<compile_context>
chip_gen: v6e
topology: v6e:2x2x1
jax: 0.10.0
libtpu: 0.0.40
codegen_flags: <defaults>
</compile_context>

<pallas_src>
import numpy as np
import jax
import jax.numpy as jnp
from jax.experimental import pallas as pl
from jax.experimental.pallas import tpu as pltpu

HP = 128          # lane-padded hidden width
MP = 128          # lane-padded MLP hidden width
OUT_LANES = 128   # lane-padded readout output width
_BN_EVAL = float(1.0 / np.sqrt(1.0 + 1e-5))   # BatchNorm1d eval, default running stats

VMEM_SPEC = pl.BlockSpec(memory_space=pltpu.MemorySpace.VMEM)


def _round_up(x, m):
    return ((x + m - 1) // m) * m


# ----------------------------------------------------------------------------
# Fused recurrent propagation kernel (all rounds x levels x gate types in ONE call)
# ----------------------------------------------------------------------------
def fused_levels_kernel(
    # scalar prefetch (SMEM)
    var_ref, gate_ref,
    # per-step streamed tensors (bf16): compact adjacency, one-hot gather
    a_ref, g_ref,
    # initial states (f32)
    hs0_ref, hf0_ref,
    # structural aggregator MLP stacks (variant: 0 AND-fwd, 1 NOT-fwd, 2 AND-bwd, 3 NOT-bwd)
    ws1, bs1, ws2, bs2, ws3, bs3,
    # functional aggregator MLP stacks (layer-1 split into hs-half / hf-half -> no concat)
    wf1s, wf1f, bf1, wf2, bf2, wf3, bf3,
    # GRU stacks (gate-type: 0 AND, 1 NOT)
    wih_s, whh_s, bih_s, bhh_s,
    wih_f, whh_f, bih_f, bhh_f,
    # outputs: double duty as the VMEM-resident f32 state (constant-index out_specs)
    hs_out, hf_out,
):
    r_id = pl.program_id(0)
    t = pl.program_id(1)

    @pl.when((r_id == 0) & (t == 0))
    def _init():
        hs_out[...] = hs0_ref[...]
        hf_out[...] = hf0_ref[...]

    v = var_ref[t]      # aggregator variant
    g = gate_ref[t]     # GRU selector (0 AND, 1 NOT)

    hs = hs_out[...]                       # (Np, HP) f32 resident state
    hf = hf_out[...]
    hs_b = hs.astype(jnp.bfloat16)
    hf_b = hf.astype(jnp.bfloat16)

    A = a_ref[0]                           # (R, Np) bf16: dst-row x src-col multiplicities
    Gm = g_ref[0]                          # (R, Np) bf16: one-hot gather of active rows

    def mm(a, b):                          # bf16 MXU matmul, f32 accumulation
        return jnp.dot(a, b, preferred_element_type=jnp.float32)

    def bf(x):
        return x.astype(jnp.bfloat16)

    # structural aggregator MLP over all (source) nodes
    y = jnp.maximum(mm(hs_b, ws1[v]) + bs1[v], 0.0)
    y = jnp.maximum(mm(bf(y), ws2[v]) + bs2[v], 0.0)
    y_s = bf(mm(bf(y), ws3[v]) + bs3[v])

    # functional aggregator MLP (layer 1 split across hs/hf; zero hs-half for NOT variants)
    y = jnp.maximum(mm(hs_b, wf1s[v]) + mm(hf_b, wf1f[v]) + bf1[v], 0.0)
    y = jnp.maximum(mm(bf(y), wf2[v]) + bf2[v], 0.0)
    y_f = bf(mm(bf(y), wf3[v]) + bf3[v])

    # scatter-add aggregation to the active destinations == compact adjacency matmul
    msg_s = mm(A, y_s)                     # (R, HP) f32
    msg_f = mm(A, y_f)
    hs_a = mm(Gm, hs_b)                    # gathered hidden states of the active rows
    hf_a = mm(Gm, hf_b)

    def gru(x, h, wih, whh, bih, bhh):
        # PyTorch GRU gate order (r, z, n); gate slices are 128-lane aligned.
        # Matmuls in bf16, all elementwise math in f32 (v5e has no bf16 VPU/EUP path).
        gi = mm(bf(x), wih) + bih
        gh = mm(bf(h), whh) + bhh
        r = jax.nn.sigmoid(gi[:, 0:HP] + gh[:, 0:HP])
        z = jax.nn.sigmoid(gi[:, HP:2 * HP] + gh[:, HP:2 * HP])
        n = jnp.tanh(gi[:, 2 * HP:3 * HP] + r * gh[:, 2 * HP:3 * HP])
        return (1.0 - z) * n + z * h

    hs_new = gru(msg_s, hs_a, wih_s[g], whh_s[g], bih_s[g], bhh_s[g])
    hf_new = gru(msg_f, hf_a, wih_f[g], whh_f[g], bih_f[g], bhh_f[g])

    # scatter the R updated rows back (delta trick: inactive & padded rows get +0 exactly)
    dn = (((0,), (0,)), ((), ()))          # contract G axis 0 with delta axis 0  -> (Np, HP)
    hs_out[...] = hs + jax.lax.dot_general(Gm, bf(hs_new - hs_a), dn,
                                           preferred_element_type=jnp.float32)
    hf_out[...] = hf + jax.lax.dot_general(Gm, bf(hf_new - hf_a), dn,
                                           preferred_element_type=jnp.float32)


def run_fused_levels(step_meta, hs0, hf0, agg_stacks, gru_stacks, num_rounds):
    if step_meta is None or num_rounds == 0:
        return hs0, hf0
    var_arr, gate_arr, a_all, g_all = step_meta
    n_steps = int(var_arr.shape[0])
    Np = hs0.shape[0]

    def const_spec(shape):
        nd = len(shape)
        return pl.BlockSpec(tuple(shape), lambda r, t, var, gt, _nd=nd: (0,) * _nd)

    def step_spec(shape):
        return pl.BlockSpec((1,) + tuple(shape[1:]), lambda r, t, var, gt: (t, 0, 0))

    arrays = [a_all, g_all, hs0, hf0, *agg_stacks, *gru_stacks]
    in_specs = [step_spec(a_all.shape), step_spec(g_all.shape),
                const_spec(hs0.shape), const_spec(hf0.shape)]
    in_specs += [const_spec(w.shape) for w in list(agg_stacks) + list(gru_stacks)]

    grid_spec = pltpu.PrefetchScalarGridSpec(
        num_scalar_prefetch=2,
        grid=(num_rounds, n_steps),
        in_specs=in_specs,
        out_specs=(const_spec((Np, HP)), const_spec((Np, HP))),
    )
    return pl.pallas_call(
        fused_levels_kernel,
        out_shape=(jax.ShapeDtypeStruct((Np, HP), jnp.float32),
                   jax.ShapeDtypeStruct((Np, HP), jnp.float32)),
        grid_spec=grid_spec,
        compiler_params=pltpu.CompilerParams(
            dimension_semantics=("arbitrary", "arbitrary"),   # serial recurrence
            vmem_limit_bytes=32 * 1024 * 1024),               # v7x-safe budget (64 MiB phys)
    )(var_arr, gate_arr, *arrays)


# ----------------------------------------------------------------------------
# Fused readout kernel (prob + redundant + rc heads in one call)
# BatchNorm eval scale is folded into the weights host-side; outputs are 128-lane slabs.
# ----------------------------------------------------------------------------
def readout_kernel(hf_ref, p0_ref, p1_ref,
                   pw1, pb1, pw2, pb2, pw3, pb3,
                   rw1, rb1, rw2, rb2, rw3, rb3,
                   cw1a, cw1b, cb1, cw2, cb2, cw3, cb3,
                   prob_ref, red_ref, rc_ref):
    def mm(a, b):
        return jnp.dot(a, b, preferred_element_type=jnp.float32)

    def bf(x):
        return x.astype(jnp.bfloat16)

    hf = bf(hf_ref[...])
    # prob head: Linear -> BN(eval, folded) -> ReLU -> Linear -> BN -> ReLU -> Linear
    h = jnp.maximum(mm(hf, pw1[...]) + pb1[...], 0.0)
    h = jnp.maximum(mm(bf(h), pw2[...]) + pb2[...], 0.0)
    prob_ref[...] = mm(bf(h), pw3[...]) + pb3[...]
    # redundant head: no BN, sigmoid at the end
    h = jnp.maximum(mm(hf, rw1[...]) + rb1[...], 0.0)
    h = jnp.maximum(mm(bf(h), rw2[...]) + rb2[...], 0.0)
    red_ref[...] = jax.nn.sigmoid(mm(bf(h), rw3[...]) + rb3[...])
    # rc head: concat-free split first layer, BN folded, sigmoid
    h = jnp.maximum(mm(bf(p0_ref[...]), cw1a[...]) + mm(bf(p1_ref[...]), cw1b[...])
                    + cb1[...], 0.0)
    h = jnp.maximum(mm(bf(h), cw2[...]) + cb2[...], 0.0)
    rc_ref[...] = jax.nn.sigmoid(mm(bf(h), cw3[...]) + cb3[...])


def run_readouts(hf_full, p0, p1, prob_params, red_params, rc_params):
    Np = hf_full.shape[0]
    Pp = p0.shape[0]
    inputs = [hf_full, p0, p1, *prob_params, *red_params, *rc_params]
    out_shape = (jax.ShapeDtypeStruct((Np, OUT_LANES), jnp.float32),
                 jax.ShapeDtypeStruct((Np, OUT_LANES), jnp.float32),
                 jax.ShapeDtypeStruct((Pp, OUT_LANES), jnp.float32))
    return pl.pallas_call(
        readout_kernel,
        out_shape=out_shape,
        in_specs=[VMEM_SPEC] * len(inputs),
        out_specs=(VMEM_SPEC, VMEM_SPEC, VMEM_SPEC),
    )(*inputs)


# ----------------------------------------------------------------------------
# Host-side metadata + parameter padding / stacking (done once)
# ----------------------------------------------------------------------------
def _build_step_metadata(gate, forward_level, backward_level, edge_index, Np):
    src, dst = np.asarray(edge_index[0]), np.asarray(edge_index[1])
    and_mask = gate == 1
    not_mask = gate == 2

    sets = []  # (active_indices, variant, gate_idx, reverse)
    for level in range(1, int(forward_level.max()) + 1):
        lm = forward_level == level
        for gate_idx, gmask, variant in ((0, and_mask, 0), (1, not_mask, 1)):
            active = np.nonzero(lm & gmask)[0]
            if active.size:
                sets.append((active, variant, gate_idx, False))
    for level in range(1, int(backward_level.max()) + 1):
        lm = backward_level == level
        for gate_idx, gmask, variant in ((0, and_mask, 2), (1, not_mask, 3)):
            active = np.nonzero(lm & gmask)[0]
            if active.size:
                sets.append((active, variant, gate_idx, True))
    if not sets:
        return None

    R = max(16, _round_up(max(len(s[0]) for s in sets), 16))   # sublane-aligned for bf16
    n_steps = len(sets)
    A_all = np.zeros((n_steps, R, Np), np.float32)
    G_all = np.zeros((n_steps, R, Np), np.float32)
    variants = np.zeros((n_steps,), np.int32)
    gates = np.zeros((n_steps,), np.int32)
    for t, (active, variant, gate_idx, reverse) in enumerate(sets):
        variants[t] = variant
        gates[t] = gate_idx
        row = {int(n): ri for ri, n in enumerate(active)}
        for s, d in zip(src, dst):
            if (not reverse) and int(d) in row:
                A_all[t, row[int(d)], int(s)] += 1.0     # forward: src -> dst
            elif reverse and int(s) in row:
                A_all[t, row[int(s)], int(d)] += 1.0     # backward: dst -> src
        for ri, n in enumerate(active):
            G_all[t, ri, int(n)] = 1.0
    # bf16 holds integers exactly up to 256; AIG multiplicities are tiny
    assert A_all.max() < 256.0, "edge multiplicity too large for bf16 adjacency"

    return (jnp.asarray(variants), jnp.asarray(gates),
            jnp.asarray(A_all, jnp.bfloat16),
            jnp.asarray(G_all, jnp.bfloat16))


def _pad2(a, rows, cols, dtype=jnp.float32):
    a = jnp.asarray(a, jnp.float32)
    a = jnp.pad(a, ((0, rows - a.shape[0]), (0, cols - a.shape[1])))
    return a.astype(dtype)


def _stack_strc_mlps(param_sets):
    ws1 = jnp.stack([_pad2(p[0], HP, MP, jnp.bfloat16) for p in param_sets])
    bs1 = jnp.stack([_pad2(p[1], 1, MP) for p in param_sets])
    ws2 = jnp.stack([_pad2(p[2], MP, MP, jnp.bfloat16) for p in param_sets])
    bs2 = jnp.stack([_pad2(p[3], 1, MP) for p in param_sets])
    ws3 = jnp.stack([_pad2(p[4], MP, HP, jnp.bfloat16) for p in param_sets])
    bs3 = jnp.stack([_pad2(p[5], 1, HP) for p in param_sets])
    return ws1, bs1, ws2, bs2, ws3, bs3


def _stack_func_mlps(param_sets, dim_hidden):
    w1s_list, w1f_list = [], []
    for p in param_sets:
        w1 = jnp.asarray(p[0], jnp.float32)
        if w1.shape[0] == 2 * dim_hidden:    # input = [hs, hf]
            w1s, w1f = w1[:dim_hidden], w1[dim_hidden:]
        else:                                # input = hf only
            w1s, w1f = jnp.zeros_like(w1), w1
        w1s_list.append(_pad2(w1s, HP, MP, jnp.bfloat16))
        w1f_list.append(_pad2(w1f, HP, MP, jnp.bfloat16))
    wf1s = jnp.stack(w1s_list)
    wf1f = jnp.stack(w1f_list)
    bf1 = jnp.stack([_pad2(p[1], 1, MP) for p in param_sets])
    wf2 = jnp.stack([_pad2(p[2], MP, MP, jnp.bfloat16) for p in param_sets])
    bf2 = jnp.stack([_pad2(p[3], 1, MP) for p in param_sets])
    wf3 = jnp.stack([_pad2(p[4], MP, HP, jnp.bfloat16) for p in param_sets])
    bf3 = jnp.stack([_pad2(p[5], 1, HP) for p in param_sets])
    return wf1s, wf1f, bf1, wf2, bf2, wf3, bf3


def _pad_gru_mat(w, rows_pad, dim_hidden):
    # (rows, 3H) -> (rows_pad, 3*HP); each H-wide gate block starts on a 128-lane boundary
    w = jnp.asarray(w, jnp.float32)
    rows = w.shape[0]
    out = jnp.zeros((rows_pad, 3 * HP), jnp.float32)
    for gk in range(3):
        out = out.at[:rows, gk * HP:gk * HP + dim_hidden].set(
            w[:, gk * dim_hidden:(gk + 1) * dim_hidden])
    return out


def _stack_grus(gru_list, dim_hidden):
    wih = jnp.stack([_pad_gru_mat(p[0], HP, dim_hidden) for p in gru_list]).astype(jnp.bfloat16)
    whh = jnp.stack([_pad_gru_mat(p[1], HP, dim_hidden) for p in gru_list]).astype(jnp.bfloat16)
    bih = jnp.stack([_pad_gru_mat(p[2], 1, dim_hidden) for p in gru_list])
    bhh = jnp.stack([_pad_gru_mat(p[3], 1, dim_hidden) for p in gru_list])
    return wih, whh, bih, bhh


def _pad_readout(p, bn_scale):
    # Fold eval-mode BatchNorm scale into layers 1 & 2; final linear is unscaled.
    w1, b1, w2, b2, w3, b3 = [jnp.asarray(a, jnp.float32) for a in p]
    s = bn_scale
    return (_pad2(w1 * s, HP, MP, jnp.bfloat16), _pad2(b1 * s, 1, MP),
            _pad2(w2 * s, MP, MP, jnp.bfloat16), _pad2(b2 * s, 1, MP),
            _pad2(w3, MP, OUT_LANES, jnp.bfloat16), _pad2(b3, 1, OUT_LANES))


def _pad_readout_rc(p, dim_hidden, bn_scale):
    w1, b1, w2, b2, w3, b3 = [jnp.asarray(a, jnp.float32) for a in p]
    s = bn_scale
    return (_pad2(w1[:dim_hidden] * s, HP, MP, jnp.bfloat16),
            _pad2(w1[dim_hidden:] * s, HP, MP, jnp.bfloat16),
            _pad2(b1 * s, 1, MP),
            _pad2(w2 * s, MP, MP, jnp.bfloat16), _pad2(b2 * s, 1, MP),
            _pad2(w3, MP, OUT_LANES, jnp.bfloat16), _pad2(b3, 1, OUT_LANES))


def _compute_backward_level(num_nodes, edge_index):
    succ = [[] for _ in range(num_nodes)]
    for s, d in zip(edge_index[0], edge_index[1]):
        succ[int(s)].append(int(d))
    level = np.zeros(num_nodes, np.int32)
    changed = True
    while changed:
        changed = False
        for v in range(num_nodes):
            lv = 0 if not succ[v] else 1 + max(int(level[d]) for d in succ[v])
            if lv != level[v]:
                level[v] = lv
                changed = True
    return level


# ----------------------------------------------------------------------------
# Deterministic parameter init (PyTorch-default-style uniform)
# ----------------------------------------------------------------------------
def linear_init(key, in_dim, out_dim):
    kw, kb = jax.random.split(key)
    bound = 1.0 / np.sqrt(in_dim)
    w = jax.random.uniform(kw, (in_dim, out_dim), jnp.float32, -bound, bound)
    b = jax.random.uniform(kb, (1, out_dim), jnp.float32, -bound, bound)
    return w, b


def mlp3_init(key, in_dim, hid, out_dim):
    k1, k2, k3 = jax.random.split(key, 3)
    w1, b1 = linear_init(k1, in_dim, hid)
    w2, b2 = linear_init(k2, hid, hid)
    w3, b3 = linear_init(k3, hid, out_dim)
    return (w1, b1, w2, b2, w3, b3)


def gru_init(key, H):
    k1, k2, k3, k4 = jax.random.split(key, 4)
    bound = 1.0 / np.sqrt(H)
    wih = jax.random.uniform(k1, (H, 3 * H), jnp.float32, -bound, bound)
    whh = jax.random.uniform(k2, (H, 3 * H), jnp.float32, -bound, bound)
    bih = jax.random.uniform(k3, (1, 3 * H), jnp.float32, -bound, bound)
    bhh = jax.random.uniform(k4, (1, 3 * H), jnp.float32, -bound, bound)
    return (wih, whh, bih, bhh)


# ----------------------------------------------------------------------------
# MLPGate2 forward
# ----------------------------------------------------------------------------
def mlpgate_forward(params, graph, dim_hidden, dim_mlp, num_rounds):
    del dim_mlp  # real mlp width is carried by the parameter shapes (padded to MP)
    N = int(graph["num_nodes"])
    gate = np.asarray(graph["gate"])
    forward_level = np.asarray(graph["forward_level"])
    backward_level = np.asarray(graph["backward_level"])
    edge_index = np.asarray(graph["edge_index"])
    rc_pair = np.asarray(graph["rc_pair_index"])
    H = dim_hidden

    Np = max(128, _round_up(N, 128))   # lane-dense node axis for streamed A/G columns

    # per-(level, gate-type, direction) step metadata, built once (reused across rounds)
    step_meta = _build_step_metadata(gate, forward_level, backward_level, edge_index, Np)

    # stacked, lane-padded parameters (weights bf16 for MXU, biases f32)
    agg_stacks = (
        *_stack_strc_mlps([params["aggr_and_strc"], params["aggr_not_strc"],
                           params["aggr_and_strc_b"], params["aggr_not_strc_b"]]),
        *_stack_func_mlps([params["aggr_and_func"], params["aggr_not_func"],
                           params["aggr_and_func_b"], params["aggr_not_func_b"]], H),
    )
    gru_stacks = (
        *_stack_grus([params["update_and_strc"], params["update_not_strc"]], H),
        *_stack_grus([params["update_and_func"], params["update_not_func"]], H),
    )

    # initial states: disable_encode path (hs = 0); hf = Linear(1,H)(1) broadcast
    hs0 = jnp.zeros((Np, HP), jnp.float32)
    w_emd, b_emd = params["hf_emd_int"]
    hf_row = w_emd[0, :] + b_emd[0, :]
    hf0 = jnp.zeros((Np, HP), jnp.float32).at[:, :H].set(
        jnp.broadcast_to(hf_row, (Np, H)))

    hs_full, hf_full = run_fused_levels(step_meta, hs0, hf0, agg_stacks, gru_stacks,
                                        num_rounds)

    # readouts (eval mode), single fused call; BN folded, 128-lane output slabs
    P = rc_pair.shape[1]
    Pp = max(8, _round_up(P, 8))
    p0 = jnp.zeros((Pp, HP), jnp.float32).at[:P].set(hs_full[jnp.asarray(rc_pair[0])])
    p1 = jnp.zeros((Pp, HP), jnp.float32).at[:P].set(hs_full[jnp.asarray(rc_pair[1])])

    prob_p, red_p, rc_p = run_readouts(
        hf_full, p0, p1,
        _pad_readout(params["readout_prob"], _BN_EVAL),
        _pad_readout(params["readout_redundant"], 1.0),
        _pad_readout_rc(params["readout_rc"], H, _BN_EVAL))

    hs = hs_full[:N, :H]
    hf = hf_full[:N, :H]
    prob = prob_p[:N, :1]
    has_redundant = red_p[:N, :2]
    is_rc = rc_p[:P, :1]
    return hs, hf, prob, is_rc, has_redundant


# ----------------------------------------------------------------------------
# Main
# ----------------------------------------------------------------------------
if __name__ == "__main__":
    dim_hidden = 32
    dim_mlp = 32
    num_rounds = 1

    # Small synthetic AIG-like circuit (gate: 0=PI, 1=AND, 2=NOT)
    gate = np.array([0, 0, 0, 0, 1, 1, 1, 2, 1, 1, 2, 1], np.int32)
    forward_level = np.array([0, 0, 0, 0, 1, 1, 1, 1, 2, 2, 2, 3], np.int32)
    edge_index = np.array([
        [0, 1, 1, 2, 2, 3, 3, 4, 5, 6, 7, 5, 8, 10],    # src
        [4, 4, 5, 5, 6, 6, 7, 8, 8, 9, 9, 10, 11, 11],  # dst
    ], np.int32)
    rc_pair_index = np.array([[4, 8, 11], [5, 9, 6]], np.int32)
    N = gate.shape[0]
    backward_level = _compute_backward_level(N, edge_index)
    graph = dict(num_nodes=N, gate=gate, forward_level=forward_level,
                 backward_level=backward_level, edge_index=edge_index,
                 rc_pair_index=rc_pair_index)

    key = jax.random.PRNGKey(0)
    keys = jax.random.split(key, 16)
    params = {
        "hf_emd_int":        linear_init(keys[0], 1, dim_hidden),
        "aggr_and_strc":     mlp3_init(keys[1], dim_hidden, dim_mlp, dim_hidden),
        "aggr_and_func":     mlp3_init(keys[2], 2 * dim_hidden, dim_mlp, dim_hidden),
        "aggr_not_strc":     mlp3_init(keys[3], dim_hidden, dim_mlp, dim_hidden),
        "aggr_not_func":     mlp3_init(keys[4], dim_hidden, dim_mlp, dim_hidden),
        "aggr_and_strc_b":   mlp3_init(keys[5], dim_hidden, dim_mlp, dim_hidden),
        "aggr_and_func_b":   mlp3_init(keys[6], 2 * dim_hidden, dim_mlp, dim_hidden),
        "aggr_not_strc_b":   mlp3_init(keys[7], dim_hidden, dim_mlp, dim_hidden),
        "aggr_not_func_b":   mlp3_init(keys[8], dim_hidden, dim_mlp, dim_hidden),
        "update_and_strc":   gru_init(keys[9], dim_hidden),
        "update_and_func":   gru_init(keys[10], dim_hidden),
        "update_not_strc":   gru_init(keys[11], dim_hidden),
        "update_not_func":   gru_init(keys[12], dim_hidden),
        "readout_prob":      mlp3_init(keys[13], dim_hidden, dim_mlp, 1),
        "readout_redundant": mlp3_init(keys[14], dim_hidden, dim_mlp, 2),
        "readout_rc":        mlp3_init(keys[15], 2 * dim_hidden, dim_mlp, 1),
    }

    outs = mlpgate_forward(params, graph, dim_hidden, dim_mlp, num_rounds)
    jax.block_until_ready(outs)
    max_sim = 0  # disable_encode path
    print("KERNEL_OK")
</pallas_src>

<mosaic_0001>
module attributes {stable_mosaic.version = 11 : i64} {
  func.func @fused_levels_kernel(%arg0: i32, %arg1: i32, %arg2: memref<8xi32, #tpu.memory_space<smem>>, %arg3: memref<8xi32, #tpu.memory_space<smem>>, %arg4: memref<1x16x128xbf16, #tpu.memory_space<vmem>>, %arg5: memref<1x16x128xbf16, #tpu.memory_space<vmem>>, %arg6: memref<128x128xf32, #tpu.memory_space<vmem>>, %arg7: memref<128x128xf32, #tpu.memory_space<vmem>>, %arg8: memref<4x128x128xbf16, #tpu.memory_space<vmem>>, %arg9: memref<4x1x128xf32, #tpu.memory_space<vmem>>, %arg10: memref<4x128x128xbf16, #tpu.memory_space<vmem>>, %arg11: memref<4x1x128xf32, #tpu.memory_space<vmem>>, %arg12: memref<4x128x128xbf16, #tpu.memory_space<vmem>>, %arg13: memref<4x1x128xf32, #tpu.memory_space<vmem>>, %arg14: memref<4x128x128xbf16, #tpu.memory_space<vmem>>, %arg15: memref<4x128x128xbf16, #tpu.memory_space<vmem>>, %arg16: memref<4x1x128xf32, #tpu.memory_space<vmem>>, %arg17: memref<4x128x128xbf16, #tpu.memory_space<vmem>>, %arg18: memref<4x1x128xf32, #tpu.memory_space<vmem>>, %arg19: memref<4x128x128xbf16, #tpu.memory_space<vmem>>, %arg20: memref<4x1x128xf32, #tpu.memory_space<vmem>>, %arg21: memref<2x128x384xbf16, #tpu.memory_space<vmem>>, %arg22: memref<2x128x384xbf16, #tpu.memory_space<vmem>>, %arg23: memref<2x1x384xf32, #tpu.memory_space<vmem>>, %arg24: memref<2x1x384xf32, #tpu.memory_space<vmem>>, %arg25: memref<2x128x384xbf16, #tpu.memory_space<vmem>>, %arg26: memref<2x128x384xbf16, #tpu.memory_space<vmem>>, %arg27: memref<2x1x384xf32, #tpu.memory_space<vmem>>, %arg28: memref<2x1x384xf32, #tpu.memory_space<vmem>>, %arg29: memref<128x128xf32, #tpu.memory_space<vmem>>, %arg30: memref<128x128xf32, #tpu.memory_space<vmem>>) attributes {dimension_semantics = [#tpu.dimension_semantics<arbitrary>, #tpu.dimension_semantics<arbitrary>], iteration_bounds = array<i64: 1, 8>, scalar_prefetch = 2 : i64, scratch_operands = 0 : i64, tpu.core_type = #tpu.core_type<tc>, window_params = [{transform_indices = @transform_0, window_bounds = array<i64: 1, 16, 128>}, {transform_indices = @transform_1, window_bounds = array<i64: 1, 16, 128>}, {pipeline_mode = #tpu.pipeline_mode<synchronous>, transform_indices = @transform_2, window_bounds = array<i64: 128, 128>}, {pipeline_mode = #tpu.pipeline_mode<synchronous>, transform_indices = @transform_3, window_bounds = array<i64: 128, 128>}, {pipeline_mode = #tpu.pipeline_mode<synchronous>, transform_indices = @transform_4, window_bounds = array<i64: 4, 128, 128>}, {pipeline_mode = #tpu.pipeline_mode<synchronous>, transform_indices = @transform_5, window_bounds = array<i64: 4, 1, 128>}, {pipeline_mode = #tpu.pipeline_mode<synchronous>, transform_indices = @transform_6, window_bounds = array<i64: 4, 128, 128>}, {pipeline_mode = #tpu.pipeline_mode<synchronous>, transform_indices = @transform_7, window_bounds = array<i64: 4, 1, 128>}, {pipeline_mode = #tpu.pipeline_mode<synchronous>, transform_indices = @transform_8, window_bounds = array<i64: 4, 128, 128>}, {pipeline_mode = #tpu.pipeline_mode<synchronous>, transform_indices = @transform_9, window_bounds = array<i64: 4, 1, 128>}, {pipeline_mode = #tpu.pipeline_mode<synchronous>, transform_indices = @transform_10, window_bounds = array<i64: 4, 128, 128>}, {pipeline_mode = #tpu.pipeline_mode<synchronous>, transform_indices = @transform_11, window_bounds = array<i64: 4, 128, 128>}, {pipeline_mode = #tpu.pipeline_mode<synchronous>, transform_indices = @transform_12, window_bounds = array<i64: 4, 1, 128>}, {pipeline_mode = #tpu.pipeline_mode<synchronous>, transform_indices = @transform_13, window_bounds = array<i64: 4, 128, 128>}, {pipeline_mode = #tpu.pipeline_mode<synchronous>, transform_indices = @transform_14, window_bounds = array<i64: 4, 1, 128>}, {pipeline_mode = #tpu.pipeline_mode<synchronous>, transform_indices = @transform_15, window_bounds = array<i64: 4, 128, 128>}, {pipeline_mode = #tpu.pipeline_mode<synchronous>, transform_indices = @transform_16, window_bounds = array<i64: 4, 1, 128>}, {pipeline_mode = #tpu.pipeline_mode<synchronous>, transform_indices = @transform_17, window_bounds = array<i64: 2, 128, 384>}, {pipeline_mode = #tpu.pipeline_mode<synchronous>, transform_indices = @transform_18, window_bounds = array<i64: 2, 128, 384>}, {pipeline_mode = #tpu.pipeline_mode<synchronous>, transform_indices = @transform_19, window_bounds = array<i64: 2, 1, 384>}, {pipeline_mode = #tpu.pipeline_mode<synchronous>, transform_indices = @transform_20, window_bounds = array<i64: 2, 1, 384>}, {pipeline_mode = #tpu.pipeline_mode<synchronous>, transform_indices = @transform_21, window_bounds = array<i64: 2, 128, 384>}, {pipeline_mode = #tpu.pipeline_mode<synchronous>, transform_indices = @transform_22, window_bounds = array<i64: 2, 128, 384>}, {pipeline_mode = #tpu.pipeline_mode<synchronous>, transform_indices = @transform_23, window_bounds = array<i64: 2, 1, 384>}, {pipeline_mode = #tpu.pipeline_mode<synchronous>, transform_indices = @transform_24, window_bounds = array<i64: 2, 1, 384>}, {pipeline_mode = #tpu.pipeline_mode<synchronous>, transform_indices = @transform_25, window_bounds = array<i64: 128, 128>}, {pipeline_mode = #tpu.pipeline_mode<synchronous>, transform_indices = @transform_26, window_bounds = array<i64: 128, 128>}]} {
    %c0_i32 = arith.constant 0 : i32
    %0 = arith.cmpi eq, %arg0, %c0_i32 : i32
    %c0_i32_0 = arith.constant 0 : i32
    %1 = arith.cmpi eq, %arg1, %c0_i32_0 : i32
    %2 = arith.andi %0, %1 : i1
    %3 = arith.extui %2 : i1 to i32
    %c0_i32_1 = arith.constant 0 : i32
    %4 = arith.cmpi ne, %3, %c0_i32_1 : i32
    scf.if %4 {
      %c0_83 = arith.constant 0 : index
      %c0_84 = arith.constant 0 : index
      %196 = vector.load %arg6[%c0_83, %c0_84] : memref<128x128xf32, #tpu.memory_space<vmem>>, vector<128x128xf32>
      %c0_85 = arith.constant 0 : index
      %c0_86 = arith.constant 0 : index
      %197 = vector.load %arg29[%c0_85, %c0_86] : memref<128x128xf32, #tpu.memory_space<vmem>>, vector<128x128xf32>
      tpu.vector_store %arg29[%c0_85, %c0_86], %196 {strides = array<i32>} : memref<128x128xf32, #tpu.memory_space<vmem>>, vector<128x128xf32>,
      %c0_87 = arith.constant 0 : index
      %c0_88 = arith.constant 0 : index
      %198 = vector.load %arg7[%c0_87, %c0_88] : memref<128x128xf32, #tpu.memory_space<vmem>>, vector<128x128xf32>
      %c0_89 = arith.constant 0 : index
      %c0_90 = arith.constant 0 : index
      %199 = vector.load %arg30[%c0_89, %c0_90] : memref<128x128xf32, #tpu.memory_space<vmem>>, vector<128x128xf32>
      tpu.vector_store %arg30[%c0_89, %c0_90], %198 {strides = array<i32>} : memref<128x128xf32, #tpu.memory_space<vmem>>, vector<128x128xf32>,
    } else {
    }
    %5 = arith.index_cast %arg1 : i32 to index
    %6 = memref.load %arg2[%5] : memref<8xi32, #tpu.memory_space<smem>>
    %7 = arith.index_cast %arg1 : i32 to index
    %8 = memref.load %arg3[%7] : memref<8xi32, #tpu.memory_space<smem>>
    %c0 = arith.constant 0 : index
    %c0_2 = arith.constant 0 : index
    %9 = vector.load %arg29[%c0, %c0_2] : memref<128x128xf32, #tpu.memory_space<vmem>>, vector<128x128xf32>
    %c0_3 = arith.constant 0 : index
    %c0_4 = arith.constant 0 : index
    %10 = vector.load %arg30[%c0_3, %c0_4] : memref<128x128xf32, #tpu.memory_space<vmem>>, vector<128x128xf32>
    %11 = arith.truncf %9 : vector<128x128xf32> to vector<128x128xbf16>
    %12 = arith.truncf %10 : vector<128x128xf32> to vector<128x128xbf16>
    %c0_5 = arith.constant 0 : index
    %c0_6 = arith.constant 0 : index
    %c0_7 = arith.constant 0 : index
    %13 = vector.load %arg4[%c0_5, %c0_6, %c0_7] : memref<1x16x128xbf16, #tpu.memory_space<vmem>>, vector<1x16x128xbf16>
    %14 = vector.shape_cast %13 : vector<1x16x128xbf16> to vector<16x128xbf16>
    %c0_8 = arith.constant 0 : index
    %c0_9 = arith.constant 0 : index
    %c0_10 = arith.constant 0 : index
    %15 = vector.load %arg5[%c0_8, %c0_9, %c0_10] : memref<1x16x128xbf16, #tpu.memory_space<vmem>>, vector<1x16x128xbf16>
    %16 = vector.shape_cast %15 : vector<1x16x128xbf16> to vector<16x128xbf16>
    %17 = arith.index_cast %6 : i32 to index
    %c0_11 = arith.constant 0 : index
    %c0_12 = arith.constant 0 : index
    %18 = vector.load %arg8[%17, %c0_11, %c0_12] : memref<4x128x128xbf16, #tpu.memory_space<vmem>>, vector<1x128x128xbf16>
    %19 = vector.shape_cast %18 : vector<1x128x128xbf16> to vector<128x128xbf16>
    %cst = arith.constant dense<0.000000e+00> : vector<128x128xf32>
    %20 = tpu.matmul %11, %19, %cst {dimension_numbers = #tpu.dot_dimension_numbers<[1], [0], [0], [1], [0, 0, 1, 1], [], []>} : vector<128x128xbf16>, vector<128x128xbf16>, vector<128x128xf32> -> vector<128x128xf32>
    %21 = arith.index_cast %6 : i32 to index
    %c0_13 = arith.constant 0 : index
    %c0_14 = arith.constant 0 : index
    %22 = vector.load %arg9[%21, %c0_13, %c0_14] : memref<4x1x128xf32, #tpu.memory_space<vmem>>, vector<1x1x128xf32>
    %23 = vector.shape_cast %22 : vector<1x1x128xf32> to vector<1x128xf32>
    %24 = vector.broadcast %23 : vector<1x128xf32> to vector<128x128xf32>
    %25 = arith.addf %20, %24 : vector<128x128xf32>
    %cst_15 = arith.constant 0.000000e+00 : f32
    %26 = vector.broadcast %cst_15 : f32 to vector<128x128xf32>
    %27 = arith.maximumf %25, %26 : vector<128x128xf32>
    %28 = arith.truncf %27 : vector<128x128xf32> to vector<128x128xbf16>
    %29 = arith.index_cast %6 : i32 to index
    %c0_16 = arith.constant 0 : index
    %c0_17 = arith.constant 0 : index
    %30 = vector.load %arg10[%29, %c0_16, %c0_17] : memref<4x128x128xbf16, #tpu.memory_space<vmem>>, vector<1x128x128xbf16>
    %31 = vector.shape_cast %30 : vector<1x128x128xbf16> to vector<128x128xbf16>
    %cst_18 = arith.constant dense<0.000000e+00> : vector<128x128xf32>
    %32 = tpu.matmul %28, %31, %cst_18 {dimension_numbers = #tpu.dot_dimension_numbers<[1], [0], [0], [1], [0, 0, 1, 1], [], []>} : vector<128x128xbf16>, vector<128x128xbf16>, vector<128x128xf32> -> vector<128x128xf32>
    %33 = arith.index_cast %6 : i32 to index
    %c0_19 = arith.constant 0 : index
    %c0_20 = arith.constant 0 : index
    %34 = vector.load %arg11[%33, %c0_19, %c0_20] : memref<4x1x128xf32, #tpu.memory_space<vmem>>, vector<1x1x128xf32>
    %35 = vector.shape_cast %34 : vector<1x1x128xf32> to vector<1x128xf32>
    %36 = vector.broadcast %35 : vector<1x128xf32> to vector<128x128xf32>
    %37 = arith.addf %32, %36 : vector<128x128xf32>
    %cst_21 = arith.constant 0.000000e+00 : f32
    %38 = vector.broadcast %cst_21 : f32 to vector<128x128xf32>
    %39 = arith.maximumf %37, %38 : vector<128x128xf32>
    %40 = arith.truncf %39 : vector<128x128xf32> to vector<128x128xbf16>
    %41 = arith.index_cast %6 : i32 to index
    %c0_22 = arith.constant 0 : index
    %c0_23 = arith.constant 0 : index
    %42 = vector.load %arg12[%41, %c0_22, %c0_23] : memref<4x128x128xbf16, #tpu.memory_space<vmem>>, vector<1x128x128xbf16>
    %43 = vector.shape_cast %42 : vector<1x128x128xbf16> to vector<128x128xbf16>
    %cst_24 = arith.constant dense<0.000000e+00> : vector<128x128xf32>
    %44 = tpu.matmul %40, %43, %cst_24 {dimension_numbers = #tpu.dot_dimension_numbers<[1], [0], [0], [1], [0, 0, 1, 1], [], []>} : vector<128x128xbf16>, vector<128x128xbf16>, vector<128x128xf32> -> vector<128x128xf32>
    %45 = arith.index_cast %6 : i32 to index
    %c0_25 = arith.constant 0 : index
    %c0_26 = arith.constant 0 : index
    %46 = vector.load %arg13[%45, %c0_25, %c0_26] : memref<4x1x128xf32, #tpu.memory_space<vmem>>, vector<1x1x128xf32>
    %47 = vector.shape_cast %46 : vector<1x1x128xf32> to vector<1x128xf32>
    %48 = vector.broadcast %47 : vector<1x128xf32> to vector<128x128xf32>
    %49 = arith.addf %44, %48 : vector<128x128xf32>
    %50 = arith.truncf %49 : vector<128x128xf32> to vector<128x128xbf16>
    %51 = arith.index_cast %6 : i32 to index
    %c0_27 = arith.constant 0 : index
    %c0_28 = arith.constant 0 : index
    %52 = vector.load %arg14[%51, %c0_27, %c0_28] : memref<4x128x128xbf16, #tpu.memory_space<vmem>>, vector<1x128x128xbf16>
    %53 = vector.shape_cast %52 : vector<1x128x128xbf16> to vector<128x128xbf16>
    %cst_29 = arith.constant dense<0.000000e+00> : vector<128x128xf32>
    %54 = tpu.matmul %11, %53, %cst_29 {dimension_numbers = #tpu.dot_dimension_numbers<[1], [0], [0], [1], [0, 0, 1, 1], [], []>} : vector<128x128xbf16>, vector<128x128xbf16>, vector<128x128xf32> -> vector<128x128xf32>
    %55 = arith.index_cast %6 : i32 to index
    %c0_30 = arith.constant 0 : index
    %c0_31 = arith.constant 0 : index
    %56 = vector.load %arg15[%55, %c0_30, %c0_31] : memref<4x128x128xbf16, #tpu.memory_space<vmem>>, vector<1x128x128xbf16>
    %57 = vector.shape_cast %56 : vector<1x128x128xbf16> to vector<128x128xbf16>
    %cst_32 = arith.constant dense<0.000000e+00> : vector<128x128xf32>
    %58 = tpu.matmul %12, %57, %cst_32 {dimension_numbers = #tpu.dot_dimension_numbers<[1], [0], [0], [1], [0, 0, 1, 1], [], []>} : vector<128x128xbf16>, vector<128x128xbf16>, vector<128x128xf32> -> vector<128x128xf32>
    %59 = arith.addf %54, %58 : vector<128x128xf32>
    %60 = arith.index_cast %6 : i32 to index
    %c0_33 = arith.constant 0 : index
    %c0_34 = arith.constant 0 : index
    %61 = vector.load %arg16[%60, %c0_33, %c0_34] : memref<4x1x128xf32, #tpu.memory_space<vmem>>, vector<1x1x128xf32>
    %62 = vector.shape_cast %61 : vector<1x1x128xf32> to vector<1x128xf32>
    %63 = vector.broadcast %62 : vector<1x128xf32> to vector<128x128xf32>
    %64 = arith.addf %59, %63 : vector<128x128xf32>
    %cst_35 = arith.constant 0.000000e+00 : f32
    %65 = vector.broadcast %cst_35 : f32 to vector<128x128xf32>
    %66 = arith.maximumf %64, %65 : vector<128x128xf32>
    %67 = arith.truncf %66 : vector<128x128xf32> to vector<128x128xbf16>
    %68 = arith.index_cast %6 : i32 to index
    %c0_36 = arith.constant 0 : index
    %c0_37 = arith.constant 0 : index
    %69 = vector.load %arg17[%68, %c0_36, %c0_37] : memref<4x128x128xbf16, #tpu.memory_space<vmem>>, vector<1x128x128xbf16>
    %70 = vector.shape_cast %69 : vector<1x128x128xbf16> to vector<128x128xbf16>
    %cst_38 = arith.constant dense<0.000000e+00> : vector<128x128xf32>
    %71 = tpu.matmul %67, %70, %cst_38 {dimension_numbers = #tpu.dot_dimension_numbers<[1], [0], [0], [1], [0, 0, 1, 1], [], []>} : vector<128x128xbf16>, vector<128x128xbf16>, vector<128x128xf32> -> vector<128x128xf32>
    %72 = arith.index_cast %6 : i32 to index
    %c0_39 = arith.constant 0 : index
    %c0_40 = arith.constant 0 : index
    %73 = vector.load %arg18[%72, %c0_39, %c0_40] : memref<4x1x128xf32, #tpu.memory_space<vmem>>, vector<1x1x128xf32>
    %74 = vector.shape_cast %73 : vector<1x1x128xf32> to vector<1x128xf32>
    %75 = vector.broadcast %74 : vector<1x128xf32> to vector<128x128xf32>
    %76 = arith.addf %71, %75 : vector<128x128xf32>
    %cst_41 = arith.constant 0.000000e+00 : f32
    %77 = vector.broadcast %cst_41 : f32 to vector<128x128xf32>
    %78 = arith.maximumf %76, %77 : vector<128x128xf32>
    %79 = arith.truncf %78 : vector<128x128xf32> to vector<128x128xbf16>
    %80 = arith.index_cast %6 : i32 to index
    %c0_42 = arith.constant 0 : index
    %c0_43 = arith.constant 0 : index
    %81 = vector.load %arg19[%80, %c0_42, %c0_43] : memref<4x128x128xbf16, #tpu.memory_space<vmem>>, vector<1x128x128xbf16>
    %82 = vector.shape_cast %81 : vector<1x128x128xbf16> to vector<128x128xbf16>
    %cst_44 = arith.constant dense<0.000000e+00> : vector<128x128xf32>
    %83 = tpu.matmul %79, %82, %cst_44 {dimension_numbers = #tpu.dot_dimension_numbers<[1], [0], [0], [1], [0, 0, 1, 1], [], []>} : vector<128x128xbf16>, vector<128x128xbf16>, vector<128x128xf32> -> vector<128x128xf32>
    %84 = arith.index_cast %6 : i32 to index
    %c0_45 = arith.constant 0 : index
    %c0_46 = arith.constant 0 : index
    %85 = vector.load %arg20[%84, %c0_45, %c0_46] : memref<4x1x128xf32, #tpu.memory_space<vmem>>, vector<1x1x128xf32>
    %86 = vector.shape_cast %85 : vector<1x1x128xf32> to vector<1x128xf32>
    %87 = vector.broadcast %86 : vector<1x128xf32> to vector<128x128xf32>
    %88 = arith.addf %83, %87 : vector<128x128xf32>
    %89 = arith.truncf %88 : vector<128x128xf32> to vector<128x128xbf16>
    %cst_47 = arith.constant dense<0.000000e+00> : vector<16x128xf32>
    %90 = tpu.matmul %14, %50, %cst_47 {dimension_numbers = #tpu.dot_dimension_numbers<[1], [0], [0], [1], [0, 0, 1, 1], [], []>} : vector<16x128xbf16>, vector<128x128xbf16>, vector<16x128xf32> -> vector<16x128xf32>
    %cst_48 = arith.constant dense<0.000000e+00> : vector<16x128xf32>
    %91 = tpu.matmul %14, %89, %cst_48 {dimension_numbers = #tpu.dot_dimension_numbers<[1], [0], [0], [1], [0, 0, 1, 1], [], []>} : vector<16x128xbf16>, vector<128x128xbf16>, vector<16x128xf32> -> vector<16x128xf32>
    %cst_49 = arith.constant dense<0.000000e+00> : vector<16x128xf32>
    %92 = tpu.matmul %16, %11, %cst_49 {dimension_numbers = #tpu.dot_dimension_numbers<[1], [0], [0], [1], [0, 0, 1, 1], [], []>} : vector<16x128xbf16>, vector<128x128xbf16>, vector<16x128xf32> -> vector<16x128xf32>
    %cst_50 = arith.constant dense<0.000000e+00> : vector<16x128xf32>
    %93 = tpu.matmul %16, %12, %cst_50 {dimension_numbers = #tpu.dot_dimension_numbers<[1], [0], [0], [1], [0, 0, 1, 1], [], []>} : vector<16x128xbf16>, vector<128x128xbf16>, vector<16x128xf32> -> vector<16x128xf32>
    %94 = arith.index_cast %8 : i32 to index
    %c0_51 = arith.constant 0 : index
    %c0_52 = arith.constant 0 : index
    %95 = vector.load %arg21[%94, %c0_51, %c0_52] : memref<2x128x384xbf16, #tpu.memory_space<vmem>>, vector<1x128x384xbf16>
    %96 = vector.shape_cast %95 : vector<1x128x384xbf16> to vector<128x384xbf16>
    %97 = arith.index_cast %8 : i32 to index
    %c0_53 = arith.constant 0 : index
    %c0_54 = arith.constant 0 : index
    %98 = vector.load %arg22[%97, %c0_53, %c0_54] : memref<2x128x384xbf16, #tpu.memory_space<vmem>>, vector<1x128x384xbf16>
    %99 = vector.shape_cast %98 : vector<1x128x384xbf16> to vector<128x384xbf16>
    %100 = arith.index_cast %8 : i32 to index
    %c0_55 = arith.constant 0 : index
    %c0_56 = arith.constant 0 : index
    %101 = vector.load %arg23[%100, %c0_55, %c0_56] : memref<2x1x384xf32, #tpu.memory_space<vmem>>, vector<1x1x384xf32>
    %102 = vector.shape_cast %101 : vector<1x1x384xf32> to vector<1x384xf32>
    %103 = arith.index_cast %8 : i32 to index
    %c0_57 = arith.constant 0 : index
    %c0_58 = arith.constant 0 : index
    %104 = vector.load %arg24[%103, %c0_57, %c0_58] : memref<2x1x384xf32, #tpu.memory_space<vmem>>, vector<1x1x384xf32>
    %105 = vector.shape_cast %104 : vector<1x1x384xf32> to vector<1x384xf32>
    %106 = arith.truncf %90 : vector<16x128xf32> to vector<16x128xbf16>
    %cst_59 = arith.constant dense<0.000000e+00> : vector<16x384xf32>
    %107 = tpu.matmul %106, %96, %cst_59 {dimension_numbers = #tpu.dot_dimension_numbers<[1], [0], [0], [1], [0, 0, 1, 1], [], []>} : vector<16x128xbf16>, vector<128x384xbf16>, vector<16x384xf32> -> vector<16x384xf32>
    %108 = vector.broadcast %102 : vector<1x384xf32> to vector<16x384xf32>
    %109 = arith.addf %107, %108 : vector<16x384xf32>
    %110 = arith.truncf %92 : vector<16x128xf32> to vector<16x128xbf16>
    %cst_60 = arith.constant dense<0.000000e+00> : vector<16x384xf32>
    %111 = tpu.matmul %110, %99, %cst_60 {dimension_numbers = #tpu.dot_dimension_numbers<[1], [0], [0], [1], [0, 0, 1, 1], [], []>} : vector<16x128xbf16>, vector<128x384xbf16>, vector<16x384xf32> -> vector<16x384xf32>
    %112 = vector.broadcast %105 : vector<1x384xf32> to vector<16x384xf32>
    %113 = arith.addf %111, %112 : vector<16x384xf32>
    %114 = vector.extract_strided_slice %109 {offsets = [0, 0], sizes = [16, 128], strides = [1, 1]} : vector<16x384xf32> to vector<16x128xf32>
    %115 = vector.extract_strided_slice %113 {offsets = [0, 0], sizes = [16, 128], strides = [1, 1]} : vector<16x384xf32> to vector<16x128xf32>
    %116 = arith.addf %114, %115 : vector<16x128xf32>
    %117 = arith.negf %116 : vector<16x128xf32>
    %118 = math.exp %117 : vector<16x128xf32>
    %cst_61 = arith.constant 1.000000e+00 : f32
    %119 = vector.broadcast %cst_61 : f32 to vector<16x128xf32>
    %120 = arith.addf %119, %118 : vector<16x128xf32>
    %121 = arith.divf %119, %120 : vector<16x128xf32>
    %122 = vector.extract_strided_slice %109 {offsets = [0, 128], sizes = [16, 128], strides = [1, 1]} : vector<16x384xf32> to vector<16x128xf32>
    %123 = vector.extract_strided_slice %113 {offsets = [0, 128], sizes = [16, 128], strides = [1, 1]} : vector<16x384xf32> to vector<16x128xf32>
    %124 = arith.addf %122, %123 : vector<16x128xf32>
    %125 = arith.negf %124 : vector<16x128xf32>
    %126 = math.exp %125 : vector<16x128xf32>
    %cst_62 = arith.constant 1.000000e+00 : f32
    %127 = vector.broadcast %cst_62 : f32 to vector<16x128xf32>
    %128 = arith.addf %127, %126 : vector<16x128xf32>
    %129 = arith.divf %127, %128 : vector<16x128xf32>
    %130 = vector.extract_strided_slice %109 {offsets = [0, 256], sizes = [16, 128], strides = [1, 1]} : vector<16x384xf32> to vector<16x128xf32>
    %131 = vector.extract_strided_slice %113 {offsets = [0, 256], sizes = [16, 128], strides = [1, 1]} : vector<16x384xf32> to vector<16x128xf32>
    %132 = arith.mulf %121, %131 : vector<16x128xf32>
    %133 = arith.addf %130, %132 : vector<16x128xf32>
    %134 = math.tanh %133 : vector<16x128xf32>
    %cst_63 = arith.constant 1.000000e+00 : f32
    %135 = vector.broadcast %cst_63 : f32 to vector<16x128xf32>
    %136 = arith.subf %135, %129 : vector<16x128xf32>
    %137 = arith.mulf %136, %134 : vector<16x128xf32>
    %138 = arith.mulf %129, %92 : vector<16x128xf32>
    %139 = arith.addf %137, %138 : vector<16x128xf32>
    %140 = arith.index_cast %8 : i32 to index
    %c0_64 = arith.constant 0 : index
    %c0_65 = arith.constant 0 : index
    %141 = vector.load %arg25[%140, %c0_64, %c0_65] : memref<2x128x384xbf16, #tpu.memory_space<vmem>>, vector<1x128x384xbf16>
    %142 = vector.shape_cast %141 : vector<1x128x384xbf16> to vector<128x384xbf16>
    %143 = arith.index_cast %8 : i32 to index
    %c0_66 = arith.constant 0 : index
    %c0_67 = arith.constant 0 : index
    %144 = vector.load %arg26[%143, %c0_66, %c0_67] : memref<2x128x384xbf16, #tpu.memory_space<vmem>>, vector<1x128x384xbf16>
    %145 = vector.shape_cast %144 : vector<1x128x384xbf16> to vector<128x384xbf16>
    %146 = arith.index_cast %8 : i32 to index
    %c0_68 = arith.constant 0 : index
    %c0_69 = arith.constant 0 : index
    %147 = vector.load %arg27[%146, %c0_68, %c0_69] : memref<2x1x384xf32, #tpu.memory_space<vmem>>, vector<1x1x384xf32>
    %148 = vector.shape_cast %147 : vector<1x1x384xf32> to vector<1x384xf32>
    %149 = arith.index_cast %8 : i32 to index
    %c0_70 = arith.constant 0 : index
    %c0_71 = arith.constant 0 : index
    %150 = vector.load %arg28[%149, %c0_70, %c0_71] : memref<2x1x384xf32, #tpu.memory_space<vmem>>, vector<1x1x384xf32>
    %151 = vector.shape_cast %150 : vector<1x1x384xf32> to vector<1x384xf32>
    %152 = arith.truncf %91 : vector<16x128xf32> to vector<16x128xbf16>
    %cst_72 = arith.constant dense<0.000000e+00> : vector<16x384xf32>
    %153 = tpu.matmul %152, %142, %cst_72 {dimension_numbers = #tpu.dot_dimension_numbers<[1], [0], [0], [1], [0, 0, 1, 1], [], []>} : vector<16x128xbf16>, vector<128x384xbf16>, vector<16x384xf32> -> vector<16x384xf32>
    %154 = vector.broadcast %148 : vector<1x384xf32> to vector<16x384xf32>
    %155 = arith.addf %153, %154 : vector<16x384xf32>
    %156 = arith.truncf %93 : vector<16x128xf32> to vector<16x128xbf16>
    %cst_73 = arith.constant dense<0.000000e+00> : vector<16x384xf32>
    %157 = tpu.matmul %156, %145, %cst_73 {dimension_numbers = #tpu.dot_dimension_numbers<[1], [0], [0], [1], [0, 0, 1, 1], [], []>} : vector<16x128xbf16>, vector<128x384xbf16>, vector<16x384xf32> -> vector<16x384xf32>
    %158 = vector.broadcast %151 : vector<1x384xf32> to vector<16x384xf32>
    %159 = arith.addf %157, %158 : vector<16x384xf32>
    %160 = vector.extract_strided_slice %155 {offsets = [0, 0], sizes = [16, 128], strides = [1, 1]} : vector<16x384xf32> to vector<16x128xf32>
    %161 = vector.extract_strided_slice %159 {offsets = [0, 0], sizes = [16, 128], strides = [1, 1]} : vector<16x384xf32> to vector<16x128xf32>
    %162 = arith.addf %160, %161 : vector<16x128xf32>
    %163 = arith.negf %162 : vector<16x128xf32>
    %164 = math.exp %163 : vector<16x128xf32>
    %cst_74 = arith.constant 1.000000e+00 : f32
    %165 = vector.broadcast %cst_74 : f32 to vector<16x128xf32>
    %166 = arith.addf %165, %164 : vector<16x128xf32>
    %167 = arith.divf %165, %166 : vector<16x128xf32>
    %168 = vector.extract_strided_slice %155 {offsets = [0, 128], sizes = [16, 128], strides = [1, 1]} : vector<16x384xf32> to vector<16x128xf32>
    %169 = vector.extract_strided_slice %159 {offsets = [0, 128], sizes = [16, 128], strides = [1, 1]} : vector<16x384xf32> to vector<16x128xf32>
    %170 = arith.addf %168, %169 : vector<16x128xf32>
    %171 = arith.negf %170 : vector<16x128xf32>
    %172 = math.exp %171 : vector<16x128xf32>
    %cst_75 = arith.constant 1.000000e+00 : f32
    %173 = vector.broadcast %cst_75 : f32 to vector<16x128xf32>
    %174 = arith.addf %173, %172 : vector<16x128xf32>
    %175 = arith.divf %173, %174 : vector<16x128xf32>
    %176 = vector.extract_strided_slice %155 {offsets = [0, 256], sizes = [16, 128], strides = [1, 1]} : vector<16x384xf32> to vector<16x128xf32>
    %177 = vector.extract_strided_slice %159 {offsets = [0, 256], sizes = [16, 128], strides = [1, 1]} : vector<16x384xf32> to vector<16x128xf32>
    %178 = arith.mulf %167, %177 : vector<16x128xf32>
    %179 = arith.addf %176, %178 : vector<16x128xf32>
    %180 = math.tanh %179 : vector<16x128xf32>
    %cst_76 = arith.constant 1.000000e+00 : f32
    %181 = vector.broadcast %cst_76 : f32 to vector<16x128xf32>
    %182 = arith.subf %181, %175 : vector<16x128xf32>
    %183 = arith.mulf %182, %180 : vector<16x128xf32>
    %184 = arith.mulf %175, %93 : vector<16x128xf32>
    %185 = arith.addf %183, %184 : vector<16x128xf32>
    %186 = arith.subf %139, %92 : vector<16x128xf32>
    %187 = arith.truncf %186 : vector<16x128xf32> to vector<16x128xbf16>
    %cst_77 = arith.constant dense<0.000000e+00> : vector<128x128xf32>
    %188 = tpu.matmul %16, %187, %cst_77 {dimension_numbers = #tpu.dot_dimension_numbers<[0], [0], [1], [1], [0, 1, 1, 1], [], []>} : vector<16x128xbf16>, vector<16x128xbf16>, vector<128x128xf32> -> vector<128x128xf32>
    %189 = arith.addf %9, %188 : vector<128x128xf32>
    %c0_78 = arith.constant 0 : index
    %c0_79 = arith.constant 0 : index
    %190 = vector.load %arg29[%c0_78, %c0_79] : memref<128x128xf32, #tpu.memory_space<vmem>>, vector<128x128xf32>
    tpu.vector_store %arg29[%c0_78, %c0_79], %189 {strides = array<i32>} : memref<128x128xf32, #tpu.memory_space<vmem>>, vector<128x128xf32>,
    %191 = arith.subf %185, %93 : vector<16x128xf32>
    %192 = arith.truncf %191 : vector<16x128xf32> to vector<16x128xbf16>
    %cst_80 = arith.constant dense<0.000000e+00> : vector<128x128xf32>
    %193 = tpu.matmul %16, %192, %cst_80 {dimension_numbers = #tpu.dot_dimension_numbers<[0], [0], [1], [1], [0, 1, 1, 1], [], []>} : vector<16x128xbf16>, vector<16x128xbf16>, vector<128x128xf32> -> vector<128x128xf32>
    %194 = arith.addf %10, %193 : vector<128x128xf32>
    %c0_81 = arith.constant 0 : index
    %c0_82 = arith.constant 0 : index
    %195 = vector.load %arg30[%c0_81, %c0_82] : memref<128x128xf32, #tpu.memory_space<vmem>>, vector<128x128xf32>
    tpu.vector_store %arg30[%c0_81, %c0_82], %194 {strides = array<i32>} : memref<128x128xf32, #tpu.memory_space<vmem>>, vector<128x128xf32>,
    return
  }
  func.func @transform_0(%arg0: i32, %arg1: i32, %arg2: memref<8xi32, #tpu.memory_space<smem>>, %arg3: memref<8xi32, #tpu.memory_space<smem>>) -> (i32, i32, i32) {
    %c0_i32 = arith.constant 0 : i32
    %c0_i32_0 = arith.constant 0 : i32
    %c0_i32_1 = arith.constant 0 : i32
    return %arg1, %c0_i32, %c0_i32_0 : i32, i32, i32
  }
  func.func @transform_1(%arg0: i32, %arg1: i32, %arg2: memref<8xi32, #tpu.memory_space<smem>>, %arg3: memref<8xi32, #tpu.memory_space<smem>>) -> (i32, i32, i32) {
    %c0_i32 = arith.constant 0 : i32
    %c0_i32_0 = arith.constant 0 : i32
    %c0_i32_1 = arith.constant 0 : i32
    return %arg1, %c0_i32, %c0_i32_0 : i32, i32, i32
  }
  func.func @transform_2(%arg0: i32, %arg1: i32, %arg2: memref<8xi32, #tpu.memory_space<smem>>, %arg3: memref<8xi32, #tpu.memory_space<smem>>) -> (i32, i32) {
    %c0_i32 = arith.constant 0 : i32
    %c0_i32_0 = arith.constant 0 : i32
    %c0_i32_1 = arith.constant 0 : i32
    return %c0_i32, %c0_i32_0 : i32, i32
  }
  func.func @transform_3(%arg0: i32, %arg1: i32, %arg2: memref<8xi32, #tpu.memory_space<smem>>, %arg3: memref<8xi32, #tpu.memory_space<smem>>) -> (i32, i32) {
    %c0_i32 = arith.constant 0 : i32
    %c0_i32_0 = arith.constant 0 : i32
    %c0_i32_1 = arith.constant 0 : i32
    return %c0_i32, %c0_i32_0 : i32, i32
  }
  func.func @transform_4(%arg0: i32, %arg1: i32, %arg2: memref<8xi32, #tpu.memory_space<smem>>, %arg3: memref<8xi32, #tpu.memory_space<smem>>) -> (i32, i32, i32) {
    %c0_i32 = arith.constant 0 : i32
    %c0_i32_0 = arith.constant 0 : i32
    %c0_i32_1 = arith.constant 0 : i32
    %c0_i32_2 = arith.constant 0 : i32
    return %c0_i32, %c0_i32_0, %c0_i32_1 : i32, i32, i32
  }
  func.func @transform_5(%arg0: i32, %arg1: i32, %arg2: memref<8xi32, #tpu.memory_space<smem>>, %arg3: memref<8xi32, #tpu.memory_space<smem>>) -> (i32, i32, i32) {
    %c0_i32 = arith.constant 0 : i32
    %c0_i32_0 = arith.constant 0 : i32
    %c0_i32_1 = arith.constant 0 : i32
    %c0_i32_2 = arith.constant 0 : i32
    return %c0_i32, %c0_i32_0, %c0_i32_1 : i32, i32, i32
  }
  func.func @transform_6(%arg0: i32, %arg1: i32, %arg2: memref<8xi32, #tpu.memory_space<smem>>, %arg3: memref<8xi32, #tpu.memory_space<smem>>) -> (i32, i32, i32) {
    %c0_i32 = arith.constant 0 : i32
    %c0_i32_0 = arith.constant 0 : i32
    %c0_i32_1 = arith.constant 0 : i32
    %c0_i32_2 = arith.constant 0 : i32
    return %c0_i32, %c0_i32_0, %c0_i32_1 : i32, i32, i32
  }
  func.func @transform_7(%arg0: i32, %arg1: i32, %arg2: memref<8xi32, #tpu.memory_space<smem>>, %arg3: memref<8xi32, #tpu.memory_space<smem>>) -> (i32, i32, i32) {
    %c0_i32 = arith.constant 0 : i32
    %c0_i32_0 = arith.constant 0 : i32
    %c0_i32_1 = arith.constant 0 : i32
    %c0_i32_2 = arith.constant 0 : i32
    return %c0_i32, %c0_i32_0, %c0_i32_1 : i32, i32, i32
  }
  func.func @transform_8(%arg0: i32, %arg1: i32, %arg2: memref<8xi32, #tpu.memory_space<smem>>, %arg3: memref<8xi32, #tpu.memory_space<smem>>) -> (i32, i32, i32) {
    %c0_i32 = arith.constant 0 : i32
    %c0_i32_0 = arith.constant 0 : i32
    %c0_i32_1 = arith.constant 0 : i32
    %c0_i32_2 = arith.constant 0 : i32
    return %c0_i32, %c0_i32_0, %c0_i32_1 : i32, i32, i32
  }
  func.func @transform_9(%arg0: i32, %arg1: i32, %arg2: memref<8xi32, #tpu.memory_space<smem>>, %arg3: memref<8xi32, #tpu.memory_space<smem>>) -> (i32, i32, i32) {
    %c0_i32 = arith.constant 0 : i32
    %c0_i32_0 = arith.constant 0 : i32
    %c0_i32_1 = arith.constant 0 : i32
    %c0_i32_2 = arith.constant 0 : i32
    return %c0_i32, %c0_i32_0, %c0_i32_1 : i32, i32, i32
  }
  func.func @transform_10(%arg0: i32, %arg1: i32, %arg2: memref<8xi32, #tpu.memory_space<smem>>, %arg3: memref<8xi32, #tpu.memory_space<smem>>) -> (i32, i32, i32) {
    %c0_i32 = arith.constant 0 : i32
    %c0_i32_0 = arith.constant 0 : i32
    %c0_i32_1 = arith.constant 0 : i32
    %c0_i32_2 = arith.constant 0 : i32
    return %c0_i32, %c0_i32_0, %c0_i32_1 : i32, i32, i32
  }
  func.func @transform_11(%arg0: i32, %arg1: i32, %arg2: memref<8xi32, #tpu.memory_space<smem>>, %arg3: memref<8xi32, #tpu.memory_space<smem>>) -> (i32, i32, i32) {
    %c0_i32 = arith.constant 0 : i32
    %c0_i32_0 = arith.constant 0 : i32
    %c0_i32_1 = arith.constant 0 : i32
    %c0_i32_2 = arith.constant 0 : i32
    return %c0_i32, %c0_i32_0, %c0_i32_1 : i32, i32, i32
  }
  func.func @transform_12(%arg0: i32, %arg1: i32, %arg2: memref<8xi32, #tpu.memory_space<smem>>, %arg3: memref<8xi32, #tpu.memory_space<smem>>) -> (i32, i32, i32) {
    %c0_i32 = arith.constant 0 : i32
    %c0_i32_0 = arith.constant 0 : i32
    %c0_i32_1 = arith.constant 0 : i32
    %c0_i32_2 = arith.constant 0 : i32
    return %c0_i32, %c0_i32_0, %c0_i32_1 : i32, i32, i32
  }
  func.func @transform_13(%arg0: i32, %arg1: i32, %arg2: memref<8xi32, #tpu.memory_space<smem>>, %arg3: memref<8xi32, #tpu.memory_space<smem>>) -> (i32, i32, i32) {
    %c0_i32 = arith.constant 0 : i32
    %c0_i32_0 = arith.constant 0 : i32
    %c0_i32_1 = arith.constant 0 : i32
    %c0_i32_2 = arith.constant 0 : i32
    return %c0_i32, %c0_i32_0, %c0_i32_1 : i32, i32, i32
  }
  func.func @transform_14(%arg0: i32, %arg1: i32, %arg2: memref<8xi32, #tpu.memory_space<smem>>, %arg3: memref<8xi32, #tpu.memory_space<smem>>) -> (i32, i32, i32) {
    %c0_i32 = arith.constant 0 : i32
    %c0_i32_0 = arith.constant 0 : i32
    %c0_i32_1 = arith.constant 0 : i32
    %c0_i32_2 = arith.constant 0 : i32
    return %c0_i32, %c0_i32_0, %c0_i32_1 : i32, i32, i32
  }
  func.func @transform_15(%arg0: i32, %arg1: i32, %arg2: memref<8xi32, #tpu.memory_space<smem>>, %arg3: memref<8xi32, #tpu.memory_space<smem>>) -> (i32, i32, i32) {
    %c0_i32 = arith.constant 0 : i32
    %c0_i32_0 = arith.constant 0 : i32
    %c0_i32_1 = arith.constant 0 : i32
    %c0_i32_2 = arith.constant 0 : i32
    return %c0_i32, %c0_i32_0, %c0_i32_1 : i32, i32, i32
  }
  func.func @transform_16(%arg0: i32, %arg1: i32, %arg2: memref<8xi32, #tpu.memory_space<smem>>, %arg3: memref<8xi32, #tpu.memory_space<smem>>) -> (i32, i32, i32) {
    %c0_i32 = arith.constant 0 : i32
    %c0_i32_0 = arith.constant 0 : i32
    %c0_i32_1 = arith.constant 0 : i32
    %c0_i32_2 = arith.constant 0 : i32
    return %c0_i32, %c0_i32_0, %c0_i32_1 : i32, i32, i32
  }
  func.func @transform_17(%arg0: i32, %arg1: i32, %arg2: memref<8xi32, #tpu.memory_space<smem>>, %arg3: memref<8xi32, #tpu.memory_space<smem>>) -> (i32, i32, i32) {
    %c0_i32 = arith.constant 0 : i32
    %c0_i32_0 = arith.constant 0 : i32
    %c0_i32_1 = arith.constant 0 : i32
    %c0_i32_2 = arith.constant 0 : i32
    return %c0_i32, %c0_i32_0, %c0_i32_1 : i32, i32, i32
  }
  func.func @transform_18(%arg0: i32, %arg1: i32, %arg2: memref<8xi32, #tpu.memory_space<smem>>, %arg3: memref<8xi32, #tpu.memory_space<smem>>) -> (i32, i32, i32) {
    %c0_i32 = arith.constant 0 : i32
    %c0_i32_0 = arith.constant 0 : i32
    %c0_i32_1 = arith.constant 0 : i32
    %c0_i32_2 = arith.constant 0 : i32
    return %c0_i32, %c0_i32_0, %c0_i32_1 : i32, i32, i32
  }
  func.func @transform_19(%arg0: i32, %arg1: i32, %arg2: memref<8xi32, #tpu.memory_space<smem>>, %arg3: memref<8xi32, #tpu.memory_space<smem>>) -> (i32, i32, i32) {
    %c0_i32 = arith.constant 0 : i32
    %c0_i32_0 = arith.constant 0 : i32
    %c0_i32_1 = arith.constant 0 : i32
    %c0_i32_2 = arith.constant 0 : i32
    return %c0_i32, %c0_i32_0, %c0_i32_1 : i32, i32, i32
  }
  func.func @transform_20(%arg0: i32, %arg1: i32, %arg2: memref<8xi32, #tpu.memory_space<smem>>, %arg3: memref<8xi32, #tpu.memory_space<smem>>) -> (i32, i32, i32) {
    %c0_i32 = arith.constant 0 : i32
    %c0_i32_0 = arith.constant 0 : i32
    %c0_i32_1 = arith.constant 0 : i32
    %c0_i32_2 = arith.constant 0 : i32
    return %c0_i32, %c0_i32_0, %c0_i32_1 : i32, i32, i32
  }
  func.func @transform_21(%arg0: i32, %arg1: i32, %arg2: memref<8xi32, #tpu.memory_space<smem>>, %arg3: memref<8xi32, #tpu.memory_space<smem>>) -> (i32, i32, i32) {
    %c0_i32 = arith.constant 0 : i32
    %c0_i32_0 = arith.constant 0 : i32
    %c0_i32_1 = arith.constant 0 : i32
    %c0_i32_2 = arith.constant 0 : i32
    return %c0_i32, %c0_i32_0, %c0_i32_1 : i32, i32, i32
  }
  func.func @transform_22(%arg0: i32, %arg1: i32, %arg2: memref<8xi32, #tpu.memory_space<smem>>, %arg3: memref<8xi32, #tpu.memory_space<smem>>) -> (i32, i32, i32) {
    %c0_i32 = arith.constant 0 : i32
    %c0_i32_0 = arith.constant 0 : i32
    %c0_i32_1 = arith.constant 0 : i32
    %c0_i32_2 = arith.constant 0 : i32
    return %c0_i32, %c0_i32_0, %c0_i32_1 : i32, i32, i32
  }
  func.func @transform_23(%arg0: i32, %arg1: i32, %arg2: memref<8xi32, #tpu.memory_space<smem>>, %arg3: memref<8xi32, #tpu.memory_space<smem>>) -> (i32, i32, i32) {
    %c0_i32 = arith.constant 0 : i32
    %c0_i32_0 = arith.constant 0 : i32
    %c0_i32_1 = arith.constant 0 : i32
    %c0_i32_2 = arith.constant 0 : i32
    return %c0_i32, %c0_i32_0, %c0_i32_1 : i32, i32, i32
  }
  func.func @transform_24(%arg0: i32, %arg1: i32, %arg2: memref<8xi32, #tpu.memory_space<smem>>, %arg3: memref<8xi32, #tpu.memory_space<smem>>) -> (i32, i32, i32) {
    %c0_i32 = arith.constant 0 : i32
    %c0_i32_0 = arith.constant 0 : i32
    %c0_i32_1 = arith.constant 0 : i32
    %c0_i32_2 = arith.constant 0 : i32
    return %c0_i32, %c0_i32_0, %c0_i32_1 : i32, i32, i32
  }
  func.func @transform_25(%arg0: i32, %arg1: i32, %arg2: memref<8xi32, #tpu.memory_space<smem>>, %arg3: memref<8xi32, #tpu.memory_space<smem>>) -> (i32, i32) {
    %c0_i32 = arith.constant 0 : i32
    %c0_i32_0 = arith.constant 0 : i32
    %c0_i32_1 = arith.constant 0 : i32
    return %c0_i32, %c0_i32_0 : i32, i32
  }
  func.func @transform_26(%arg0: i32, %arg1: i32, %arg2: memref<8xi32, #tpu.memory_space<smem>>, %arg3: memref<8xi32, #tpu.memory_space<smem>>) -> (i32, i32) {
    %c0_i32 = arith.constant 0 : i32
    %c0_i32_0 = arith.constant 0 : i32
    %c0_i32_1 = arith.constant 0 : i32
    return %c0_i32, %c0_i32_0 : i32, i32
  }
}

</mosaic_0001>

<bundles_post_ra>
// kernel: tpu_custom_call.1
= control target key start
LH: loop header
LB: loop body
LE: loop exit
PB: predicated region body
PF: predicated region fallthrough
CT: control target
= control target key end

     0   :  { %s6556_s30 = smov [#allocation4]   ;;  %s7697_s0 = inlined_call_operand.hbm [shape: s32[8], index: 0, kind: input, shape index: {}]   ;;  %s7698_s2 = inlined_call_operand.hbm [shape: bf16[8,16,128], index: 2, kind: input, shape index: {}]   ;;  %s7699_s3 = inlined_call_operand.hbm [shape: bf16[8,16,128], index: 3, kind: input, shape index: {}]   ;;  %s7700_s4 = inlined_call_operand.hbm [shape: f32[128,128], index: 4, kind: input, shape index: {}]   ;;  %s7701_s5 = inlined_call_operand.hbm [shape: f32[128,128], index: 5, kind: input, shape index: {}]   ;;  %s7702_s6 = inlined_call_operand.hbm [shape: bf16[4,128,128], index: 6, kind: input, shape index: {}]   ;;  %s7703_s7 = inlined_call_operand.hbm [shape: f32[4,1,128], index: 7, kind: input, shape index: {}]   ;;  %s7704_s8 = inlined_call_operand.hbm [shape: bf16[4,128,128], index: 8, kind: input, shape index: {}]   ;;  %s7705_s9 = inlined_call_operand.hbm [shape: f32[4,1,128], index: 9, kind: input, shape index: {}]   ;;  %s7706_s10 = inlined_call_operand.hbm [shape: bf16[4,128,128], index: 10, kind: input, shape index: {}]   ;;  %s7707_s11 = inlined_call_operand.hbm [shape: f32[4,1,128], index: 11, kind: input, shape index: {}]   ;;  %s7708_s12 = inlined_call_operand.hbm [shape: bf16[4,128,128], index: 12, kind: input, shape index: {}]   ;;  %s7709_s13 = inlined_call_operand.hbm [shape: bf16[4,128,128], index: 13, kind: input, shape index: {}]   ;;  %s7710_s14 = inlined_call_operand.hbm [shape: f32[4,1,128], index: 14, kind: input, shape index: {}]   ;;  %s7711_s15 = inlined_call_operand.hbm [shape: bf16[4,128,128], index: 15, kind: input, shape index: {}]   ;;  %s7712_s16 = inlined_call_operand.vmem [shape: f32[4,1,128], index: 16, kind: input, shape index: {}]   ;;  %s7713_s17 = inlined_call_operand.hbm [shape: bf16[4,128,128], index: 17, kind: input, shape index: {}]   ;;  %s7714_s18 = inlined_call_operand.vmem [shape: f32[4,1,128], index: 18, kind: input, shape index: {}]   ;;  %s7715_s19 = inlined_call_operand.hbm [shape: bf16[2,128,384], index: 19, kind: input, shape index: {}]   ;;  %s7716_s20 = inlined_call_operand.hbm [shape: bf16[2,128,384], index: 20, kind: input, shape index: {}]   ;;  %s7717_s21 = inlined_call_operand.vmem [shape: f32[2,1,384], index: 21, kind: input, shape index: {}]   ;;  %s7718_s22 = inlined_call_operand.vmem [shape: f32[2,1,384], index: 22, kind: input, shape index: {}]   ;;  %s7719_s23 = inlined_call_operand.hbm [shape: bf16[2,128,384], index: 23, kind: input, shape index: {}]   ;;  %s7720_s24 = inlined_call_operand.hbm [shape: bf16[2,128,384], index: 24, kind: input, shape index: {}]   ;;  %s7721_s25 = inlined_call_operand.vmem [shape: f32[2,1,384], index: 25, kind: input, shape index: {}]   ;;  %s7722_s26 = inlined_call_operand.vmem [shape: f32[2,1,384], index: 26, kind: input, shape index: {}]   ;;  %s7723_s27 = inlined_call_operand.hbm [shape: f32[128,128], index: 27, kind: output, shape index: {0}]   ;;  %s7724_s28 = inlined_call_operand.hbm [shape: f32[128,128], index: 28, kind: output, shape index: {1}]   ;;  %s7725_s1 = inlined_call_operand.hbm [shape: s32[8], index: 1, kind: input, shape index: {}]  }
   0x1   :  { %7740 = sst [smem:[#allocation52_spill]] %s7697_s0 }
   0x2   :  { %7741 = sst [smem:[#allocation53_spill]] %s7698_s2 }
   0x3   :  { %7742 = sst [smem:[#allocation54_spill]] %s7699_s3 }
   0x4   :  { %7743 = sst [smem:[#allocation55_spill]] %s7700_s4 }
   0x5   :  { %7744 = sst [smem:[#allocation56_spill]] %s7701_s5 }
   0x6   :  { %7745 = sst [smem:[#allocation57_spill]] %s7702_s6 }
   0x7   :  { %7746 = sst [smem:[#allocation58_spill]] %s7703_s7 }
   0x8   :  { %7747 = sst [smem:[#allocation59_spill]] %s7704_s8 }
   0x9   :  { %7748 = sst [smem:[#allocation60_spill]] %s7705_s9  ;;  %s6555_s9 = smov [#allocation3]  }
   0xa   :  { %7749 = sst [smem:[#allocation61_spill]] %s7706_s10 }
   0xb   :  { %7750 = sst [smem:[#allocation62_spill]] %s7707_s11 }
   0xc   :  { %7751 = sst [smem:[#allocation63_spill]] %s7708_s12 }
   0xd   :  { %7752 = sst [smem:[#allocation64_spill]] %s7709_s13 }
   0xe   :  { %7753 = sst [smem:[#allocation65_spill]] %s7710_s14 }
   0xf   :  { %7754 = sst [smem:[#allocation66_spill]] %s7711_s15 }
  0x10   :  { %7755 = sst [smem:[#allocation67_spill]] %s7713_s17 }
  0x11   :  { %7756 = sst [smem:[#allocation68_spill]] %s7715_s19 }
  0x12   :  { %7757 = sst [smem:[#allocation69_spill]] %s7717_s21 }
  0x13   :  { %7758 = sst [smem:[#allocation70_spill]] %s7718_s22 }
  0x14   :  { %7759 = sst [smem:[#allocation71_spill]] %s7721_s25 }
  0x15   :  { %7760 = sst [smem:[#allocation72_spill]] %s7722_s26 }
  0x16   :  { %7761 = sst [smem:[#allocation73_spill]] %s7723_s27 }
  0x17   :  { %7762 = sst [smem:[#allocation74_spill]] %s7724_s28 }
  0x18   :  { %s7763_s22 = sld [smem:[#allocation52_spill]] }
  0x1e   :  { %35 = dma.hbm_to_smem %s7763_s22, 16, %s6555_s9, [#allocation2] }
  0x1f   :  { %37 = dma.hbm_to_smem %s7725_s1, 16, %s6556_s30, [#allocation2] }
  0x20   :  { %6477 = dma.done.wait [#allocation2], 32 }
  0x21   :  { %6478 = vsyncadd [#allocation2], 4294967264 }
  0x22   :  { %39 = sfence }
  0x23   :  { %40 = vsyncpa [#allocation6], 0 }
  0x24   :  { %42 = vsyncpa [#allocation6 + $0x1], 0 }
  0x25   :  { %43 = vsyncpa [#allocation9], 0 }
  0x26   :  { %45 = vsyncpa [#allocation9 + $0x1], 0 }
  0x27   :  { %46 = vsyncpa [#allocation12], 0 }
  0x28   :  { %47 = vsyncpa [#allocation15], 0 }
  0x29   :  { %48 = vsyncpa [#allocation18], 0 }
  0x2a   :  { %49 = vsyncpa [#allocation21], 0 }
  0x2b   :  { %50 = vsyncpa [#allocation24], 0 }
  0x2c   :  { %51 = vsyncpa [#allocation27], 0 }
  0x2d   :  { %52 = vsyncpa [#allocation30], 0 }
  0x2e   :  { %53 = vsyncpa [#allocation33], 0 }
  0x2f   :  { %54 = vsyncpa [#allocation7], 0 }
  0x30   :  { %55 = vsyncpa [#allocation37], 0  ;;  %s6742_s22 = smov 0   ;;  %s6744_s1 = smov 0  }
  0x31   :  { %s6746_s11 = smov 0   ;;  %s6748_s0 = smov 0  }
  0x32   :  { %s6750_s12 = smov 0   ;;  %s6752_s29 = smov 0  }
  0x33 LB: > { %s6773_s3 = sadd.s32 4294967295, %s6553_s29   ;;  %p4486_p0 = scmp.ge.s32.totalorder %s6553_s29, 1  ;;  %s6553_s29 = sphi %s6752_s29, %s61_s29   ;;  %s6549_s12 = sphi %s6750_s12, %s7824_s12   ;;  %s6545_s0 = sphi %s6748_s0, %s7823_s0   ;;  %s6541_s11 = sphi %s6746_s11, %s7822_s11   ;;  %s6537_s1 = sphi %s6744_s1, %s7821_s1   ;;  %s6533_s22 = sphi %s6742_s22, %s7820_s22  }
  0x34   : > { %p7726_p1 = scmp.eq.s32.totalorder %s6773_s3, 0  ;;  %p655_p2 = scmp.lt.s32.totalorder %s6553_s29, 9 }
  0x35   : > { %s6557_s13 = smov [#allocation10]   ;;  %s6558_s9 = smov [#allocation11]  }
  0x36   : > { %p6778_p3 = pnand %p4486_p0, %p655_p2  ;;  %s667_s2 = sshll.u32 %s6557_s13, 4  ;;  %s668_s2 = int_to_ptr.vmem [resolvable:$true] %s667_s2 }
  0x37   : > { %s680_s6 = sshll.u32 %s6558_s9, 4  ;;  %s6559_s10 = smov [#allocation14]   ;;  %s681_s6 = int_to_ptr.vmem [resolvable:$true] %s680_s6 }
  0x38   : > { %s7764_s8 = scalar_select %p6778_p3, 1, 0 }
  0x39   : > { %p5452_p4 = pneg %p6778_p3  ;;  %s706_s30 = sshll.u32 %s6559_s10, 4  ;;  %s707_s30 = int_to_ptr.vmem [resolvable:$true] %s706_s30 }
  0x3a   : > { %s5918_s7 = scalar_lea.vmem %s668_s2, 2048  ;;  %p5926_p10 = scmp.lt.s32.totalorder %s668_s2, %s668_s2 }
  0x3b   : > { %p6786_p5 = pnand %p5452_p4, %p7726_p1  ;;  %p5919_p7 = scmp.ne.s32.totalorder %s668_s2, %s5918_s7 }
  0x3c   : > { %p5927_p11 = scmp.lt.s32.totalorder %s5918_s7, %s5918_s7 }
  0x3d   : > { %p6792_p6 = pneg %p6786_p5 }
  0x3e   : > { %p5928_p12 = por %p5927_p11, %p5926_p10 }
  0x3f   : > { %p5921_p8 = pnand %p5919_p7, %p6792_p6 }
  0x41   : > { %p5922_p9 = pneg %p5921_p8 }
  0x43   : > { %p5929_p13 = pnand %p5928_p12, %p5922_p9 }
  0x45   : > { %5932 = shalt.err (!%p5929_p13)
}
  0x46   : > { %s6560_s13 = smov 128   ;;  %s6561_s9 = smov 8  }
  0x47   : > { %s7767_s27 = sld [smem:[#allocation55_spill]]  ;;  %s5944_s26 = scalar_lea.vmem %s681_s6, 2048 }
  0x48   : > { %p5945_p0 = scmp.ne.s32.totalorder %s681_s6, %s5944_s26  ;;  %p5952_p7 = scmp.lt.s32.totalorder %s681_s6, %s681_s6 }
  0x49   : > { %p5953_p8 = scmp.lt.s32.totalorder %s5944_s26, %s5944_s26 }
  0x4a   : > { %p5947_p2 = pnand %p5945_p0, %p6792_p6 }
  0x4b   : > { %p5954_p1 = por %p5953_p8, %p5952_p7 }
  0x4c   : > { %p5948_p4 = pneg %p5947_p2 }
  0x4d   : > { %5455 = dma.hbm_to_vmem [thread:$0]  (!%p6786_p5), %s7767_s27, 2048, %s668_s2, [#allocation9], %s6560_s13, %s6560_s13, %s6561_s9  }
  0x4e   : > { %p5955_p10 = pnand %p5954_p1, %p5948_p4 }
  0x50   : > { %5958 = shalt.err (!%p5955_p10)
}
  0x51   : > { %s7768_s21 = sld [smem:[#allocation56_spill]]  ;;  %s5970_s28 = scalar_lea.vmem %s707_s30, 64 }
  0x52   : > { %p5971_p9 = scmp.ne.s32.totalorder %s707_s30, %s5970_s28  ;;  %p5978_p13 = scmp.lt.s32.totalorder %s707_s30, %s707_s30 }
  0x53   : > { %p5979_p0 = scmp.lt.s32.totalorder %s5970_s28, %s5970_s28 }
  0x54   : > { %p5973_p11 = pnand %p5971_p9, %p6792_p6 }
  0x55   : > { %p5980_p2 = por %p5979_p0, %p5978_p13 }
  0x56   : > { %p5974_p12 = pneg %p5973_p11 }
  0x57   : > { %5458 = dma.hbm_to_vmem [thread:$0]  (!%p6786_p5), %s7768_s21, 2048, %s681_s6, [#allocation12], %s6560_s13, %s6560_s13, %s6561_s9  }
  0x58   : > { %p5981_p3 = pnand %p5980_p2, %p5974_p12 }
  0x5a   : > { %5984 = shalt.err (!%p5981_p3)
}
  0x5b   : > { %s7728_s26 = smov 16   ;;  %s7729_s27 = smov 1  }
  0x5c   : > { %s7769_s2 = sld [smem:[#allocation58_spill]]  ;;  %s6564_s6 = smov [#allocation17]  }
  0x5d   : > { %s732_s13 = sshll.u32 %s6564_s6, 4  ;;  %s6565_s9 = smov [#allocation20]   ;;  %s733_s13 = int_to_ptr.vmem [resolvable:$true] %s732_s13 }
  0x5e   : > { %s758_s10 = sshll.u32 %s6565_s9, 4  ;;  %s5996_s7 = scalar_lea.vmem %s733_s13, 64  ;;  %s759_s10 = int_to_ptr.vmem [resolvable:$true] %s758_s10 }
  0x5f   : > { %p5997_p1 = scmp.ne.s32.totalorder %s733_s13, %s5996_s7  ;;  %p6004_p7 = scmp.lt.s32.totalorder %s733_s13, %s733_s13 }
  0x60   : > { %p6005_p8 = scmp.lt.s32.totalorder %s5996_s7, %s5996_s7 }
  0x61   : > { %p5999_p3 = pnand %p5997_p1, %p6792_p6 }
  0x62   : > { %5464 = dma.hbm_to_vmem [thread:$0]  (!%p6786_p5), %s7769_s2, 64, %s707_s30, [#allocation15], %s7728_s26, %s7728_s26, %s7729_s27  }
  0x63   : > { %p6000_p4 = pneg %p5999_p3  ;;  %p6006_p10 = por %p6005_p8, %p6004_p7 }
  0x65   : > { %p6007_p9 = pnand %p6006_p10, %p6000_p4 }
  0x67   : > { %6010 = shalt.err (!%p6007_p9)
}
  0x68   : > { %s7770_s21 = sld [smem:[#allocation60_spill]]  ;;  %s6022_s25 = scalar_lea.vmem %s759_s10, 64 }
  0x69   : > { %p6023_p11 = scmp.ne.s32.totalorder %s759_s10, %s6022_s25  ;;  %p6030_p0 = scmp.lt.s32.totalorder %s759_s10, %s759_s10 }
  0x6a   : > { %p6031_p2 = scmp.lt.s32.totalorder %s6022_s25, %s6022_s25 }
  0x6b   : > { %p6025_p12 = pnand %p6023_p11, %p6792_p6 }
  0x6c   : > { %p6032_p1 = por %p6031_p2, %p6030_p0 }
  0x6d   : > { %p6026_p13 = pneg %p6025_p12 }
  0x6e   : > { %5470 = dma.hbm_to_vmem [thread:$0]  (!%p6786_p5), %s7770_s21, 64, %s733_s13, [#allocation18], %s7728_s26, %s7728_s26, %s7729_s27  }
  0x6f   : > { %p6033_p3 = pnand %p6032_p1, %p6026_p13 }
  0x71   : > { %6036 = shalt.err (!%p6033_p3)
}
  0x72   : > { %s7771_s9 = sld [smem:[#allocation62_spill]]  ;;  %s6566_s13 = smov [#allocation23]  }
  0x73   : > { %s784_s7 = sshll.u32 %s6566_s13, 4  ;;  %s6567_s30 = smov [#allocation26]   ;;  %s785_s7 = int_to_ptr.vmem [resolvable:$true] %s784_s7 }
  0x74   : > { %s810_s28 = sshll.u32 %s6567_s30, 4  ;;  %s6048_s21 = scalar_lea.vmem %s785_s7, 4096  ;;  %s811_s28 = int_to_ptr.vmem [resolvable:$true] %s810_s28 }
  0x75   : > { %p6049_p4 = scmp.ne.s32.totalorder %s785_s7, %s6048_s21  ;;  %p6056_p10 = scmp.lt.s32.totalorder %s785_s7, %s785_s7 }
  0x76   : > { %p6057_p9 = scmp.lt.s32.totalorder %s6048_s21, %s6048_s21 }
  0x77   : > { %p6051_p7 = pnand %p6049_p4, %p6792_p6 }
  0x78   : > { %5476 = dma.hbm_to_vmem [thread:$0]  (!%p6786_p5), %s7771_s9, 64, %s759_s10, [#allocation21], %s7728_s26, %s7728_s26, %s7729_s27  }
  0x79   : > { %p6052_p8 = pneg %p6051_p7  ;;  %p6058_p11 = por %p6057_p9, %p6056_p10 }
  0x7b   : > { %p6059_p12 = pnand %p6058_p11, %p6052_p8 }
  0x7d   : > { %6062 = shalt.err (!%p6059_p12)
}
  0x7e   : > { %s7734_s25 = smov 64   ;;  %s7736_s2 = smov 4  }
  0x7f   : > { %s7772_s9 = sld [smem:[#allocation64_spill]]  ;;  %s6074_s13 = scalar_lea.vmem %s811_s28, 4096 }
  0x80   : > { %p6075_p13 = scmp.ne.s32.totalorder %s811_s28, %s6074_s13  ;;  %p6082_p1 = scmp.lt.s32.totalorder %s811_s28, %s811_s28 }
  0x81   : > { %p6083_p3 = scmp.lt.s32.totalorder %s6074_s13, %s6074_s13 }
  0x82   : > { %p6077_p0 = pnand %p6075_p13, %p6792_p6 }
  0x83   : > { %p6084_p4 = por %p6083_p3, %p6082_p1 }
  0x84   : > { %p6078_p2 = pneg %p6077_p0 }
  0x85   : > { %5482 = dma.hbm_to_vmem [thread:$0]  (!%p6786_p5), %s7772_s9, 4096, %s785_s7, [#allocation24], %s7734_s25, %s7734_s25, %s7736_s2  }
  0x86   : > { %p6085_p7 = pnand %p6084_p4, %p6078_p2 }
  0x88   : > { %6088 = shalt.err (!%p6085_p7)
}
  0x89   : > { %s7773_s15 = sld [smem:[#allocation66_spill]]  ;;  %s6570_s7 = smov [#allocation29]  }
  0x8a   : > { %s842_s10 = sshll.u32 %s6570_s7, 4  ;;  %s843_s10 = int_to_ptr.vmem [resolvable:$true] %s842_s10 }
  0x8b   : > { %s6100_s6 = scalar_lea.vmem %s843_s10, 6144  ;;  %p6108_p11 = scmp.lt.s32.totalorder %s843_s10, %s843_s10 }
  0x8c   : > { %p6101_p8 = scmp.ne.s32.totalorder %s843_s10, %s6100_s6  ;;  %p6109_p12 = scmp.lt.s32.totalorder %s6100_s6, %s6100_s6 }
  0x8e   : > { %p6103_p10 = pnand %p6101_p8, %p6792_p6  ;;  %p6110_p13 = por %p6109_p12, %p6108_p11 }
  0x8f   : > { %5488 = dma.hbm_to_vmem [thread:$0]  (!%p6786_p5), %s7773_s15, 4096, %s811_s28, [#allocation27], %s7734_s25, %s7734_s25, %s7736_s2  }
  0x90   : > { %p6104_p9 = pneg %p6103_p10 }
  0x92   : > { %p6111_p0 = pnand %p6110_p13, %p6104_p9 }
  0x94   : > { %6114 = shalt.err (!%p6111_p0)
}
  0x95   : > { %s7730_s9 = smov 192   ;;  %s7732_s13 = smov 12  }
  0x96   : > { %s7774_s19 = sld [smem:[#allocation68_spill]]  ;;  %s6573_s21 = smov [#allocation32]  }
  0x97   : > { %s874_s7 = sshll.u32 %s6573_s21, 4  ;;  %s6574_s26 = smov [#allocation13]   ;;  %s875_s7 = int_to_ptr.vmem [resolvable:$true] %s874_s7 }
  0x98   : > { %s693_s27 = sshll.u32 %s6574_s26, 4  ;;  %s6126_s6 = scalar_lea.vmem %s875_s7, 6144  ;;  %s694_s27 = int_to_ptr.vmem [resolvable:$true] %s693_s27 }
  0x99   : > { %p6127_p2 = scmp.ne.s32.totalorder %s875_s7, %s6126_s6  ;;  %p6134_p4 = scmp.lt.s32.totalorder %s875_s7, %s875_s7 }
  0x9a   : > { %p6135_p7 = scmp.lt.s32.totalorder %s6126_s6, %s6126_s6 }
  0x9b   : > { %p6129_p1 = pnand %p6127_p2, %p6792_p6 }
  0x9c   : > { %5494 = dma.hbm_to_vmem [thread:$0]  (!%p6786_p5), %s7774_s19, 6144, %s843_s10, [#allocation30], %s7730_s9, %s7730_s9, %s7732_s13  }
  0x9d   : > { %p6130_p3 = pneg %p6129_p1  ;;  %p6136_p8 = por %p6135_p7, %p6134_p4 }
  0x9f   : > { %p6137_p10 = pnand %p6136_p8, %p6130_p3 }
  0xa1   : > { %6140 = shalt.err (!%p6137_p10)
}
  0xa2   : > { %5500 = dma.hbm_to_vmem [thread:$0]  (!%p6786_p5), %s7719_s23, 6144, %s875_s7, [#allocation33], %s7730_s9, %s7730_s9, %s7732_s13  }
  0xa3   : > { %s6152_s26 = scalar_lea.vmem %s694_s27, 4096  ;;  %p6160_p13 = scmp.lt.s32.totalorder %s694_s27, %s694_s27 }
  0xa4   : > { %p6153_p9 = scmp.ne.s32.totalorder %s694_s27, %s6152_s26  ;;  %p6161_p0 = scmp.lt.s32.totalorder %s6152_s26, %s6152_s26 }
  0xa6   : > { %p6155_p11 = pnand %p6153_p9, %p6792_p6  ;;  %p6162_p2 = por %p6161_p0, %p6160_p13 }
  0xa8   : > { %p6156_p12 = pneg %p6155_p11 }
  0xaa   : > { %p6163_p1 = pnand %p6162_p2, %p6156_p12 }
  0xac   : > { %6166 = shalt.err (!%p6163_p1)
}
  0xad   : > { %s7775_s6 = sld [smem:[#allocation57_spill]]  ;;  %s6575_s7 = smov [#allocation16]  }
  0xae   : > { %s719_s10 = sshll.u32 %s6575_s7, 4  ;;  %s6576_s28 = smov [#allocation19]   ;;  %s720_s10 = int_to_ptr.vmem [resolvable:$true] %s719_s10 }
  0xaf   : > { %s745_s9 = sshll.u32 %s6576_s28, 4  ;;  %s6178_s26 = scalar_lea.vmem %s720_s10, 4096  ;;  %s746_s9 = int_to_ptr.vmem [resolvable:$true] %s745_s9 }
  0xb0   : > { %p6179_p3 = scmp.ne.s32.totalorder %s720_s10, %s6178_s26  ;;  %p6186_p8 = scmp.lt.s32.totalorder %s720_s10, %s720_s10 }
  0xb1   : > { %p6187_p10 = scmp.lt.s32.totalorder %s6178_s26, %s6178_s26 }
  0xb2   : > { %p6181_p4 = pnand %p6179_p3, %p6792_p6 }
  0xb3   : > { %5461 = dma.hbm_to_vmem [thread:$0]  (!%p6786_p5), %s7775_s6, 4096, %s694_s27, [#allocation12], %s7734_s25, %s7734_s25, %s7736_s2  }
  0xb4   : > { %p6182_p7 = pneg %p6181_p4  ;;  %p6188_p9 = por %p6187_p10, %p6186_p8 }
  0xb6   : > { %p6189_p11 = pnand %p6188_p9, %p6182_p7 }
  0xb8   : > { %6192 = shalt.err (!%p6189_p11)
}
  0xb9   : > { %s7776_s21 = sld [smem:[#allocation59_spill]]  ;;  %s6204_s6 = scalar_lea.vmem %s746_s9, 4096 }
  0xba   : > { %p6205_p12 = scmp.ne.s32.totalorder %s746_s9, %s6204_s6  ;;  %p6212_p2 = scmp.lt.s32.totalorder %s746_s9, %s746_s9 }
  0xbb   : > { %p6213_p1 = scmp.lt.s32.totalorder %s6204_s6, %s6204_s6 }
  0xbc   : > { %p6207_p13 = pnand %p6205_p12, %p6792_p6 }
  0xbd   : > { %p6214_p3 = por %p6213_p1, %p6212_p2 }
  0xbe   : > { %p6208_p0 = pneg %p6207_p13 }
  0xbf   : > { %5467 = dma.hbm_to_vmem [thread:$0]  (!%p6786_p5), %s7776_s21, 4096, %s720_s10, [#allocation15], %s7734_s25, %s7734_s25, %s7736_s2  }
  0xc0   : > { %p6215_p4 = pnand %p6214_p3, %p6208_p0 }
  0xc2   : > { %6218 = shalt.err (!%p6215_p4)
}
  0xc3   : > { %s7777_s26 = sld [smem:[#allocation61_spill]]  ;;  %s6577_s10 = smov [#allocation22]  }
  0xc4   : > { %s771_s27 = sshll.u32 %s6577_s10, 4  ;;  %s6578_s30 = smov [#allocation25]   ;;  %s772_s27 = int_to_ptr.vmem [resolvable:$true] %s771_s27 }
  0xc5   : > { %s797_s21 = sshll.u32 %s6578_s30, 4  ;;  %s6230_s6 = scalar_lea.vmem %s772_s27, 4096  ;;  %s798_s21 = int_to_ptr.vmem [resolvable:$true] %s797_s21 }
  0xc6   : > { %p6231_p7 = scmp.ne.s32.totalorder %s772_s27, %s6230_s6  ;;  %p6238_p9 = scmp.lt.s32.totalorder %s772_s27, %s772_s27 }
  0xc7   : > { %p6239_p11 = scmp.lt.s32.totalorder %s6230_s6, %s6230_s6 }
  0xc8   : > { %p6233_p8 = pnand %p6231_p7, %p6792_p6 }
  0xc9   : > { %5473 = dma.hbm_to_vmem [thread:$0]  (!%p6786_p5), %s7777_s26, 4096, %s746_s9, [#allocation18], %s7734_s25, %s7734_s25, %s7736_s2  }
  0xca   : > { %p6234_p10 = pneg %p6233_p8  ;;  %p6240_p12 = por %p6239_p11, %p6238_p9 }
  0xcc   : > { %p6241_p13 = pnand %p6240_p12, %p6234_p10 }
  0xce   : > { %6244 = shalt.err (!%p6241_p13)
}
  0xcf   : > { %s7778_s28 = sld [smem:[#allocation63_spill]]  ;;  %s6256_s26 = scalar_lea.vmem %s798_s21, 64 }
  0xd0   : > { %p6257_p0 = scmp.ne.s32.totalorder %s798_s21, %s6256_s26  ;;  %p6264_p3 = scmp.lt.s32.totalorder %s798_s21, %s798_s21 }
  0xd1   : > { %p6265_p4 = scmp.lt.s32.totalorder %s6256_s26, %s6256_s26 }
  0xd2   : > { %p6259_p2 = pnand %p6257_p0, %p6792_p6 }
  0xd3   : > { %p6266_p7 = por %p6265_p4, %p6264_p3 }
  0xd4   : > { %p6260_p1 = pneg %p6259_p2 }
  0xd5   : > { %5479 = dma.hbm_to_vmem [thread:$0]  (!%p6786_p5), %s7778_s28, 4096, %s772_s27, [#allocation21], %s7734_s25, %s7734_s25, %s7736_s2  }
  0xd6   : > { %p6267_p8 = pnand %p6266_p7, %p6260_p1 }
  0xd8   : > { %6270 = shalt.err (!%p6267_p8)
}
  0xd9   : > { %s7779_s10 = smov 1   ;;  %s7780_s30 = smov 16  }
  0xda   : > { %s7781_s14 = sld [smem:[#allocation65_spill]]  ;;  %s6579_s27 = smov [#allocation28]  }
  0xdb   : > { %s826_s9 = sshll.u32 %s6579_s27, 4  ;;  %s6580_s7 = smov [#allocation31]   ;;  %s827_s9 = int_to_ptr.vmem [resolvable:$true] %s826_s9 }
  0xdc   : > { %s855_s28 = sshll.u32 %s6580_s7, 4  ;;  %s6282_s26 = scalar_lea.vmem %s827_s9, 4096  ;;  %s856_s28 = int_to_ptr.vmem [resolvable:$true] %s855_s28 }
  0xdd   : > { %p6283_p10 = scmp.ne.s32.totalorder %s827_s9, %s6282_s26  ;;  %p6290_p12 = scmp.lt.s32.totalorder %s827_s9, %s827_s9 }
  0xde   : > { %p6291_p13 = scmp.lt.s32.totalorder %s6282_s26, %s6282_s26 }
  0xdf   : > { %p6285_p9 = pnand %p6283_p10, %p6792_p6 }
  0xe0   : > { %5485 = dma.hbm_to_vmem [thread:$0]  (!%p6786_p5), %s7781_s14, 64, %s798_s21, [#allocation24], %s7780_s30, %s7780_s30, %s7779_s10  }
  0xe1   : > { %p6286_p11 = pneg %p6285_p9  ;;  %p6292_p0 = por %p6291_p13, %p6290_p12 }
  0xe3   : > { %p6293_p2 = pnand %p6292_p0, %p6286_p11 }
  0xe5   : > { %6296 = shalt.err (!%p6293_p2)
}
  0xe6   : > { %s7782_s17 = sld [smem:[#allocation67_spill]]  ;;  %s6308_s10 = scalar_lea.vmem %s856_s28, 6144 }
  0xe7   : > { %p6309_p1 = scmp.ne.s32.totalorder %s856_s28, %s6308_s10  ;;  %p6316_p7 = scmp.lt.s32.totalorder %s856_s28, %s856_s28 }
  0xe8   : > { %p6317_p8 = scmp.lt.s32.totalorder %s6308_s10, %s6308_s10 }
  0xe9   : > { %p6311_p3 = pnand %p6309_p1, %p6792_p6 }
  0xea   : > { %p6318_p10 = por %p6317_p8, %p6316_p7 }
  0xeb   : > { %p6312_p4 = pneg %p6311_p3 }
  0xec   : > { %5491 = dma.hbm_to_vmem [thread:$0]  (!%p6786_p5), %s7782_s17, 4096, %s827_s9, [#allocation27], %s7734_s25, %s7734_s25, %s7736_s2  }
  0xed   : > { %p6319_p9 = pnand %p6318_p10, %p6312_p4 }
  0xef   : > { %6322 = shalt.err (!%p6319_p9)
}
  0xf0   : > { %s7783_s30 = smov 12   ;;  %s7784_s6 = smov 192  }
  0xf1   : > { %5497 = dma.hbm_to_vmem [thread:$0]  (!%p6786_p5), %s7716_s20, 6144, %s856_s28, [#allocation30], %s7784_s6, %s7784_s6, %s7783_s30  }
  0xf2   : > { %s6581_s9 = smov [#allocation34]  }
  0xf3   : > { %s887_s26 = sshll.u32 %s6581_s9, 4  ;;  %s888_s26 = int_to_ptr.vmem [resolvable:$true] %s887_s26 }
  0xf4   : > { %s6334_s13 = scalar_lea.vmem %s888_s26, 6144  ;;  %p6342_p0 = scmp.lt.s32.totalorder %s888_s26, %s888_s26 }
  0xf5   : > { %p6335_p11 = scmp.ne.s32.totalorder %s888_s26, %s6334_s13  ;;  %p6343_p2 = scmp.lt.s32.totalorder %s6334_s13, %s6334_s13 }
  0xf7   : > { %p6337_p12 = pnand %p6335_p11, %p6792_p6  ;;  %p6344_p1 = por %p6343_p2, %p6342_p0 }
  0xf9   : > { %p6338_p13 = pneg %p6337_p12 }
  0xfb   : > { %p6345_p3 = pnand %p6344_p1, %p6338_p13 }
  0xfd   : > { %6348 = shalt.err (!%p6345_p3)
}
  0xfe   : > { %5503 = dma.hbm_to_vmem [thread:$0]  (!%p6786_p5), %s7720_s24, 6144, %s888_s26, [#allocation33], %s7784_s6, %s7784_s6, %s7783_s30  }
  0xff   : > { %s70_s5 = sadd.s32 1, %s6549_s12  ;;  %s80_s4 = sadd.s32 1, %s6541_s11 }
 0x100   : > { %p71_p6 = scmp.ge.s32.totalorder %s70_s5, 8  ;;  %p87_p4 = scmp.ne.s32.totalorder %s6541_s11, %s6537_s1 }
 0x101   : > { %p88_p7 = scmp.eq.s32.totalorder %s6553_s29, 0  ;;  %p93_p10 = scmp.ne.s32.totalorder %s6537_s1, %s6533_s22 }
 0x102   : > { %s7826_s5 = smov (%p71_p6, %s70_s5), 0  ;;  %p5528_p9 = scmp.lt.s32.totalorder %s6553_s29, 8 }
 0x103   : > { %p6967_p8 = por %p88_p7, %p87_p4  ;;  %s77_s27 = ssub.s32 %s6549_s12, %s7826_s5 }
 0x104   : > { %p78_p11 = scmp.eq.s32.totalorder %s77_s27, 0  ;;  %p7786_p12 = scmp.eq.s32.totalorder %s6773_s3, 0 }
 0x105   : > { %s907_s6 = sand.u32 1, %s6541_s11   ;;  %s4734_s7 = sshll.u32 %s6549_s12, 7 }
 0x106   : > { %p6978_p13 = por %p7786_p12, %p93_p10  ;;  %s4505_s26 = sshll.u32 %s907_s6, 3 }
 0x107   : > { %s6985_s9 = scalar_select %p78_p11, %s6541_s11, %s80_s4  }
 0x108   : > { %s7788_s28 = sld [smem:[#allocation53_spill]]  ;;  %s911_s2 = scalar_lea.vmem [#allocation5], %s4505_s26 }
 0x109   : > { %s918_s14 = sshll.u32 %s911_s2, 4  ;;  %p6992_p5 = pnand %p5528_p9, %p6967_p8  ;;  %s919_s14 = int_to_ptr.vmem [resolvable:$true] %s918_s14 }
 0x10a   : > { %s7790_s17 = sld [smem:[#allocation54_spill]]  ;;  %s908_s19 = scalar_lea.sflag [#allocation6], %s907_s6 }
 0x10b   : > { %p6351_p0 = pneg %p6992_p5  ;;  %s6362_s13 = scalar_lea.vmem %s919_s14, 128 }
 0x10c   : > { %p6363_p2 = scmp.ne.s32.totalorder %s919_s14, %s6362_s13  ;;  %s6582_s2 = smov [#allocation5]  }
 0x10d   : > { %s6367_s10 = sshll.u32 %s6582_s2, 4  ;;  %s6368_s10 = int_to_ptr.vmem [resolvable:$false] %s6367_s10 }
 0x10e   : > { %s917_s25 = scalar_lea.hbm %s7788_s28, %s4734_s7  ;;  %p6365_p1 = pnand %p6363_p2, %p6351_p0 }
 0x10f   : > { %s6369_s21 = scalar_lea.vmem %s6368_s10, 256  ;;  %p6370_p6 = scmp.lt.s32.totalorder %s919_s14, %s6368_s10 }
 0x110   : > { %s6999_s4 = scalar_lea.hbm %s7790_s17, %s4734_s7  ;;  %p6366_p3 = pneg %p6365_p1 }
 0x111   : > { %p6371_p4 = scmp.lt.s32.totalorder %s6369_s21, %s6362_s13 }
 0x113   : > { %p6372_p7 = por %p6371_p4, %p6370_p6 }
 0x115   : > { %p6373_p8 = pnand %p6372_p7, %p6366_p3 }
 0x117   : > { %6376 = shalt.err (!%p6373_p8)
}
 0x118   : > { %s7791_s15 = smov 4   ;;  %s7792_s17 = smov 64  }
 0x119   : > { %5507 = dma.hbm_to_vmem [thread:$0]  (!%p6992_p5), %s917_s25, 128, %s919_s14, %s908_s19, %s7792_s17, %s7792_s17, %s7791_s15  }
 0x11a   : > { %s932_s6 = scalar_lea.vmem [#allocation8], %s4505_s26  ;;  %s928_s28 = sand.u32 1, %s6553_s29  }
 0x11b   : > { %s939_s7 = sshll.u32 %s932_s6, 4  ;;  %s929_s27 = scalar_lea.sflag [#allocation9], %s928_s28  ;;  %s940_s7 = int_to_ptr.vmem [resolvable:$true] %s939_s7 }
 0x11c   : > { %s6390_s2 = scalar_lea.vmem %s940_s7, 128  ;;  %s6583_s13 = smov [#allocation8]  }
 0x11d   : > { %p6391_p10 = scmp.ne.s32.totalorder %s940_s7, %s6390_s2  ;;  %s6395_s10 = sshll.u32 %s6583_s13, 4  ;;  %s6396_s10 = int_to_ptr.vmem [resolvable:$false] %s6395_s10 }
 0x11e   : > { %s6397_s21 = scalar_lea.vmem %s6396_s10, 256  ;;  %p6398_p12 = scmp.lt.s32.totalorder %s940_s7, %s6396_s10 }
 0x11f   : > { %p6393_p9 = pnand %p6391_p10, %p6351_p0  ;;  %p6399_p2 = scmp.lt.s32.totalorder %s6397_s21, %s6390_s2 }
 0x121   : > { %p6394_p11 = pneg %p6393_p9  ;;  %p6400_p1 = por %p6399_p2, %p6398_p12 }
 0x123   : > { %p6401_p3 = pnand %p6400_p1, %p6394_p11 }
 0x125   : > { %6404 = shalt.err (!%p6401_p3)
}
 0x126   : > { %5510 = dma.hbm_to_vmem [thread:$0]  (!%p6992_p5), %s6999_s4, 128, %s940_s7, %s929_s27, %s7792_s17, %s7792_s17, %s7791_s15  }
 0x127   : > { %p7793_p6 = scmp.ne.s32.totalorder %s7764_s8, 0 }
 0x128   : > { %s953_s14 = sand.u32 (!%p7793_p6), 1, %s6537_s1  }
 0x129   : > { %951 = sbr.rel (%p7793_p6) target bundleno = 2223 (0x8af), region = 120  ;;  %s7024_s19 = sshll.u32 (!%p7793_p6), %s953_s14, 3 }
 0x12a   : > { %s954_s25 = scalar_lea.sflag (!%p7793_p6), [#allocation6], %s953_s14  ;;  %s957_s26 = scalar_lea.vmem (!%p7793_p6), [#allocation5], %s7024_s19 }
 0x12e   : > { %6480 = dma.done.wait (%p6978_p13), %s954_s25, 128  }
 0x12f   : > { %6482 = vsyncadd (%p6978_p13), %s954_s25, 4294967168  ;;  %s962_s22 = sand.u32 1, %s6773_s3   ;;  %s966_s8 = scalar_lea.vmem [#allocation8], %s7024_s19 }
 0x130   : > { %s963_s4 = scalar_lea.sflag [#allocation9], %s962_s22 }
 0x131   : > { %6484 = dma.done.wait (%p6978_p13), %s963_s4, 128  }
 0x132   : > { %6486 = vsyncadd (%p6978_p13), %s963_s4, 4294967168  ;;  %p7794_p5 = scmp.eq.s32.totalorder %s6773_s3, 0 }
 0x134   : > { %6488 = dma.done.wait (%p7794_p5), [#allocation9], 2048   ;;  %p7795_p0 = pmov %p7794_p5 }
 0x136   : > { %6490 = vsyncadd (%p7795_p0), [#allocation9], 4294965248  ;;  %p7796_p4 = pmov %p7795_p0 }
 0x137   : > { %p7797_p7 = pmov %p7795_p0 }
 0x138   : > { %6492 = dma.done.wait (%p7796_p4), [#allocation12], 6144  }
 0x139   : > { %6494 = vsyncadd (%p7797_p7), [#allocation12], 4294961152  ;;  %p7798_p8 = pmov %p7795_p0 }
 0x13a   : > { %p7799_p10 = pmov %p7795_p0 }
 0x13b   : > { %6496 = dma.done.wait (%p7798_p8), [#allocation15], 4160  }
 0x13c   : > { %6498 = vsyncadd (%p7799_p10), [#allocation15], 4294963136  ;;  %p7800_p13 = pmov %p7795_p0 }
 0x13d   : > { %p7801_p9 = pmov %p7795_p0 }
 0x13e   : > { %6500 = dma.done.wait (%p7800_p13), [#allocation18], 4160  }
 0x13f   : > { %6502 = vsyncadd (%p7801_p9), [#allocation18], 4294963136  ;;  %p7802_p11 = pmov %p7795_p0 }
 0x140   : > { %p7803_p12 = pmov %p7795_p0 }
 0x141   : > { %6504 = dma.done.wait (%p7802_p11), [#allocation21], 4160  }
 0x142   : > { %6506 = vsyncadd (%p7803_p12), [#allocation21], 4294963136  ;;  %p7804_p2 = pmov %p7795_p0 }
 0x143   : > { %p7805_p1 = pmov %p7795_p0 }
 0x144   : > { %6508 = dma.done.wait (%p7804_p2), [#allocation24], 4160  }
 0x145   : > { %6510 = vsyncadd (%p7805_p1), [#allocation24], 4294963136  ;;  %p7806_p3 = pmov %p7795_p0 }
 0x146   : > { %p7807_p6 = pmov %p7795_p0 }
 0x147   : > { %6512 = dma.done.wait (%p7806_p3), [#allocation27], 8192  }
 0x148   : > { %6514 = vsyncadd (%p7807_p6), [#allocation27], 4294959104  ;;  %p7808_p5 = pmov %p7795_p0 }
 0x14a   : > { %6516 = dma.done.wait (%p7808_p5), [#allocation30], 12288  }
 0x14b   : > { %6518 = vsyncadd (%p7795_p0), [#allocation30], 4294955008  ;;  %p7809_p4 = pmov %p7795_p0 }
 0x14c   : > { %p7810_p7 = pmov %p7795_p0 }
 0x14d   : > { %6520 = dma.done.wait (%p7809_p4), [#allocation33], 12288  }
 0x14e   : > { %6522 = vsyncadd (%p7810_p7), [#allocation33], 4294955008  ;;  %p1105_p8 = scmp.eq.s32.totalorder %s6545_s0, 0 }
 0x14f   : > { %v1110_v0 = vld [vmem:[#allocation10] sm:$0xff] (%p1105_p8)  ;;  %v1111_v1 = vld [vmem:[#allocation10 + $0x8] sm:$0xff] (%p1105_p8)  ;;  %v1112_v2 = vld [vmem:[#allocation10 + $0x10] sm:$0xff] (%p1105_p8) }
 0x150   : > { %1109 = sbr.rel (!%p1105_p8) target bundleno = 352 (0x160), region = 200  ;;  %1126 = vst [vmem:[#allocation35] sm:$0xff] (%p1105_p8), %v1110_v0  ;;  %1127 = vst [vmem:[#allocation35 + $0x8] sm:$0xff] (%p1105_p8), %v1111_v1  ;;  %v1113_v3 = vld [vmem:[#allocation10 + $0x18] sm:$0xff] (%p1105_p8)  ;;  %v1114_v4 = vld [vmem:[#allocation10 + $0x20] sm:$0xff] (%p1105_p8) }
 0x151   : > { %1128 = vst [vmem:[#allocation35 + $0x10] sm:$0xff] (%p1105_p8), %v1112_v2  ;;  %v1115_v5 = vld [vmem:[#allocation10 + $0x28] sm:$0xff] (%p1105_p8)  ;;  %1129 = vst [vmem:[#allocation35 + $0x18] sm:$0xff] (%p1105_p8), %v1113_v3  ;;  %v1116_v6 = vld [vmem:[#allocation10 + $0x30] sm:$0xff] (%p1105_p8) }
 0x152   : > { %1130 = vst [vmem:[#allocation35 + $0x20] sm:$0xff] (%p1105_p8), %v1114_v4  ;;  %1131 = vst [vmem:[#allocation35 + $0x28] sm:$0xff] (%p1105_p8), %v1115_v5  ;;  %v1117_v7 = vld [vmem:[#allocation10 + $0x38] sm:$0xff] (%p1105_p8)  ;;  %v1118_v8 = vld [vmem:[#allocation10 + $0x40] sm:$0xff] (%p1105_p8) }
 0x153   : > { %1132 = vst [vmem:[#allocation35 + $0x30] sm:$0xff] (%p1105_p8), %v1116_v6  ;;  %1133 = vst [vmem:[#allocation35 + $0x38] sm:$0xff] (%p1105_p8), %v1117_v7  ;;  %v1119_v9 = vld [vmem:[#allocation10 + $0x48] sm:$0xff] (%p1105_p8)  ;;  %v1120_v10 = vld [vmem:[#allocation10 + $0x50] sm:$0xff] (%p1105_p8) }
 0x154   : > { %1134 = vst [vmem:[#allocation35 + $0x40] sm:$0xff] (%p1105_p8), %v1118_v8  ;;  %v1121_v11 = vld [vmem:[#allocation10 + $0x58] sm:$0xff] (%p1105_p8)  ;;  %1135 = vst [vmem:[#allocation35 + $0x48] sm:$0xff] (%p1105_p8), %v1119_v9  ;;  %v1122_v12 = vld [vmem:[#allocation10 + $0x60] sm:$0xff] (%p1105_p8) }
 0x155   : > { %1136 = vst [vmem:[#allocation35 + $0x50] sm:$0xff] %v1120_v10  ;;  %1137 = vst [vmem:[#allocation35 + $0x58] sm:$0xff] %v1121_v11  ;;  %v1123_v13 = vld [vmem:[#allocation10 + $0x68] sm:$0xff]  ;;  %v1124_v14 = vld [vmem:[#allocation10 + $0x70] sm:$0xff] }
 0x156   : > { %1138 = vst [vmem:[#allocation35 + $0x60] sm:$0xff] %v1122_v12  ;;  %1139 = vst [vmem:[#allocation35 + $0x68] sm:$0xff] %v1123_v13  ;;  %v1125_v15 = vld [vmem:[#allocation10 + $0x78] sm:$0xff]  ;;  %v1142_v16 = vld [vmem:[#allocation11] sm:$0xff] }
 0x157   : > { %1140 = vst [vmem:[#allocation35 + $0x70] sm:$0xff] %v1124_v14  ;;  %v1143_v17 = vld [vmem:[#allocation11 + $0x8] sm:$0xff]  ;;  %1141 = vst [vmem:[#allocation35 + $0x78] sm:$0xff] %v1125_v15  ;;  %v1144_v18 = vld [vmem:[#allocation11 + $0x10] sm:$0xff] }
 0x158   : > { %1158 = vst [vmem:[#allocation36] sm:$0xff] %v1142_v16  ;;  %1159 = vst [vmem:[#allocation36 + $0x8] sm:$0xff] %v1143_v17  ;;  %v1145_v19 = vld [vmem:[#allocation11 + $0x18] sm:$0xff]  ;;  %v1146_v20 = vld [vmem:[#allocation11 + $0x20] sm:$0xff] }
 0x159   : > { %1160 = vst [vmem:[#allocation36 + $0x10] sm:$0xff] %v1144_v18  ;;  %1161 = vst [vmem:[#allocation36 + $0x18] sm:$0xff] %v1145_v19  ;;  %v1147_v21 = vld [vmem:[#allocation11 + $0x28] sm:$0xff]  ;;  %v1148_v22 = vld [vmem:[#allocation11 + $0x30] sm:$0xff] }
 0x15a   : > { %1162 = vst [vmem:[#allocation36 + $0x20] sm:$0xff] %v1146_v20  ;;  %v1149_v23 = vld [vmem:[#allocation11 + $0x38] sm:$0xff]  ;;  %1163 = vst [vmem:[#allocation36 + $0x28] sm:$0xff] %v1147_v21  ;;  %v1150_v24 = vld [vmem:[#allocation11 + $0x40] sm:$0xff] }
 0x15b   : > { %1164 = vst [vmem:[#allocation36 + $0x30] sm:$0xff] %v1148_v22  ;;  %1165 = vst [vmem:[#allocation36 + $0x38] sm:$0xff] %v1149_v23  ;;  %v1151_v25 = vld [vmem:[#allocation11 + $0x48] sm:$0xff]  ;;  %v1152_v26 = vld [vmem:[#allocation11 + $0x50] sm:$0xff] }
 0x15c   : > { %1166 = vst [vmem:[#allocation36 + $0x40] sm:$0xff] %v1150_v24  ;;  %1167 = vst [vmem:[#allocation36 + $0x48] sm:$0xff] %v1151_v25  ;;  %v1153_v27 = vld [vmem:[#allocation11 + $0x58] sm:$0xff]  ;;  %v1154_v28 = vld [vmem:[#allocation11 + $0x60] sm:$0xff] }
 0x15d   : > { %1168 = vst [vmem:[#allocation36 + $0x50] sm:$0xff] %v1152_v26  ;;  %v1155_v29 = vld [vmem:[#allocation11 + $0x68] sm:$0xff]  ;;  %1169 = vst [vmem:[#allocation36 + $0x58] sm:$0xff] %v1153_v27  ;;  %v1156_v30 = vld [vmem:[#allocation11 + $0x70] sm:$0xff] }
 0x15e   : > { %1170 = vst [vmem:[#allocation36 + $0x60] sm:$0xff] %v1154_v28  ;;  %1171 = vst [vmem:[#allocation36 + $0x68] sm:$0xff] %v1155_v29  ;;  %v1157_v31 = vld [vmem:[#allocation11 + $0x78] sm:$0xff] }
 0x15f   : > { %1172 = vst [vmem:[#allocation36 + $0x70] sm:$0xff] %v1156_v30  ;;  %1173 = vst [vmem:[#allocation36 + $0x78] sm:$0xff] %v1157_v31 }
 0x160 PF: > { %s7075_s30 = sld [smem:[#allocation3 + %s6545_s0]]  ;;  %v1188_v62 = vld [vmem:[#allocation35 + $0x60] sm:$0xff]  ;;  %v1189_v63 = vld [vmem:[#allocation35 + $0x68] sm:$0xff]  ;;  %v1190_v2 = vld [vmem:[#allocation35 + $0x70] sm:$0xff]  ;;  %vm6585_vm0 = vmmov 0   ;;  %vm3887_vm1 = vcmask 130048  }
 0x161   : > { %v7116_v1 = vpack.c.bf16 %v1189_v63, %v1188_v62  ;;  %v1191_v3 = vld [vmem:[#allocation35 + $0x78] sm:$0xff]  ;;  %p5546_p10 = scmp.eq.s32.totalorder %s6773_s3, 7 }
 0x162   : > { %v1176_v32 = vld [vmem:[#allocation35] sm:$0xff]  ;;  %v1177_v33 = vld [vmem:[#allocation35 + $0x8] sm:$0xff]  ;;  %v7120_v4 = vpack.c.bf16 %v1191_v3, %v1190_v2 }
 0x163   : > { %v7077_v34 = vpack.c.bf16 %v1177_v33, %v1176_v32  ;;  %v1178_v48 = vld [vmem:[#allocation35 + $0x10] sm:$0xff]  ;;  %v1179_v49 = vld [vmem:[#allocation35 + $0x18] sm:$0xff] }
 0x164   : > { %v1180_v50 = vld [vmem:[#allocation35 + $0x20] sm:$0xff]  ;;  %v1181_v51 = vld [vmem:[#allocation35 + $0x28] sm:$0xff]  ;;  %v7102_v52 = vpack.c.bf16 %v1179_v49, %v1178_v48 }
 0x165   : > { %4966 = vmatprep.mubr.bf16.mxu0 %v7077_v34  ;;  %v7104_v53 = vpack.c.bf16 %v1181_v51, %v1180_v50  ;;  %v1182_v54 = vld [vmem:[#allocation35 + $0x30] sm:$0xff]  ;;  %v1183_v55 = vld [vmem:[#allocation35 + $0x38] sm:$0xff] }
 0x166   : > { %s7081_s15 = sshll.u32 %s7075_s30, 6  ;;  %v1184_v56 = vld [vmem:[#allocation35 + $0x40] sm:$0xff]  ;;  %v1185_v57 = vld [vmem:[#allocation35 + $0x48] sm:$0xff]  ;;  %v7108_v58 = vpack.c.bf16 %v1183_v55, %v1182_v54  ;;  %s1247_s28 = scalar_lea.vmem [#allocation14], %s7075_s30 }
 0x167   : > { %s7084_s17 = scalar_lea.vmem [#allocation13], %s7081_s15  ;;  %s7091_s6 = scalar_lea.vmem [#allocation16], %s7081_s15  ;;  %v7110_v59 = vpack.c.bf16 %v1185_v57, %v1184_v56  ;;  %v1186_v60 = vld [vmem:[#allocation35 + $0x50] sm:$0xff]  ;;  %v1187_v61 = vld [vmem:[#allocation35 + $0x58] sm:$0xff] }
 0x168   : > { %v5632_v35 = vld [vmem:[%s7084_s17 + $0x38] sm:$0xff]   ;;  %v5633_v36 = vld [vmem:[%s7084_s17 + $0x30] sm:$0xff]   ;;  %v5634_v37 = vld [vmem:[%s7084_s17 + $0x28] sm:$0xff]   ;;  %v7114_v0 = vpack.c.bf16 %v1187_v61, %v1186_v60  ;;  %s7127_s7 = scalar_lea.vmem [#allocation19], %s7081_s15  ;;  %s1817_s27 = scalar_lea.vmem [#allocation23], %s7081_s15 }
 0x169   : > { %4950 = vmatprep.subr.bf16.mxu0 %v5632_v35  ;;  %v5635_v38 = vld [vmem:[%s7084_s17 + $0x20] sm:$0xff]   ;;  %v5640_v39 = vld [vmem:[%s7091_s6 + $0x38] sm:$0xff]   ;;  %v5641_v40 = vld [vmem:[%s7091_s6 + $0x30] sm:$0xff]   ;;  %s7140_s2 = scalar_lea.vmem [#allocation22], %s7081_s15  ;;  %s1442_s13 = scalar_lea.vmem [#allocation17], %s7075_s30 }
 0x16a   : > { %4951 = vmatpush3.bf16.msra.mxu0 %v5632_v35  ;;  %4982 = vmatprep.subr.bf16.mxu1 %v5640_v39  ;;  %v5636_v41 = vld [vmem:[%s7084_s17 + $0x18] sm:$0xff]   ;;  %v5642_v42 = vld [vmem:[%s7091_s6 + $0x28] sm:$0xff]   ;;  %v5637_v43 = vld [vmem:[%s7084_s17 + $0x10] sm:$0xff]   ;;  %s2173_s10 = scalar_lea.vmem [#allocation26], %s7081_s15  ;;  %s7208_s21 = scalar_lea.vmem [#allocation28], %s7081_s15 }
 0x16b   : > { %4952 = vmatprep.subr.bf16.mxu0 %v5633_v36  ;;  %4983 = vmatpush3.bf16.msra.mxu1 %v5640_v39  ;;  %v5643_v44 = vld [vmem:[%s7091_s6 + $0x20] sm:$0xff]   ;;  %v5638_v45 = vld [vmem:[%s7084_s17 + $0x8] sm:$0xff]   ;;  %v5644_v46 = vld [vmem:[%s7091_s6 + $0x18] sm:$0xff]   ;;  %s1637_s14 = scalar_lea.vmem [#allocation20], %s7075_s30  ;;  %s2124_s25 = scalar_lea.vmem [#allocation25], %s7075_s30 }
 0x16c   : > { %4984 = vmatprep.subr.bf16.mxu1 %v5641_v40  ;;  %v5639_v47 = vld [vmem:[%s7084_s17] sm:$0xff]   ;;  %v5645_v5 = vld [vmem:[%s7091_s6 + $0x10] sm:$0xff]   ;;  %v5646_v6 = vld [vmem:[%s7091_s6 + $0x8] sm:$0xff]   ;;  %s7816_s15 = sld [smem:[#allocation71_spill]] }
 0x16d   : > { %v5647_v7 = vld [vmem:[%s7091_s6] sm:$0xff]   ;;  %v5648_v8 = vld [vmem:[%s7127_s7 + $0x38] sm:$0xff]   ;;  %v5649_v9 = vld [vmem:[%s7127_s7 + $0x30] sm:$0xff]   ;;  %s2190_s6 = scalar_lea.vmem %s7712_s16, %s7075_s30 }
 0x16e   : > { %4953 = vmatpush3.bf16.msra.mxu0 %v5633_v36  ;;  %v5650_v10 = vld [vmem:[%s7127_s7 + $0x28] sm:$0xff]   ;;  %v5651_v11 = vld [vmem:[%s7127_s7 + $0x20] sm:$0xff]   ;;  %v5652_v12 = vld [vmem:[%s7127_s7 + $0x18] sm:$0xff]  }
 0x16f   : > { %4954 = vmatprep.subr.bf16.mxu0 %v5634_v37  ;;  %4985 = vmatpush3.bf16.msra.mxu1 %v5641_v40  ;;  %v4534_v15 = vld [vmem:[%s1247_s28] ss:$0 sm:$0xff]  ;;  %s7817_s28 = sld [smem:[#allocation72_spill]] }
 0x170   : > { %4986 = vmatprep.subr.bf16.mxu1 %v5642_v42 }
 0x172   : > { %4955 = vmatpush3.bf16.msra.mxu0 %v5634_v37 }
 0x173   : > { %4956 = vmatprep.subr.bf16.mxu0 %v5635_v38  ;;  %4987 = vmatpush3.bf16.msra.mxu1 %v5642_v42 }
 0x174   : > { %4988 = vmatprep.subr.bf16.mxu1 %v5643_v44 }
 0x176   : > { %4957 = vmatpush3.bf16.msra.mxu0 %v5635_v38 }
 0x177   : > { %4958 = vmatprep.subr.bf16.mxu0 %v5636_v41  ;;  %4989 = vmatpush3.bf16.msra.mxu1 %v5643_v44 }
 0x178   : > { %4990 = vmatprep.subr.bf16.mxu1 %v5644_v46 }
 0x17a   : > { %4959 = vmatpush3.bf16.msra.mxu0 %v5636_v41 }
 0x17b   : > { %4960 = vmatprep.subr.bf16.mxu0 %v5637_v43  ;;  %4991 = vmatpush3.bf16.msra.mxu1 %v5644_v46 }
 0x17c   : > { %4992 = vmatprep.subr.bf16.mxu1 %v5645_v5 }
 0x17e   : > { %4961 = vmatpush3.bf16.msra.mxu0 %v5637_v43 }
 0x17f   : > { %4962 = vmatprep.subr.bf16.mxu0 %v5638_v45  ;;  %4993 = vmatpush3.bf16.msra.mxu1 %v5645_v5 }
 0x180   : > { %4994 = vmatprep.subr.bf16.mxu1 %v5646_v6 }
 0x182   : > { %4963 = vmatpush3.bf16.msra.mxu0 %v5638_v45 }
 0x183   : > { %4964 = vmatprep.subr.bf16.mxu0 %v5639_v47  ;;  %4995 = vmatpush3.bf16.msra.mxu1 %v5646_v6 }
 0x184   : > { %4996 = vmatprep.subr.bf16.mxu1 %v5647_v7 }
 0x186   : > { %4965 = vmatpush3.bf16.msra.mxu0 %v5639_v47 }
 0x187   : > { %4997 = vmatpush3.bf16.msra.mxu1 %v5647_v7  ;;  %5014 = vmatprep.subr.bf16.mxu0 %v5648_v8 }
 0x189   : > { %4967 = vmatmul.mubr.bf16.vlgmr.msra.gmra.mxu0 %v7102_v52 }
 0x18a   : > { %4970 = vmatprep.mubr.bf16.mxu0 %v7104_v53  ;;  %5015 = vmatpush3.bf16.msra.mxu0 %v5648_v8 }
 0x18b   : > { %5016 = vmatprep.subr.bf16.mxu0 %v5649_v9 }
 0x18e   : > { %5017 = vmatpush3.bf16.msra.mxu0 %v5649_v9 }
 0x18f   : > { %5018 = vmatprep.subr.bf16.mxu0 %v5650_v10 }
 0x191   : > { %4971 = vmatmul.mubr.bf16.gmra.mxu0 %v7108_v58 }
 0x192   : > { %4974 = vmatprep.mubr.bf16.mxu0 %v7110_v59  ;;  %5019 = vmatpush3.bf16.msra.mxu0 %v5650_v10 }
 0x193   : > { %5020 = vmatprep.subr.bf16.mxu0 %v5651_v11 }
 0x196   : > { %5021 = vmatpush3.bf16.msra.mxu0 %v5651_v11 }
 0x197   : > { %5022 = vmatprep.subr.bf16.mxu0 %v5652_v12 }
 0x199   : > { %4975 = vmatmul.mubr.bf16.gmra.mxu0 %v7114_v0 }
 0x19a   : > { %4978 = vmatprep.mubr.bf16.mxu0 %v7116_v1  ;;  %5023 = vmatpush3.bf16.msra.mxu0 %v5652_v12 }
 0x1a1   : > { %4979 = vmatmul.mubr.bf16.gmra.mxu0 %v7120_v4 }
 0x249   : > { %v4968_v13 = vpop.f32.mrf.mxu0 }
 0x24a   : > { %v1346_v19 = vadd.f32 %v4968_v13, %v4534_v15 }
 0x24b   : > { %v1337_v14 = vpop.f32.mrf.mxu0 }
 0x24c   : > { %v1338_v17 = vadd.f32 %v4534_v15, %v1337_v14  ;;  %v1402_v26 = vmax.f32 %v1346_v19, 0.0  ;;  %v5653_v14 = vld [vmem:[%s7127_s7 + $0x10] sm:$0xff]   ;;  %v7143_v19 = vld [vmem:[%s7140_s2 + $0x38] sm:$0xff]  }
 0x24d   : > { %v4969_v16 = vpop.f32.mrf.mxu0  ;;  %5024 = vmatprep.subr.bf16.mxu0 %v5653_v14 }
 0x24e   : > { %v1349_v18 = vadd.f32 %v4969_v16, %v4534_v15  ;;  %v1400_v24 = vmax.f32 %v1338_v17, 0.0  ;;  %5025 = vmatpush3.bf16.msra.mxu0 %v5653_v14  ;;  %v5654_v16 = vld [vmem:[%s7127_s7 + $0x8] sm:$0xff]   ;;  %v5655_v17 = vld [vmem:[%s1817_s27 + $0x38] sm:$0xff]  }
 0x24f   : > { %v1340_v20 = vpop.f32.mrf.mxu0  ;;  %5026 = vmatprep.subr.bf16.mxu0 %v5654_v16  ;;  %5046 = vmatprep.subr.bf16.mxu1 %v5655_v17 }
 0x250   : > { %v1341_v21 = vadd.f32 %v4534_v15, %v1340_v20  ;;  %v1403_v22 = vmax.f32 %v1349_v18, 0.0  ;;  %v5657_v18 = vld [vmem:[%s1817_s27 + $0x30] sm:$0xff]   ;;  %v5659_v20 = vld [vmem:[%s1817_s27 + $0x28] sm:$0xff]  }
 0x251   : > { %v4972_v23 = vpop.f32.mrf.mxu0 }
 0x252   : > { %v1401_v25 = vmax.f32 %v1341_v21, 0.0  ;;  %v1417_v29 = vpack.c.bf16 %v1403_v22, %v1402_v26  ;;  %v1362_v33 = vadd.f32 %v4972_v23, %v4534_v15  ;;  %5027 = vmatpush3.bf16.msra.mxu0 %v5654_v16  ;;  %v5661_v21 = vld [vmem:[%s1817_s27 + $0x20] sm:$0xff]   ;;  %v5663_v22 = vld [vmem:[%s1817_s27 + $0x18] sm:$0xff]   ;;  %v5665_v23 = vld [vmem:[%s1817_s27 + $0x10] sm:$0xff]  }
 0x253   : > { %v1353_v27 = vpop.f32.mrf.mxu0  ;;  %v1192_v26 = vld [vmem:[#allocation36] sm:$0xff] }
 0x254   : > { %v1416_v28 = vpack.c.bf16 %v1401_v25, %v1400_v24  ;;  %v1354_v31 = vadd.f32 %v4534_v15, %v1353_v27  ;;  %v1406_v41 = vmax.f32 %v1362_v33, 0.0  ;;  %v5667_v24 = vld [vmem:[%s1817_s27 + $0x8] sm:$0xff]   ;;  %v5669_v25 = vld [vmem:[%s1817_s27] sm:$0xff]   ;;  %v1193_v27 = vld [vmem:[#allocation36 + $0x8] sm:$0xff]  ;;  %s2385_s27 = scalar_lea.vmem %s7714_s18, %s7075_s30 }
 0x255   : > { %v4973_v30 = vpop.f32.mrf.mxu0  ;;  %v1197_v33 = vld [vmem:[#allocation36 + $0x28] sm:$0xff] }
 0x256   : > { %v1365_v32 = vadd.f32 %v4973_v30, %v4534_v15  ;;  %4998 = vmatprep.mubr.bf16.mxu1 %v1416_v28  ;;  %v1404_v39 = vmax.f32 %v1354_v31, 0.0  ;;  %v7146_v28 = vpack.c.bf16 %v1193_v27, %v1192_v26  ;;  %v1195_v30 = vld [vmem:[#allocation36 + $0x18] sm:$0xff] }
 0x257   : > { %v1356_v35 = vpop.f32.mrf.mxu0  ;;  %4999 = vmatmul.mubr.bf16.vlgmr.msra.gmra.mxu1 %v1417_v29  ;;  %v1194_v29 = vld [vmem:[#allocation36 + $0x10] sm:$0xff] }
 0x258   : > { %v1357_v36 = vadd.f32 %v4534_v15, %v1356_v35  ;;  %v1407_v37 = vmax.f32 %v1365_v32, 0.0  ;;  %5047 = vmatpush3.bf16.msra.mxu1 %v5655_v17  ;;  %v7148_v31 = vpack.c.bf16 %v1195_v30, %v1194_v29  ;;  %v1196_v32 = vld [vmem:[#allocation36 + $0x20] sm:$0xff]  ;;  %v5664_v30 = vld [vmem:[%s7140_s2 + $0x20] sm:$0xff]  }
 0x259   : > { %v4976_v38 = vpop.f32.mrf.mxu0  ;;  %5048 = vmatprep.subr.bf16.mxu1 %v5657_v18  ;;  %v7152_v35 = vpack.c.bf16 %v1197_v33, %v1196_v32 }
 0x25a   : > { %v1405_v40 = vmax.f32 %v1357_v36, 0.0  ;;  %v1419_v44 = vpack.c.bf16 %v1407_v37, %v1406_v41  ;;  %v1378_v48 = vadd.f32 %v4976_v38, %v4534_v15  ;;  %v1198_v36 = vld [vmem:[#allocation36 + $0x30] sm:$0xff]  ;;  %v1199_v37 = vld [vmem:[#allocation36 + $0x38] sm:$0xff] }
 0x25b   : > { %v1369_v42 = vpop.f32.mrf.mxu0  ;;  %v7154_v38 = vpack.c.bf16 %v1199_v37, %v1198_v36 }
 0x25c   : > { %v1418_v43 = vpack.c.bf16 %v1405_v40, %v1404_v39  ;;  %v1370_v46 = vadd.f32 %v4534_v15, %v1369_v42  ;;  %v1410_v57 = vmax.f32 %v1378_v48, 0.0  ;;  %5049 = vmatpush3.bf16.msra.mxu1 %v5657_v18  ;;  %v1200_v39 = vld [vmem:[#allocation36 + $0x40] sm:$0xff]  ;;  %v1201_v40 = vld [vmem:[#allocation36 + $0x48] sm:$0xff]  ;;  %v1202_v42 = vld [vmem:[#allocation36 + $0x50] sm:$0xff] }
 0x25d   : > { %v4977_v45 = vpop.f32.mrf.mxu0  ;;  %5050 = vmatprep.subr.bf16.mxu1 %v5659_v20  ;;  %v7158_v41 = vpack.c.bf16 %v1201_v40, %v1200_v39  ;;  %v1206_v48 = vld [vmem:[#allocation36 + $0x70] sm:$0xff] }
 0x25e   : > { %v1381_v47 = vadd.f32 %v4977_v45, %v4534_v15  ;;  %5002 = vmatprep.mubr.bf16.mxu1 %v1418_v43  ;;  %v1408_v55 = vmax.f32 %v1370_v46, 0.0  ;;  %v1203_v43 = vld [vmem:[#allocation36 + $0x58] sm:$0xff]  ;;  %v1204_v45 = vld [vmem:[#allocation36 + $0x60] sm:$0xff]  ;;  %v1205_v46 = vld [vmem:[#allocation36 + $0x68] sm:$0xff] }
 0x25f   : > { %v1372_v49 = vpop.f32.mrf.mxu0  ;;  %5003 = vmatmul.mubr.bf16.gmra.mxu1 %v1419_v44  ;;  %v7160_v44 = vpack.c.bf16 %v1203_v43, %v1202_v42  ;;  %v5666_v42 = vld [vmem:[%s7140_s2 + $0x18] sm:$0xff]  }
 0x260   : > { %v1373_v50 = vadd.f32 %v4534_v15, %v1372_v49  ;;  %v1411_v51 = vmax.f32 %v1381_v47, 0.0  ;;  %5051 = vmatpush3.bf16.msra.mxu1 %v5659_v20  ;;  %v7164_v47 = vpack.c.bf16 %v1205_v46, %v1204_v45  ;;  %v1207_v49 = vld [vmem:[#allocation36 + $0x78] sm:$0xff] }
 0x261   : > { %v4980_v54 = vpop.f32.mrf.mxu0  ;;  %5052 = vmatprep.subr.bf16.mxu1 %v5661_v21 }
 0x262   : > { %v1409_v56 = vmax.f32 %v1373_v50, 0.0  ;;  %v1421_v62 = vpack.c.bf16 %v1411_v51, %v1410_v57  ;;  %v1394_v5 = vadd.f32 %v4980_v54, %v4534_v15  ;;  %v7166_v50 = vpack.c.bf16 %v1207_v49, %v1206_v48 }
 0x263   : > { %v1385_v60 = vpop.f32.mrf.mxu0 }
 0x264   : > { %v1420_v61 = vpack.c.bf16 %v1409_v56, %v1408_v55  ;;  %v1386_v2 = vadd.f32 %v4534_v15, %v1385_v60  ;;  %v1414_v11 = vmax.f32 %v1394_v5, 0.0  ;;  %5053 = vmatpush3.bf16.msra.mxu1 %v5661_v21  ;;  %v7171_v55 = vld [vmem:[%s1442_s13] ss:$0 sm:$0xff]  ;;  %v5662_v21 = vld [vmem:[%s7140_s2 + $0x28] sm:$0xff]  }
 0x265   : > { %v4981_v63 = vpop.f32.mrf.mxu0  ;;  %5054 = vmatprep.subr.bf16.mxu1 %v5663_v22 }
 0x266   : > { %v1397_v3 = vadd.f32 %v4981_v63, %v4534_v15  ;;  %5006 = vmatprep.mubr.bf16.mxu1 %v1420_v61  ;;  %v1412_v9 = vmax.f32 %v1386_v2, 0.0 }
 0x267   : > { %v1388_v6 = vpop.f32.mrf.mxu0  ;;  %5007 = vmatmul.mubr.bf16.gmra.mxu1 %v1421_v62 }
 0x268   : > { %v1389_v7 = vadd.f32 %v4534_v15, %v1388_v6  ;;  %v1415_v8 = vmax.f32 %v1397_v3, 0.0  ;;  %v5656_v15 = vld [vmem:[%s7127_s7] sm:$0xff]   ;;  %5055 = vmatpush3.bf16.msra.mxu1 %v5663_v22 }
 0x269   : > { %5028 = vmatprep.subr.bf16.mxu0 %v5656_v15  ;;  %5056 = vmatprep.subr.bf16.mxu1 %v5665_v23 }
 0x26a   : > { %v1413_v10 = vmax.f32 %v1389_v7, 0.0  ;;  %v1423_v13 = vpack.c.bf16 %v1415_v8, %v1414_v11  ;;  %5029 = vmatpush3.bf16.msra.mxu0 %v5656_v15 }
 0x26b   : > { %5078 = vmatprep.subr.bf16.mxu0 %v7143_v19 }
 0x26c   : > { %v1422_v12 = vpack.c.bf16 %v1413_v10, %v1412_v9  ;;  %5057 = vmatpush3.bf16.msra.mxu1 %v5665_v23 }
 0x26d   : > { %5058 = vmatprep.subr.bf16.mxu1 %v5667_v24 }
 0x26e   : > { %5010 = vmatprep.mubr.bf16.mxu1 %v1422_v12  ;;  %v5660_v12 = vld [vmem:[%s7140_s2 + $0x30] sm:$0xff]  }
 0x26f   : > { %5011 = vmatmul.mubr.bf16.gmra.mxu1 %v1423_v13 }
 0x270   : > { %5059 = vmatpush3.bf16.msra.mxu1 %v5667_v24  ;;  %5062 = vmatprep.mubr.bf16.mxu1 %v7146_v28 }
 0x271   : > { %5060 = vmatprep.subr.bf16.mxu1 %v5669_v25 }
 0x274   : > { %5061 = vmatpush3.bf16.msra.mxu1 %v5669_v25 }
 0x277   : > { %5063 = vmatmul.mubr.bf16.vlgmr.msra.gmra.mxu1 %v7148_v31 }
 0x278   : > { %5066 = vmatprep.mubr.bf16.mxu1 %v7152_v35 }
 0x27f   : > { %5067 = vmatmul.mubr.bf16.gmra.mxu1 %v7154_v38 }
 0x280   : > { %5070 = vmatprep.mubr.bf16.mxu1 %v7158_v41 }
 0x287   : > { %5071 = vmatmul.mubr.bf16.gmra.mxu1 %v7160_v44 }
 0x288   : > { %5074 = vmatprep.mubr.bf16.mxu1 %v7164_v47 }
 0x28f   : > { %5075 = vmatmul.mubr.bf16.gmra.mxu1 %v7166_v50 }
 0x317   : > { %v5000_v51 = vpop.f32.mrf.mxu1 }
 0x318   : > { %v1541_v61 = vadd.f32 %v5000_v51, %v7171_v55 }
 0x319   : > { %v1532_v54 = vpop.f32.mrf.mxu1 }
 0x31a   : > { %v1533_v57 = vadd.f32 %v7171_v55, %v1532_v54  ;;  %v1597_v7 = vmax.f32 %v1541_v61, 0.0 }
 0x31b   : > { %v5001_v56 = vpop.f32.mrf.mxu1 }
 0x31c   : > { %v1544_v60 = vadd.f32 %v5001_v56, %v7171_v55  ;;  %v1595_v5 = vmax.f32 %v1533_v57, 0.0  ;;  %v5668_v56 = vld [vmem:[%s7140_s2 + $0x10] sm:$0xff]  }
 0x31d   : > { %v1535_v62 = vpop.f32.mrf.mxu1 }
 0x31e   : > { %v1536_v63 = vadd.f32 %v7171_v55, %v1535_v62  ;;  %v1598_v2 = vmax.f32 %v1544_v60, 0.0 }
 0x31f   : > { %v5004_v3 = vpop.f32.mrf.mxu1 }
 0x320   : > { %v1596_v6 = vmax.f32 %v1536_v63, 0.0  ;;  %v1612_v10 = vpack.c.bf16 %v1598_v2, %v1597_v7  ;;  %v1557_v16 = vadd.f32 %v5004_v3, %v7171_v55  ;;  %v5670_v3 = vld [vmem:[%s7140_s2 + $0x8] sm:$0xff]  }
 0x321   : > { %v1548_v8 = vpop.f32.mrf.mxu1 }
 0x322   : > { %v1611_v9 = vpack.c.bf16 %v1596_v6, %v1595_v5  ;;  %v1549_v13 = vadd.f32 %v7171_v55, %v1548_v8  ;;  %v1601_v24 = vmax.f32 %v1557_v16, 0.0  ;;  %v5677_v16 = vld [vmem:[%s2173_s10 + $0x10] sm:$0xff]  }
 0x323   : > { %v5005_v11 = vpop.f32.mrf.mxu1 }
 0x324   : > { %v1560_v14 = vadd.f32 %v5005_v11, %v7171_v55  ;;  %5030 = vmatprep.mubr.bf16.mxu0 %v1611_v9  ;;  %v1599_v22 = vmax.f32 %v1549_v13, 0.0  ;;  %v5673_v11 = vld [vmem:[%s2173_s10 + $0x30] sm:$0xff]   ;;  %v5675_v13 = vld [vmem:[%s2173_s10 + $0x20] sm:$0xff]  }
 0x325   : > { %v1551_v17 = vpop.f32.mrf.mxu1  ;;  %5031 = vmatmul.mubr.bf16.vlgmr.msra.gmra.mxu0 %v1612_v10  ;;  %v5671_v10 = vld [vmem:[%s7140_s2] sm:$0xff]  }
 0x326   : > { %v1552_v15 = vadd.f32 %v7171_v55, %v1551_v17  ;;  %5079 = vmatpush3.bf16.msra.mxu0 %v7143_v19  ;;  %v1602_v18 = vmax.f32 %v1560_v14, 0.0  ;;  %v5676_v14 = vld [vmem:[%s2173_s10 + $0x18] sm:$0xff]   ;;  %v5678_v17 = vld [vmem:[%s2173_s10 + $0x8] sm:$0xff]  }
 0x327   : > { %v5008_v20 = vpop.f32.mrf.mxu1  ;;  %5080 = vmatprep.subr.bf16.mxu0 %v5660_v12 }
 0x328   : > { %v1600_v23 = vmax.f32 %v1552_v15, 0.0  ;;  %v1614_v27 = vpack.c.bf16 %v1602_v18, %v1601_v24  ;;  %v1573_v19 = vadd.f32 %v5008_v20, %v7171_v55  ;;  %v5679_v15 = vld [vmem:[%s2173_s10] sm:$0xff]   ;;  %v7738_v18 = vmov 0.0   ;;  %v5681_v20 = vld [vmem:[%s7208_s21 + $0x38] sm:$0xff]  }
 0x329   : > { %v1564_v25 = vpop.f32.mrf.mxu1  ;;  %v5685_v24 = vld [vmem:[%s7208_s21 + $0x18] sm:$0xff]  }
 0x32a   : > { %v1613_v26 = vpack.c.bf16 %v1600_v23, %v1599_v22  ;;  %5081 = vmatpush3.bf16.msra.mxu0 %v5660_v12  ;;  %v1565_v32 = vadd.f32 %v7171_v55, %v1564_v25  ;;  %v1605_v46 = vmax.f32 %v1573_v19, 0.0  ;;  %v5674_v12 = vld [vmem:[%s2173_s10 + $0x28] sm:$0xff]   ;;  %v5684_v23 = vld [vmem:[%s7208_s21 + $0x20] sm:$0xff]  }
 0x32b   : > { %v5009_v29 = vpop.f32.mrf.mxu1  ;;  %5082 = vmatprep.subr.bf16.mxu0 %v5662_v21  ;;  %v5683_v22 = vld [vmem:[%s7208_s21 + $0x28] sm:$0xff]  }
 0x32c   : > { %v1576_v33 = vadd.f32 %v5009_v29, %v7171_v55  ;;  %5034 = vmatprep.mubr.bf16.mxu0 %v1613_v26  ;;  %v1603_v43 = vmax.f32 %v1565_v32, 0.0  ;;  %v7217_v25 = vld [vmem:[%s966_s8] sm:$0xff]  }
 0x32d   : > { %v1567_v36 = vpop.f32.mrf.mxu1  ;;  %5035 = vmatmul.mubr.bf16.gmra.mxu0 %v1614_v27  ;;  %3871 = vxpose.xlu0.c.b16.start.end [1/1] (short) %v7217_v25, 128  ;;  %v7221_v27 = vld [vmem:[%s1637_s14] ss:$0 sm:$0xff] }
 0x32e   : > { %v1568_v37 = vadd.f32 %v7171_v55, %v1567_v36  ;;  %5083 = vmatpush3.bf16.msra.mxu0 %v5662_v21  ;;  %v1606_v39 = vmax.f32 %v1576_v33, 0.0  ;;  %v5682_v21 = vld [vmem:[%s7208_s21 + $0x30] sm:$0xff]  }
 0x32f   : > { %v5012_v40 = vpop.f32.mrf.mxu1  ;;  %5084 = vmatprep.subr.bf16.mxu0 %v5664_v30 }
 0x330   : > { %v1604_v45 = vmax.f32 %v1568_v37, 0.0  ;;  %v1616_v51 = vpack.c.bf16 %v1606_v39, %v1605_v46  ;;  %v1589_v61 = vadd.f32 %v5012_v40, %v7171_v55 }
 0x331   : > { %v1580_v48 = vpop.f32.mrf.mxu1 }
 0x332   : > { %v1615_v49 = vpack.c.bf16 %v1604_v45, %v1603_v43  ;;  %5085 = vmatpush3.bf16.msra.mxu0 %v5664_v30  ;;  %v1581_v57 = vadd.f32 %v7171_v55, %v1580_v48  ;;  %v1609_v7 = vmax.f32 %v1589_v61, 0.0 }
 0x333   : > { %v5013_v54 = vpop.f32.mrf.mxu1  ;;  %5086 = vmatprep.subr.bf16.mxu0 %v5666_v42 }
 0x334   : > { %v1592_v60 = vadd.f32 %v5013_v54, %v7171_v55  ;;  %5038 = vmatprep.mubr.bf16.mxu0 %v1615_v49  ;;  %v1607_v5 = vmax.f32 %v1581_v57, 0.0 }
 0x335   : > { %v1583_v62 = vpop.f32.mrf.mxu1  ;;  %5039 = vmatmul.mubr.bf16.gmra.mxu0 %v1616_v51 }
 0x336   : > { %v1584_v63 = vadd.f32 %v7171_v55, %v1583_v62  ;;  %5087 = vmatpush3.bf16.msra.mxu0 %v5666_v42  ;;  %v1610_v2 = vmax.f32 %v1592_v60, 0.0  ;;  %v5672_v55 = vld [vmem:[%s2173_s10 + $0x38] sm:$0xff]   ;;  %s7814_s10 = sld [smem:[#allocation69_spill]] }
 0x337   : > { %5088 = vmatprep.subr.bf16.mxu0 %v5668_v56  ;;  %5110 = vmatprep.subr.bf16.mxu1 %v5672_v55  ;;  %v5064_v30 = vpop.f32.mrf.mxu1 }
 0x338   : > { %v1608_v6 = vmax.f32 %v1584_v63, 0.0  ;;  %v1618_v9 = vpack.c.bf16 %v1610_v2, %v1609_v7  ;;  %5111 = vmatpush3.bf16.msra.mxu1 %v5672_v55 }
 0x339   : > { %5112 = vmatprep.subr.bf16.mxu1 %v5673_v11  ;;  %v1916_v37 = vpop.f32.mrf.mxu1 }
 0x33a   : > { %v1617_v8 = vpack.c.bf16 %v1608_v6, %v1607_v5  ;;  %5089 = vmatpush3.bf16.msra.mxu0 %v5668_v56 }
 0x33b   : > { %5090 = vmatprep.subr.bf16.mxu0 %v5670_v3  ;;  %v5065_v48 = vpop.f32.mrf.mxu1 }
 0x33c   : > { %5042 = vmatprep.mubr.bf16.mxu0 %v1617_v8  ;;  %5113 = vmatpush3.bf16.msra.mxu1 %v5673_v11 }
 0x33d   : > { %5043 = vmatmul.mubr.bf16.gmra.mxu0 %v1618_v9  ;;  %5114 = vmatprep.subr.bf16.mxu1 %v5674_v12  ;;  %v1919_v54 = vpop.f32.mrf.mxu1 }
 0x33e   : > { %5091 = vmatpush3.bf16.msra.mxu0 %v5670_v3  ;;  %5094 = vmatprep.mubr.bf16.mxu0 %v7077_v34 }
 0x33f   : > { %5092 = vmatprep.subr.bf16.mxu0 %v5671_v10  ;;  %v5068_v60 = vpop.f32.mrf.mxu1 }
 0x340   : > { %5115 = vmatpush3.bf16.msra.mxu1 %v5674_v12 }
 0x341   : > { %5116 = vmatprep.subr.bf16.mxu1 %v5675_v13  ;;  %v1932_v63 = vpop.f32.mrf.mxu1 }
 0x342   : > { %5093 = vmatpush3.bf16.msra.mxu0 %v5671_v10 }
 0x343   : > { %5142 = vmatprep.subr.bf16.mxu0 %v5681_v20  ;;  %v5069_v5 = vpop.f32.mrf.mxu1 }
 0x344   : > { %5117 = vmatpush3.bf16.msra.mxu1 %v5675_v13 }
 0x345   : > { %5095 = vmatmul.mubr.bf16.vlgmr.msra.gmra.mxu0 %v7102_v52  ;;  %5118 = vmatprep.subr.bf16.mxu1 %v5676_v14  ;;  %v1935_v8 = vpop.f32.mrf.mxu1 }
 0x346   : > { %5098 = vmatprep.mubr.bf16.mxu0 %v7104_v53  ;;  %5143 = vmatpush3.bf16.msra.mxu0 %v5681_v20 }
 0x347   : > { %5144 = vmatprep.subr.bf16.mxu0 %v5682_v21  ;;  %v5072_v55 = vpop.f32.mrf.mxu1 }
 0x348   : > { %5119 = vmatpush3.bf16.msra.mxu1 %v5676_v14  ;;  %v7254_v14 = vld [vmem:[%s2124_s25] ss:$0 sm:$0xff] }
 0x349   : > { %5120 = vmatprep.subr.bf16.mxu1 %v5677_v16 }
 0x34a   : > { %5145 = vmatpush3.bf16.msra.mxu0 %v5682_v21 }
 0x34b   : > { %5146 = vmatprep.subr.bf16.mxu0 %v5683_v22 }
 0x34c   : > { %5121 = vmatpush3.bf16.msra.mxu1 %v5677_v16 }
 0x34d   : > { %5099 = vmatmul.mubr.bf16.gmra.mxu0 %v7108_v58  ;;  %5122 = vmatprep.subr.bf16.mxu1 %v5678_v17 }
 0x34e   : > { %5102 = vmatprep.mubr.bf16.mxu0 %v7110_v59  ;;  %5147 = vmatpush3.bf16.msra.mxu0 %v5683_v22 }
 0x34f   : > { %5148 = vmatprep.subr.bf16.mxu0 %v5684_v23 }
 0x350   : > { %5123 = vmatpush3.bf16.msra.mxu1 %v5678_v17 }
 0x351   : > { %5124 = vmatprep.subr.bf16.mxu1 %v5679_v15 }
 0x352   : > { %5149 = vmatpush3.bf16.msra.mxu0 %v5684_v23 }
 0x353   : > { %5150 = vmatprep.subr.bf16.mxu0 %v5685_v24 }
 0x354   : > { %5125 = vmatpush3.bf16.msra.mxu1 %v5679_v15  ;;  %v1948_v15 = vpop.f32.mrf.mxu1 }
 0x355   : > { %5103 = vmatmul.mubr.bf16.gmra.mxu0 %v7114_v0  ;;  %5174 = vmatprep.subr.bf16.mxu1 %v7738_v18 }
 0x356   : > { %5106 = vmatprep.mubr.bf16.mxu0 %v7116_v1  ;;  %5151 = vmatpush3.bf16.msra.mxu0 %v5685_v24 }
 0x35d   : > { %5107 = vmatmul.mubr.bf16.gmra.mxu0 %v7120_v4 }
 0x3e5   : > { %v5032_v26 = vpop.f32.mrf.mxu0 }
 0x3e6   : > { %v7224_v33 = vadd.f32 %v5032_v26, %v7221_v27 }
 0x3e7   : > { %v1727_v29 = vpop.f32.mrf.mxu0 }
 0x3e8   : > { %v7230_v39 = vadd.f32 %v7221_v27, %v1727_v29 }
 0x3e9   : > { %v5033_v32 = vpop.f32.mrf.mxu0 }
 0x3ea   : > { %v7227_v19 = vadd.f32 %v5033_v32, %v7221_v27 }
 0x3eb   : > { %v1730_v36 = vpop.f32.mrf.mxu0 }
 0x3ec   : > { %v7235_v42 = vadd.f32 %v7221_v27, %v1730_v36  ;;  %v5073_v36 = vpop.f32.mrf.mxu1 }
 0x3ed   : > { %v7237_v43 = vpop.f32.mrf.mxu0 }
 0x3ee   : > { %v1951_v18 = vpop.f32.mrf.mxu1 }
 0x3ef   : > { %v7241_v46 = vpop.f32.mrf.mxu0 }
 0x3f1   : > { %v7243_v49 = vpop.f32.mrf.mxu0 }
 0x3f3   : > { %v7245_v51 = vpop.f32.mrf.mxu0 }
 0x3f5   : > { %v7247_v56 = vpop.f32.mrf.mxu0 }
 0x3f7   : > { %v7249_v57 = vpop.f32.mrf.mxu0 }
 0x3f9   : > { %v5041_v61 = vpop.f32.mrf.mxu0 }
 0x3fb   : > { %v7251_v62 = vpop.f32.mrf.mxu0 }
 0x3fd   : > { %v5044_v2 = vpop.f32.mrf.mxu0 }
 0x3ff   : > { %v1775_v3 = vpop.f32.mrf.mxu0 }
 0x401   : > { %v5045_v6 = vpop.f32.mrf.mxu0 }
 0x402   : > { %v1787_v29 = vadd.f32 %v5045_v6, %v7221_v27 }
 0x403   : > { %v1778_v7 = vpop.f32.mrf.mxu0 }
 0x405   : > { %v5096_v9 = vpop.f32.mrf.mxu0 }
 0x406   : > { %v2070_v12 = vadd.f32 %v5096_v9, %v5064_v30 }
 0x407   : > { %v2061_v10 = vpop.f32.mrf.mxu0 }
 0x408   : > { %v2062_v11 = vadd.f32 %v2061_v10, %v1916_v37  ;;  %v2134_v23 = vadd.f32 %v7254_v14, %v2070_v12  ;;  %v1784_v10 = vadd.f32 %v5044_v2, %v7221_v27 }
 0x409   : > { %v5097_v13 = vpop.f32.mrf.mxu0 }
 0x40a   : > { %v2073_v16 = vadd.f32 %v5097_v13, %v5065_v48  ;;  %v2132_v20 = vadd.f32 %v7254_v14, %v2062_v11  ;;  %v2150_v13 = vmax.f32 %v2134_v23, 0.0 }
 0x40b   : > { %v2064_v17 = vpop.f32.mrf.mxu0 }
 0x40c   : > { %v2135_v21 = vadd.f32 %v7254_v14, %v2073_v16  ;;  %v2065_v22 = vadd.f32 %v2064_v17, %v1919_v54  ;;  %v2148_v37 = vmax.f32 %v2132_v20, 0.0  ;;  %v1797_v17 = vpack.c.bf16 %v1787_v29, %v1784_v10 }
 0x40d   : > { %v5100_v24 = vpop.f32.mrf.mxu0 }
 0x40e   : > { %v2133_v26 = vadd.f32 %v7254_v14, %v2065_v22  ;;  %v2151_v30 = vmax.f32 %v2135_v21, 0.0  ;;  %v2086_v11 = vadd.f32 %v5100_v24, %v5068_v60  ;;  %v1779_v22 = vadd.f32 %v7221_v27, %v1778_v7  ;;  %v5076_v24 = vpop.f32.mrf.mxu1 }
 0x40f   : > { %v2077_v32 = vpop.f32.mrf.mxu0  ;;  %v1776_v60 = vadd.f32 %v7221_v27, %v1775_v3 }
 0x410   : > { %v2149_v9 = vmax.f32 %v2133_v26, 0.0  ;;  %v2078_v48 = vadd.f32 %v2077_v32, %v1932_v63  ;;  %v2165_v12 = vpack.c.bf16 %v2151_v30, %v2150_v13  ;;  %v2138_v63 = vadd.f32 %v7254_v14, %v2086_v11 }
 0x411   : > { %v5101_v45 = vpop.f32.mrf.mxu0  ;;  %v7811_v26 = vmov 0.0   ;;  %v1796_v29 = vpack.c.bf16 %v1779_v22, %v1776_v60  ;;  %v1768_v32 = vadd.f32 %v7247_v56, %v7221_v27 }
 0x412   : > { %v2089_v16 = vadd.f32 %v5101_v45, %v5069_v5  ;;  %v2164_v54 = vpack.c.bf16 %v2149_v9, %v2148_v37  ;;  %v2136_v6 = vadd.f32 %v7254_v14, %v2078_v48  ;;  %v1771_v5 = vadd.f32 %v5041_v61, %v7221_v27  ;;  %v1964_v61 = vpop.f32.mrf.mxu1 }
 0x413   : > { %v2080_v40 = vpop.f32.mrf.mxu0  ;;  %v2154_v37 = vmax.f32 %v2138_v63, 0.0 }
 0x414   : > { %v2139_v21 = vadd.f32 %v7254_v14, %v2089_v16  ;;  %v2081_v20 = vadd.f32 %v2080_v40, %v1935_v8  ;;  %5126 = vmatprep.mubr.bf16.mxu1 %v2164_v54  ;;  %v2152_v30 = vmax.f32 %v2136_v6, 0.0  ;;  %v1795_v13 = vpack.c.bf16 %v1771_v5, %v1768_v32 }
 0x415   : > { %v5104_v2 = vpop.f32.mrf.mxu0  ;;  %5127 = vmatmul.mubr.bf16.vlgmr.msra.gmra.mxu1 %v2165_v12  ;;  %v1763_v54 = vadd.f32 %v7221_v27, %v7251_v62  ;;  %v1760_v12 = vadd.f32 %v7221_v27, %v7249_v57  ;;  %v1755_v6 = vadd.f32 %v7243_v49, %v7221_v27  ;;  %v1747_v32 = vadd.f32 %v7221_v27, %v7245_v51 }
 0x416   : > { %v2137_v45 = vadd.f32 %v7254_v14, %v2081_v20  ;;  %5175 = vmatpush3.bf16.msra.mxu1 %v1797_v17  ;;  %v2155_v23 = vmax.f32 %v2139_v21, 0.0  ;;  %v2102_v9 = vadd.f32 %v5104_v2, %v5072_v55  ;;  %v5077_v21 = vpop.f32.mrf.mxu1 }
 0x417   : > { %v2093_v7 = vpop.f32.mrf.mxu0  ;;  %5176 = vmatprep.subr.bf16.mxu1 %v7811_v26 }
 0x418   : > { %v2153_v40 = vmax.f32 %v2137_v45, 0.0  ;;  %v2094_v8 = vadd.f32 %v2093_v7, %v1948_v15  ;;  %v2167_v16 = vpack.c.bf16 %v2155_v23, %v2154_v37  ;;  %v2142_v55 = vadd.f32 %v7254_v14, %v2102_v9  ;;  %v1967_v49 = vpop.f32.mrf.mxu1 }
 0x419   : > { %v5105_v3 = vpop.f32.mrf.mxu0  ;;  %v1752_v45 = vadd.f32 %v7237_v43, %v7221_v27 }
 0x41a   : > { %v2105_v48 = vadd.f32 %v5105_v3, %v5073_v36  ;;  %5177 = vmatpush3.bf16.msra.mxu1 %v1796_v29  ;;  %v2166_v10 = vpack.c.bf16 %v2153_v40, %v2152_v30  ;;  %v2140_v15 = vadd.f32 %v7254_v14, %v2094_v8  ;;  %v2158_v5 = vmax.f32 %v2142_v55, 0.0 }
 0x41b   : > { %v2096_v11 = vpop.f32.mrf.mxu0  ;;  %5178 = vmatprep.subr.bf16.mxu1 %v7811_v26  ;;  %v1793_v30 = vpack.c.bf16 %v1755_v6, %v1752_v45  ;;  %v1744_v3 = vadd.f32 %v7221_v27, %v7241_v46  ;;  %v7812_v27 = vpack.c.bf16 %v7227_v19, %v7224_v33  ;;  %v7305_v46 = vld [vmem:[%s957_s26] sm:$0xff]   ;;  %s7335_s26 = sld [smem:[#allocation4 + %s6545_s0]] }
 0x41c   : > { %v2143_v17 = vadd.f32 %v7254_v14, %v2105_v48  ;;  %v2097_v56 = vadd.f32 %v2096_v11, %v1951_v18  ;;  %5130 = vmatprep.mubr.bf16.mxu1 %v2166_v10  ;;  %v1794_v18 = vpack.c.bf16 %v1763_v54, %v1760_v12  ;;  %v2156_v63 = vmax.f32 %v2140_v15, 0.0 }
 0x41d   : > { %v5108_v36 = vpop.f32.mrf.mxu0  ;;  %5131 = vmatmul.mubr.bf16.gmra.mxu1 %v2167_v16  ;;  %v1792_v51 = vpack.c.bf16 %v1747_v32, %v1744_v3 }
 0x41e   : > { %v2141_v22 = vadd.f32 %v7254_v14, %v2097_v56  ;;  %5179 = vmatpush3.bf16.msra.mxu1 %v1795_v13  ;;  %v2159_v62 = vmax.f32 %v2143_v17, 0.0  ;;  %v2118_v57 = vadd.f32 %v5108_v36, %v5076_v24 }
 0x41f   : > { %v2109_v20 = vpop.f32.mrf.mxu0  ;;  %5180 = vmatprep.subr.bf16.mxu1 %v7811_v26 }
 0x420   : > { %v2157_v2 = vmax.f32 %v2141_v22, 0.0  ;;  %v2110_v60 = vadd.f32 %v2109_v20, %v1964_v61  ;;  %v2169_v8 = vpack.c.bf16 %v2159_v62, %v2158_v5  ;;  %v2146_v24 = vadd.f32 %v7254_v14, %v2118_v57  ;;  %v4583_v20 = vld [vmem:[%s2190_s6] ss:$0 sm:$0xff] }
 0x421   : > { %v5109_v23 = vpop.f32.mrf.mxu0  ;;  %s7339_s22 = smul.u32 192, %s7335_s26 }
 0x422   : > { %v2121_v7 = vadd.f32 %v5109_v23, %v5077_v21  ;;  %5181 = vmatpush3.bf16.msra.mxu1 %v1794_v18  ;;  %v2168_v29 = vpack.c.bf16 %v2157_v2, %v2156_v63  ;;  %v2144_v37 = vadd.f32 %v7254_v14, %v2110_v60  ;;  %v2162_v11 = vmax.f32 %v2146_v24, 0.0 }
 0x423   : > { %v2112_v40 = vpop.f32.mrf.mxu0  ;;  %5182 = vmatprep.subr.bf16.mxu1 %v7811_v26  ;;  %s7342_s4 = scalar_lea.vmem [#allocation29], %s7339_s22  ;;  %s7352_s0 = scalar_lea.vmem [#allocation31], %s7339_s22 }
 0x424   : > { %v2147_v9 = vadd.f32 %v7254_v14, %v2121_v7  ;;  %v2113_v43 = vadd.f32 %v2112_v40, %v1967_v49  ;;  %5134 = vmatprep.mubr.bf16.mxu1 %v2168_v29  ;;  %v2160_v13 = vmax.f32 %v2144_v37, 0.0  ;;  %v5696_v33 = vld [vmem:[%s7342_s4 + $0x78] ss:$12 sps:$4 sm:$0xff]   ;;  %v5702_v15 = vld [vmem:[%s7342_s4 + $0x48] ss:$12 sps:$4 sm:$0xff]   ;;  %s7412_s2 = scalar_lea.vmem [#allocation32], %s7339_s22 }
 0x425   : > { %5135 = vmatmul.mubr.bf16.gmra.mxu1 %v2169_v8  ;;  %v5701_v19 = vld [vmem:[%s7342_s4 + $0x64] ss:$12 sps:$4 sm:$0xff]   ;;  %v5707_v17 = vld [vmem:[%s7342_s4 + $0x34] ss:$12 sps:$4 sm:$0xff]   ;;  %v5710_v55 = vld [vmem:[%s7342_s4 + $0x1c] ss:$12 sps:$4 sm:$0xff]  }
 0x426   : > { %v2145_v48 = vadd.f32 %v7254_v14, %v2113_v43  ;;  %5183 = vmatpush3.bf16.msra.mxu1 %v1793_v30  ;;  %v2163_v10 = vmax.f32 %v2147_v9, 0.0  ;;  %v7813_v14 = vpack.c.bf16 %v7235_v42, %v7230_v39  ;;  %v5699_v39 = vld [vmem:[%s7342_s4 + $0x60] ss:$12 sps:$4 sm:$0xff]   ;;  %v5705_v56 = vld [vmem:[%s7342_s4 + $0x30] ss:$12 sps:$4 sm:$0xff]   ;;  %s7490_s19 = scalar_lea.vmem [#allocation34], %s7339_s22 }
 0x427   : > { %5184 = vmatprep.subr.bf16.mxu1 %v7811_v26  ;;  %v5704_v42 = vld [vmem:[%s7342_s4 + $0x4c] ss:$12 sps:$4 sm:$0xff]   ;;  %v5713_v12 = vld [vmem:[%s7342_s4 + $0x4] ss:$12 sps:$4 sm:$0xff]   ;;  %s7815_s22 = sld [smem:[#allocation70_spill]] }
 0x428   : > { %v2161_v61 = vmax.f32 %v2145_v48, 0.0  ;;  %v2171_v54 = vpack.c.bf16 %v2163_v10, %v2162_v11  ;;  %v5708_v36 = vld [vmem:[%s7342_s4 + $0x18] ss:$12 sps:$4 sm:$0xff]   ;;  %v5711_v22 = vld [vmem:[%s7342_s4] ss:$12 sps:$4 sm:$0xff]  }
 0x429   : > { %v5716_v6 = vld [vmem:[%s7352_s0 + $0xac] ss:$12 sps:$4 sm:$0xff]  }
 0x42a   : > { %5185 = vmatpush3.bf16.msra.mxu1 %v1792_v51  ;;  %v2170_v16 = vpack.c.bf16 %v2161_v61, %v2160_v13 }
 0x42b   : > { %5186 = vmatprep.subr.bf16.mxu1 %v7811_v26 }
 0x42c   : > { %5138 = vmatprep.mubr.bf16.mxu1 %v2170_v16 }
 0x42d   : > { %5139 = vmatmul.mubr.bf16.gmra.mxu1 %v2171_v54 }
 0x42e   : > { %5187 = vmatpush3.bf16.msra.mxu1 %v7812_v27  ;;  %5190 = vmatprep.mubr.msk.bf16.mxu1 %vm6585_vm0, %v7811_v26 }
 0x42f   : > { %5188 = vmatprep.subr.bf16.mxu1 %v7811_v26 }
 0x432   : > { %5189 = vmatpush3.bf16.msra.mxu1 %v7813_v14 }
 0x433   : > { %5214 = vmatprep.subr.bf16.mxu1 %v7811_v26 }
 0x435   : > { %5191 = vmatmul.mubr.bf16.vlgmr.msra.gmra.mxu1 %v7305_v46 }
 0x436   : > { %5215 = vmatpush3.bf16.msra.mxu1 %v7120_v4  ;;  %5230 = vmatprep.mubr.msk.bf16.mxu1 %vm6585_vm0, %v7811_v26  ;;  %v5693_v4 = vld [vmem:[%s7342_s4 + $0x90] ss:$12 sps:$4 sm:$0xff]  }
 0x437   : > { %5216 = vmatprep.subr.bf16.mxu1 %v7811_v26 }
 0x43a   : > { %5217 = vmatpush3.bf16.msra.mxu1 %v7116_v1  ;;  %v5695_v1 = vld [vmem:[%s7342_s4 + $0x94] ss:$12 sps:$4 sm:$0xff]  }
 0x43b   : > { %5218 = vmatprep.subr.bf16.mxu1 %v7811_v26 }
 0x43e   : > { %5219 = vmatpush3.bf16.msra.mxu1 %v7114_v0  ;;  %v5688_v0 = vld [vmem:[%s7208_s21 + $0x8] sm:$0xff]  }
 0x43f   : > { %5220 = vmatprep.subr.bf16.mxu1 %v7811_v26 }
 0x442   : > { %5221 = vmatpush3.bf16.msra.mxu1 %v7110_v59  ;;  %v5687_v59 = vld [vmem:[%s7208_s21 + $0x10] sm:$0xff]  }
 0x443   : > { %5222 = vmatprep.subr.bf16.mxu1 %v7811_v26  ;;  %5152 = vmatprep.subr.bf16.mxu0 %v5687_v59 }
 0x444   : > { %5153 = vmatpush3.bf16.msra.mxu0 %v5687_v59 }
 0x445   : > { %5154 = vmatprep.subr.bf16.mxu0 %v5688_v0 }
 0x446   : > { %5223 = vmatpush3.bf16.msra.mxu1 %v7108_v58  ;;  %v5689_v58 = vld [vmem:[%s7208_s21] sm:$0xff]  }
 0x447   : > { %5224 = vmatprep.subr.bf16.mxu1 %v7811_v26 }
 0x448   : > { %5155 = vmatpush3.bf16.msra.mxu0 %v5688_v0 }
 0x449   : > { %5156 = vmatprep.subr.bf16.mxu0 %v5689_v58 }
 0x44a   : > { %5225 = vmatpush3.bf16.msra.mxu1 %v7104_v53  ;;  %v5692_v53 = vld [vmem:[%s7342_s4 + $0xac] ss:$12 sps:$4 sm:$0xff]  }
 0x44b   : > { %5226 = vmatprep.subr.bf16.mxu1 %v7811_v26 }
 0x44c   : > { %5157 = vmatpush3.bf16.msra.mxu0 %v5689_v58 }
 0x44d   : > { %5194 = vmatprep.subr.bf16.mxu0 %v7811_v26 }
 0x44e   : > { %5227 = vmatpush3.bf16.msra.mxu1 %v7102_v52  ;;  %v6586_v52 = vmov 0  }
 0x44f   : > { %5228 = vmatprep.subr.bf16.mxu1 %v7811_v26 }
 0x452   : > { %5229 = vmatpush3.bf16.msra.mxu1 %v7077_v34  ;;  %v5690_v34 = vld [vmem:[%s7342_s4 + $0xa8] ss:$12 sps:$4 sm:$0xff]  }
 0x453   : > { %2941 = vmatprep.subr.bf16.mxu1 %v5692_v53 }
 0x455   : > { %5231 = vmatmul.mubr.bf16.vlgmr.msra.gmra.mxu1 %v7217_v25  ;;  %v5698_v25 = vld [vmem:[%s7342_s4 + $0x7c] ss:$12 sps:$4 sm:$0xff]  }
 0x456   : > { %2973 = vmatprep.mubr.bf16.mxu1 %v6586_v52  ;;  %2942 = vmatpush1.bf16.msra.mxu1 %v5690_v34 }
 0x457   : > { %2943 = vmatprep.subr.bf16.mxu1 %v5695_v1 }
 0x45a   : > { %2944 = vmatpush1.bf16.msra.mxu1 %v5693_v4 }
 0x45b   : > { %2945 = vmatprep.subr.bf16.mxu1 %v5698_v25 }
 0x45e   : > { %2946 = vmatpush1.bf16.msra.mxu1 %v5696_v33 }
 0x45f   : > { %2947 = vmatprep.subr.bf16.mxu1 %v5701_v19 }
 0x462   : > { %2948 = vmatpush1.bf16.msra.mxu1 %v5699_v39 }
 0x463   : > { %2949 = vmatprep.subr.bf16.mxu1 %v5704_v42 }
 0x466   : > { %2950 = vmatpush1.bf16.msra.mxu1 %v5702_v15 }
 0x467   : > { %2951 = vmatprep.subr.bf16.mxu1 %v5707_v17 }
 0x46a   : > { %2952 = vmatpush1.bf16.msra.mxu1 %v5705_v56 }
 0x46b   : > { %2953 = vmatprep.subr.bf16.mxu1 %v5710_v55 }
 0x46e   : > { %2954 = vmatpush1.bf16.msra.mxu1 %v5708_v36 }
 0x46f   : > { %2955 = vmatprep.subr.bf16.mxu1 %v5713_v12 }
 0x472   : > { %2956 = vmatpush1.bf16.msra.mxu1 %v5711_v22 }
 0x473   : > { %3170 = vmatprep.subr.bf16.mxu1 %v5716_v6 }
 0x4d5   : > { %v5128_v62 = vpop.f32.mrf.mxu1 }
 0x4d6   : > { %v2289_v60 = vadd.f32 %v5128_v62, %v4583_v20 }
 0x4d7   : > { %v2280_v21 = vpop.f32.mrf.mxu1 }
 0x4d8   : > { %v2281_v63 = vadd.f32 %v4583_v20, %v2280_v21  ;;  %v2345_v30 = vmax.f32 %v2289_v60, 0.0 }
 0x4d9   : > { %v5129_v18 = vpop.f32.mrf.mxu1 }
 0x4da   : > { %v2292_v2 = vadd.f32 %v5129_v18, %v4583_v20  ;;  %v2343_v7 = vmax.f32 %v2281_v63, 0.0 }
 0x4db   : > { %v2283_v45 = vpop.f32.mrf.mxu1 }
 0x4dc   : > { %v2284_v5 = vadd.f32 %v4583_v20, %v2283_v45  ;;  %v2346_v57 = vmax.f32 %v2292_v2, 0.0 }
 0x4dd   : > { %v5132_v23 = vpop.f32.mrf.mxu1 }
 0x4de   : > { %v2344_v29 = vmax.f32 %v2284_v5, 0.0  ;;  %v2360_v8 = vpack.c.bf16 %v2346_v57, %v2345_v30  ;;  %v2305_v43 = vadd.f32 %v5132_v23, %v4583_v20  ;;  %v5714_v5 = vld [vmem:[%s7352_s0 + $0xa8] ss:$12 sps:$4 sm:$0xff]   ;;  %v5720_v30 = vld [vmem:[%s7352_s0 + $0x78] ss:$12 sps:$4 sm:$0xff]  }
 0x4df   : > { %v2296_v49 = vpop.f32.mrf.mxu1  ;;  %v5719_v23 = vld [vmem:[%s7352_s0 + $0x94] ss:$12 sps:$4 sm:$0xff]  }
 0x4e0   : > { %v2359_v40 = vpack.c.bf16 %v2344_v29, %v2343_v7  ;;  %v2297_v37 = vadd.f32 %v4583_v20, %v2296_v49  ;;  %v2349_v61 = vmax.f32 %v2305_v43, 0.0  ;;  %v5717_v7 = vld [vmem:[%s7352_s0 + $0x90] ss:$12 sps:$4 sm:$0xff]  }
 0x4e1   : > { %v5133_v32 = vpop.f32.mrf.mxu1  ;;  %v5722_v29 = vld [vmem:[%s7352_s0 + $0x7c] ss:$12 sps:$4 sm:$0xff]   ;;  %v5725_v49 = vld [vmem:[%s7352_s0 + $0x64] ss:$12 sps:$4 sm:$0xff]  }
 0x4e2   : > { %v2308_v9 = vadd.f32 %v5133_v32, %v4583_v20  ;;  %5158 = vmatprep.mubr.bf16.mxu0 %v2359_v40  ;;  %v2347_v51 = vmax.f32 %v2297_v37, 0.0  ;;  %v5723_v40 = vld [vmem:[%s7352_s0 + $0x60] ss:$12 sps:$4 sm:$0xff]   ;;  %v5726_v32 = vld [vmem:[%s7352_s0 + $0x48] ss:$12 sps:$4 sm:$0xff]  }
 0x4e3   : > { %v2299_v24 = vpop.f32.mrf.mxu1  ;;  %5159 = vmatmul.mubr.bf16.vlgmr.msra.gmra.mxu0 %v2360_v8  ;;  %v5728_v8 = vld [vmem:[%s7352_s0 + $0x4c] ss:$12 sps:$4 sm:$0xff]   ;;  %v5731_v37 = vld [vmem:[%s7352_s0 + $0x34] ss:$12 sps:$4 sm:$0xff]   ;;  %v5734_v43 = vld [vmem:[%s7352_s0 + $0x1c] ss:$12 sps:$4 sm:$0xff]  }
 0x4e4   : > { %v2300_v3 = vadd.f32 %v4583_v20, %v2299_v24  ;;  %v2350_v48 = vmax.f32 %v2308_v9, 0.0  ;;  %v5729_v9 = vld [vmem:[%s7352_s0 + $0x30] ss:$12 sps:$4 sm:$0xff]   ;;  %v5732_v24 = vld [vmem:[%s7352_s0 + $0x18] ss:$12 sps:$4 sm:$0xff]  }
 0x4e5   : > { %v5136_v10 = vpop.f32.mrf.mxu1 }
 0x4e6   : > { %v2348_v13 = vmax.f32 %v2300_v3, 0.0  ;;  %v2362_v54 = vpack.c.bf16 %v2350_v48, %v2349_v61  ;;  %v2321_v0 = vadd.f32 %v5136_v10, %v4583_v20  ;;  %v5737_v3 = vld [vmem:[%s7352_s0 + $0x4] ss:$12 sps:$4 sm:$0xff]   ;;  %v5735_v10 = vld [vmem:[%s7352_s0] ss:$12 sps:$4 sm:$0xff]  }
 0x4e7   : > { %v2312_v11 = vpop.f32.mrf.mxu1 }
 0x4e8   : > { %v2361_v16 = vpack.c.bf16 %v2348_v13, %v2347_v51  ;;  %v2313_v14 = vadd.f32 %v4583_v20, %v2312_v11  ;;  %v2353_v33 = vmax.f32 %v2321_v0, 0.0 }
 0x4e9   : > { %v5137_v27 = vpop.f32.mrf.mxu1 }
 0x4ea   : > { %v2324_v59 = vadd.f32 %v5137_v27, %v4583_v20  ;;  %5162 = vmatprep.mubr.bf16.mxu0 %v2361_v16  ;;  %v2351_v4 = vmax.f32 %v2313_v14, 0.0 }
 0x4eb   : > { %v2315_v58 = vpop.f32.mrf.mxu1  ;;  %5163 = vmatmul.mubr.bf16.gmra.mxu0 %v2362_v54 }
 0x4ec   : > { %v2316_v34 = vadd.f32 %v4583_v20, %v2315_v58  ;;  %v2354_v53 = vmax.f32 %v2324_v59, 0.0 }
 0x4ed   : > { %v5140_v1 = vpop.f32.mrf.mxu1 }
 0x4ee   : > { %v2352_v25 = vmax.f32 %v2316_v34, 0.0  ;;  %v2364_v42 = vpack.c.bf16 %v2354_v53, %v2353_v33  ;;  %v2337_v55 = vadd.f32 %v5140_v1, %v4583_v20 }
 0x4ef   : > { %v2328_v19 = vpop.f32.mrf.mxu1 }
 0x4f0   : > { %v2363_v39 = vpack.c.bf16 %v2352_v25, %v2351_v4  ;;  %v2329_v17 = vadd.f32 %v4583_v20, %v2328_v19  ;;  %v2357_v18 = vmax.f32 %v2337_v55, 0.0 }
 0x4f1   : > { %v5141_v15 = vpop.f32.mrf.mxu1 }
 0x4f2   : > { %v2340_v56 = vadd.f32 %v5141_v15, %v4583_v20  ;;  %5166 = vmatprep.mubr.bf16.mxu0 %v2363_v39  ;;  %v2355_v62 = vmax.f32 %v2329_v17, 0.0  ;;  %v4593_v39 = vld [vmem:[%s2385_s27] ss:$0 sm:$0xff] }
 0x4f3   : > { %v2331_v36 = vpop.f32.mrf.mxu1  ;;  %5167 = vmatmul.mubr.bf16.gmra.mxu0 %v2364_v42 }
 0x4f4   : > { %v2332_v12 = vadd.f32 %v4583_v20, %v2331_v36  ;;  %v2358_v22 = vmax.f32 %v2340_v56, 0.0 }
 0x4f5   : > { %v2586_v6 = vpop.f32.mrf.mxu1 }
 0x4f6   : > { %v2356_v21 = vmax.f32 %v2332_v12, 0.0  ;;  %v2366_v60 = vpack.c.bf16 %v2358_v22, %v2357_v18  ;;  %v5754_v22 = vld [vmem:[%s7412_s2 + $0xa8] ss:$12 sps:$4 sm:$0xff]  }
 0x4f7   : > { %v5192_v63 = vpop.f32.mrf.mxu1 }
 0x4f8   : > { %v2365_v2 = vpack.c.bf16 %v2356_v21, %v2355_v62  ;;  %v5758_v63 = vld [vmem:[%s7412_s2 + $0x90] ss:$12 sps:$4 sm:$0xff]  }
 0x4f9   : > { %v2589_v45 = vpop.f32.mrf.mxu1 }
 0x4fa   : > { %5170 = vmatprep.mubr.bf16.mxu0 %v2365_v2  ;;  %v7369_v57 = vpack.c.bf16 %v2589_v45, %v2586_v6  ;;  %v5756_v6 = vld [vmem:[%s7412_s2 + $0xac] ss:$12 sps:$4 sm:$0xff]   ;;  %v5760_v2 = vld [vmem:[%s7412_s2 + $0x94] ss:$12 sps:$4 sm:$0xff]  }
 0x4fb   : > { %5171 = vmatmul.mubr.bf16.gmra.mxu0 %v2366_v60  ;;  %v5193_v20 = vpop.f32.mrf.mxu1 }
 0x4fc   : > { %2974 = vmatmul.mubr.bf16.vlgmr.msra.gmra.mxu1 %v7369_v57  ;;  %5210 = vmatprep.mubr.msk.bf16.mxu0 %vm6585_vm0, %v7811_v26  ;;  %v5762_v20 = vld [vmem:[%s7412_s2 + $0x78] ss:$12 sps:$4 sm:$0xff]  }
 0x4fd   : > { %3171 = vmatpush1.bf16.msra.mxu1 %v5714_v5  ;;  %3202 = vmatprep.mubr.bf16.mxu1 %v6586_v52  ;;  %v5764_v5 = vld [vmem:[%s7412_s2 + $0x7c] ss:$12 sps:$4 sm:$0xff]  }
 0x4fe   : > { %3172 = vmatprep.subr.bf16.mxu1 %v5719_v23 }
 0x501   : > { %3173 = vmatpush1.bf16.msra.mxu1 %v5717_v7  ;;  %v5768_v7 = vld [vmem:[%s7412_s2 + $0x64] ss:$12 sps:$4 sm:$0xff]  }
 0x502   : > { %3174 = vmatprep.subr.bf16.mxu1 %v5722_v29 }
 0x505   : > { %3175 = vmatpush1.bf16.msra.mxu1 %v5720_v30 }
 0x506   : > { %3176 = vmatprep.subr.bf16.mxu1 %v5725_v49 }
 0x509   : > { %3177 = vmatpush1.bf16.msra.mxu1 %v5723_v40  ;;  %v5766_v40 = vld [vmem:[%s7412_s2 + $0x60] ss:$12 sps:$4 sm:$0xff]  }
 0x50a   : > { %3178 = vmatprep.subr.bf16.mxu1 %v5728_v8  ;;  %v5772_v8 = vld [vmem:[%s7412_s2 + $0x4c] ss:$12 sps:$4 sm:$0xff]  }
 0x50d   : > { %3179 = vmatpush1.bf16.msra.mxu1 %v5726_v32 }
 0x50e   : > { %3180 = vmatprep.subr.bf16.mxu1 %v5731_v37 }
 0x511   : > { %3181 = vmatpush1.bf16.msra.mxu1 %v5729_v9 }
 0x512   : > { %3182 = vmatprep.subr.bf16.mxu1 %v5734_v43  ;;  %v5770_v43 = vld [vmem:[%s7412_s2 + $0x48] ss:$12 sps:$4 sm:$0xff]  }
 0x515   : > { %v7388_v48 = vpop.f32.mrf.mxu1  ;;  %3183 = vmatpush1.bf16.msra.mxu1 %v5732_v24  ;;  %v5776_v24 = vld [vmem:[%s7412_s2 + $0x34] ss:$12 sps:$4 sm:$0xff]  }
 0x516   : > { %3184 = vmatprep.subr.bf16.mxu1 %v5737_v3 }
 0x517   : > { %v5232_v51 = vpop.f32.mrf.mxu1 }
 0x519   : > { %v7391_v13 = vpop.f32.mrf.mxu1  ;;  %3185 = vmatpush1.bf16.msra.mxu1 %v5735_v10 }
 0x51a   : > { %v7395_v61 = vpack.c.bf16 %v7391_v13, %v7388_v48  ;;  %3513 = vmatprep.subr.bf16.mxu1 %v5756_v6 }
 0x51b   : > { %v5233_v11 = vpop.f32.mrf.mxu1 }
 0x51c   : > { %3203 = vmatmul.mubr.bf16.vlgmr.msra.gmra.mxu1 %v7395_v61  ;;  %v5774_v11 = vld [vmem:[%s7412_s2 + $0x30] ss:$12 sps:$4 sm:$0xff]  }
 0x51d   : > { %3545 = vmatprep.mubr.bf16.mxu1 %v6586_v52  ;;  %3514 = vmatpush1.bf16.msra.mxu1 %v5754_v22  ;;  %v5785_v22 = vld [vmem:[%s7412_s2 + $0x8] ss:$12 sps:$4 sm:$0xff]  }
 0x51e   : > { %3515 = vmatprep.subr.bf16.mxu1 %v5760_v2 }
 0x521   : > { %3516 = vmatpush1.bf16.msra.mxu1 %v5758_v63  ;;  %v5789_v63 = vld [vmem:[%s7490_s19 + $0xb0] ss:$12 sps:$4 sm:$0xff]  }
 0x522   : > { %3517 = vmatprep.subr.bf16.mxu1 %v5764_v5  ;;  %v5790_v5 = vld [vmem:[%s7490_s19 + $0x90] ss:$12 sps:$4 sm:$0xff]  }
 0x525   : > { %3518 = vmatpush1.bf16.msra.mxu1 %v5762_v20  ;;  %v5796_v20 = vld [vmem:[%s7490_s19 + $0x7c] ss:$12 sps:$4 sm:$0xff]  }
 0x526   : > { %3519 = vmatprep.subr.bf16.mxu1 %v5768_v7  ;;  %v5794_v7 = vld [vmem:[%s7490_s19 + $0x78] ss:$12 sps:$4 sm:$0xff]  }
 0x529   : > { %3520 = vmatpush1.bf16.msra.mxu1 %v5766_v40  ;;  %v5804_v40 = vld [vmem:[%s7490_s19 + $0x4c] ss:$12 sps:$4 sm:$0xff]  }
 0x52a   : > { %3521 = vmatprep.subr.bf16.mxu1 %v5772_v8  ;;  %v5802_v8 = vld [vmem:[%s7490_s19 + $0x48] ss:$12 sps:$4 sm:$0xff]  }
 0x52d   : > { %3522 = vmatpush1.bf16.msra.mxu1 %v5770_v43  ;;  %v5809_v43 = vld [vmem:[%s7490_s19 + $0x38] ss:$12 sps:$4 sm:$0xff]  }
 0x52e   : > { %3523 = vmatprep.subr.bf16.mxu1 %v5776_v24  ;;  %v5812_v24 = vld [vmem:[%s7490_s19 + $0x1c] ss:$12 sps:$4 sm:$0xff]  }
 0x531   : > { %3524 = vmatpush1.bf16.msra.mxu1 %v5774_v11 }
 0x5a3   : > { %v7399_v16 = vpop.f32.mrf.mxu0 }
 0x5a4   : > { %v2484_v51 = vadd.f32 %v7399_v16, %v4593_v39  ;;  %v5746_v16 = vld [vmem:[%s7352_s0 + $0xb0] ss:$12 sps:$4 sm:$0xff]  }
 0x5a5   : > { %v7401_v54 = vpop.f32.mrf.mxu0 }
 0x5a7   : > { %v7403_v27 = vpop.f32.mrf.mxu0 }
 0x5a8   : > { %v2487_v3 = vadd.f32 %v7403_v27, %v4593_v39 }
 0x5a9   : > { %v7405_v14 = vpop.f32.mrf.mxu0 }
 0x5ab   : > { %v5164_v59 = vpop.f32.mrf.mxu0 }
 0x5ac   : > { %v2500_v49 = vadd.f32 %v5164_v59, %v4593_v39  ;;  %v5780_v59 = vld [vmem:[%s7412_s2 + $0x1c] ss:$12 sps:$4 sm:$0xff]  }
 0x5ad   : > { %v2491_v0 = vpop.f32.mrf.mxu0  ;;  %3525 = vmatprep.subr.bf16.mxu1 %v5780_v59 }
 0x5ae   : > { %v2492_v9 = vadd.f32 %v4593_v39, %v2491_v0  ;;  %v2539_v0 = vpack.c.bf16 %v2487_v3, %v2484_v51  ;;  %v5810_v3 = vld [vmem:[%s7490_s19 + $0x18] ss:$12 sps:$4 sm:$0xff]  }
 0x5af   : > { %v5165_v58 = vpop.f32.mrf.mxu0  ;;  %v5816_v51 = vld [vmem:[%s7490_s19 + $0x4] ss:$12 sps:$4 sm:$0xff]  }
 0x5b0   : > { %v2503_v29 = vadd.f32 %v5165_v58, %v4593_v39  ;;  %v2479_v58 = vadd.f32 %v4593_v39, %v7405_v14  ;;  %v5782_v14 = vld [vmem:[%s7412_s2] ss:$12 sps:$4 sm:$0xff]  }
 0x5b1   : > { %v2494_v34 = vpop.f32.mrf.mxu0 }
 0x5b2   : > { %v2541_v32 = vpack.c.bf16 %v2503_v29, %v2500_v49  ;;  %v2495_v37 = vadd.f32 %v4593_v39, %v2494_v34  ;;  %v2476_v34 = vadd.f32 %v4593_v39, %v7401_v54  ;;  %v5747_v54 = vld [vmem:[%s7352_s0 + $0x98] ss:$12 sps:$4 sm:$0xff]   ;;  %v5797_v29 = vld [vmem:[%s7490_s19 + $0x80] ss:$12 sps:$4 sm:$0xff]  }
 0x5b3   : > { %v5168_v53 = vpop.f32.mrf.mxu0  ;;  %v5798_v49 = vld [vmem:[%s7490_s19 + $0x60] ss:$12 sps:$4 sm:$0xff]  }
 0x5b4   : > { %v2516_v18 = vadd.f32 %v5168_v53, %v4593_v39  ;;  %v2540_v10 = vpack.c.bf16 %v2495_v37, %v2492_v9  ;;  %v5778_v53 = vld [vmem:[%s7412_s2 + $0x18] ss:$12 sps:$4 sm:$0xff]   ;;  %v2538_v27 = vpack.c.bf16 %v2479_v58, %v2476_v34  ;;  %v5808_v37 = vld [vmem:[%s7490_s19 + $0x34] ss:$12 sps:$4 sm:$0xff]   ;;  %v5806_v9 = vld [vmem:[%s7490_s19 + $0x30] ss:$12 sps:$4 sm:$0xff]  }
 0x5b5   : > { %v2507_v1 = vpop.f32.mrf.mxu0  ;;  %3526 = vmatpush1.bf16.msra.mxu1 %v5778_v53  ;;  %v5817_v58 = vld [vmem:[%s7490_s19 + $0x8] ss:$12 sps:$4 sm:$0xff]  }
 0x5b6   : > { %v2508_v23 = vadd.f32 %v4593_v39, %v2507_v1  ;;  %v5784_v1 = vld [vmem:[%s7412_s2 + $0x4] ss:$12 sps:$4 sm:$0xff]  }
 0x5b7   : > { %v5169_v4 = vpop.f32.mrf.mxu0  ;;  %3527 = vmatprep.subr.bf16.mxu1 %v5784_v1 }
 0x5b8   : > { %v2519_v62 = vadd.f32 %v5169_v4, %v4593_v39  ;;  %v5748_v4 = vld [vmem:[%s7352_s0 + $0x80] ss:$12 sps:$4 sm:$0xff]  }
 0x5b9   : > { %v2510_v25 = vpop.f32.mrf.mxu0  ;;  %3528 = vmatpush1.bf16.msra.mxu1 %v5782_v14 }
 0x5ba   : > { %v2543_v60 = vpack.c.bf16 %v2519_v62, %v2516_v18  ;;  %v2511_v45 = vadd.f32 %v4593_v39, %v2510_v25  ;;  %v5749_v25 = vld [vmem:[%s7352_s0 + $0x68] ss:$12 sps:$4 sm:$0xff]  }
 0x5bb   : > { %v5172_v33 = vpop.f32.mrf.mxu0  ;;  %v5786_v18 = vld [vmem:[%s7490_s19 + $0xa8] ss:$12 sps:$4 sm:$0xff]  }
 0x5bc   : > { %v2532_v15 = vadd.f32 %v5172_v33, %v4593_v39  ;;  %v2542_v30 = vpack.c.bf16 %v2511_v45, %v2508_v23  ;;  %v5750_v33 = vld [vmem:[%s7352_s0 + $0x50] ss:$12 sps:$4 sm:$0xff]   ;;  %v5793_v23 = vld [vmem:[%s7490_s19 + $0x98] ss:$12 sps:$4 sm:$0xff]   ;;  %v2975_v11 = vpop.f32.mrf.mxu1 }
 0x5bd   : > { %v2523_v19 = vpop.f32.mrf.mxu0 }
 0x5be   : > { %v2524_v12 = vadd.f32 %v4593_v39, %v2523_v19  ;;  %v5751_v19 = vld [vmem:[%s7352_s0 + $0x38] ss:$12 sps:$4 sm:$0xff]   ;;  %v2977_v34 = vpop.f32.mrf.mxu1 }
 0x5bf   : > { %v5173_v42 = vpop.f32.mrf.mxu0 }
 0x5c0   : > { %v2535_v17 = vadd.f32 %v5173_v42, %v4593_v39  ;;  %v5753_v42 = vld [vmem:[%s7352_s0 + $0x8] ss:$12 sps:$4 sm:$0xff]  }
 0x5c1   : > { %v2526_v56 = vpop.f32.mrf.mxu0 }
 0x5c2   : > { %v2545_v55 = vpack.c.bf16 %v2535_v17, %v2532_v15  ;;  %v2527_v36 = vadd.f32 %v4593_v39, %v2526_v56  ;;  %v5752_v39 = vld [vmem:[%s7352_s0 + $0x20] ss:$12 sps:$4 sm:$0xff]   ;;  %v5757_v15 = vld [vmem:[%s7412_s2 + $0xb0] ss:$12 sps:$4 sm:$0xff]   ;;  %v5761_v17 = vld [vmem:[%s7412_s2 + $0x98] ss:$12 sps:$4 sm:$0xff]  }
 0x5c3   : > { %v5765_v56 = vld [vmem:[%s7412_s2 + $0x80] ss:$12 sps:$4 sm:$0xff]  }
 0x5c4   : > { %5195 = vmatpush3.bf16.msra.mxu0 %v2545_v55  ;;  %v2544_v21 = vpack.c.bf16 %v2527_v36, %v2524_v12  ;;  %v5769_v55 = vld [vmem:[%s7412_s2 + $0x68] ss:$12 sps:$4 sm:$0xff]   ;;  %v5773_v36 = vld [vmem:[%s7412_s2 + $0x50] ss:$12 sps:$4 sm:$0xff]   ;;  %v5781_v12 = vld [vmem:[%s7412_s2 + $0x20] ss:$12 sps:$4 sm:$0xff]  }
 0x5c5   : > { %5196 = vmatprep.subr.bf16.mxu0 %v7811_v26 }
 0x5c8   : > { %5197 = vmatpush3.bf16.msra.mxu0 %v2544_v21 }
 0x5c9   : > { %5198 = vmatprep.subr.bf16.mxu0 %v7811_v26 }
 0x5cc   : > { %5199 = vmatpush3.bf16.msra.mxu0 %v2543_v60  ;;  %v5792_v60 = vld [vmem:[%s7490_s19 + $0x94] ss:$12 sps:$4 sm:$0xff]  }
 0x5cd   : > { %5200 = vmatprep.subr.bf16.mxu0 %v7811_v26 }
 0x5d0   : > { %5201 = vmatpush3.bf16.msra.mxu0 %v2542_v30  ;;  %v5800_v30 = vld [vmem:[%s7490_s19 + $0x64] ss:$12 sps:$4 sm:$0xff]  }
 0x5d1   : > { %5202 = vmatprep.subr.bf16.mxu0 %v7811_v26 }
 0x5d4   : > { %5203 = vmatpush3.bf16.msra.mxu0 %v2541_v32  ;;  %v5805_v32 = vld [vmem:[%s7490_s19 + $0x50] ss:$12 sps:$4 sm:$0xff]  }
 0x5d5   : > { %5204 = vmatprep.subr.bf16.mxu0 %v7811_v26 }
 0x5d8   : > { %5205 = vmatpush3.bf16.msra.mxu0 %v2540_v10  ;;  %v5813_v10 = vld [vmem:[%s7490_s19 + $0x20] ss:$12 sps:$4 sm:$0xff]  }
 0x5d9   : > { %5206 = vmatprep.subr.bf16.mxu0 %v7811_v26 }
 0x5dc   : > { %5207 = vmatpush3.bf16.msra.mxu0 %v2539_v0  ;;  %v5814_v0 = vld [vmem:[%s7490_s19] ss:$12 sps:$4 sm:$0xff]  }
 0x5dd   : > { %5208 = vmatprep.subr.bf16.mxu0 %v7811_v26 }
 0x5e0   : > { %5209 = vmatpush3.bf16.msra.mxu0 %v2538_v27 }
 0x5e1   : > { %5234 = vmatprep.subr.bf16.mxu0 %v7811_v26 }
 0x5e3   : > { %5211 = vmatmul.mubr.bf16.vlgmr.msra.gmra.mxu0 %v7305_v46  ;;  %v5745_v46 = vld [vmem:[%s7342_s4 + $0x8] ss:$12 sps:$4 sm:$0xff]  }
 0x5e4   : > { %5235 = vmatpush3.bf16.msra.mxu0 %v7166_v50  ;;  %5250 = vmatprep.mubr.msk.bf16.mxu0 %vm6585_vm0, %v7811_v26  ;;  %v5744_v50 = vld [vmem:[%s7342_s4 + $0x20] ss:$12 sps:$4 sm:$0xff]  }
 0x5e5   : > { %5236 = vmatprep.subr.bf16.mxu0 %v7811_v26 }
 0x5e8   : > { %5237 = vmatpush3.bf16.msra.mxu0 %v7164_v47  ;;  %v5743_v47 = vld [vmem:[%s7342_s4 + $0x38] ss:$12 sps:$4 sm:$0xff]  }
 0x5e9   : > { %5238 = vmatprep.subr.bf16.mxu0 %v7811_v26 }
 0x5ec   : > { %5239 = vmatpush3.bf16.msra.mxu0 %v7160_v44  ;;  %v5739_v44 = vld [vmem:[%s7342_s4 + $0x98] ss:$12 sps:$4 sm:$0xff]  }
 0x5ed   : > { %5240 = vmatprep.subr.bf16.mxu0 %v7811_v26 }
 0x5f0   : > { %5241 = vmatpush3.bf16.msra.mxu0 %v7158_v41  ;;  %v5738_v41 = vld [vmem:[%s7342_s4 + $0xb0] ss:$12 sps:$4 sm:$0xff]  }
 0x5f1   : > { %5242 = vmatprep.subr.bf16.mxu0 %v7811_v26 }
 0x5f4   : > { %5243 = vmatpush3.bf16.msra.mxu0 %v7154_v38  ;;  %v5858_v38 = vld [vmem:[%s966_s8] sm:$0xff]   ;;  %s7563_s8 = smul.u32 3, %s7335_s26 }
 0x5f5   : > { %5244 = vmatprep.subr.bf16.mxu0 %v7811_v26 }
 0x5f6   : > { %s2792_s21 = scalar_lea.vmem %s7814_s10, %s7563_s8  ;;  %s3364_s17 = scalar_lea.vmem %s7816_s15, %s7563_s8 }
 0x5f7   : > { %s3366_s27 = scalar_lea.vmem %s7817_s28, %s7563_s8 }
 0x5f8   : > { %5245 = vmatpush3.bf16.msra.mxu0 %v7152_v35  ;;  %v5742_v35 = vld [vmem:[%s7342_s4 + $0x50] ss:$12 sps:$4 sm:$0xff]  }
 0x5f9   : > { %5246 = vmatprep.subr.bf16.mxu0 %v7811_v26 }
 0x5fc   : > { %5247 = vmatpush3.bf16.msra.mxu0 %v7148_v31  ;;  %v5740_v31 = vld [vmem:[%s7342_s4 + $0x80] ss:$12 sps:$4 sm:$0xff]  }
 0x5fd   : > { %5248 = vmatprep.subr.bf16.mxu0 %v7811_v26 }
 0x600   : > { %5249 = vmatpush3.bf16.msra.mxu0 %v7146_v28  ;;  %v5741_v28 = vld [vmem:[%s7342_s4 + $0x68] ss:$12 sps:$4 sm:$0xff]   ;;  %s2794_s4 = scalar_lea.vmem %s7815_s22, %s7563_s8 }
 0x601   : > { %5254 = vmatprep.subr.bf16.mxu0 %v7811_v26 }
 0x603   : > { %5251 = vmatmul.mubr.bf16.vlgmr.msra.gmra.mxu0 %v5858_v38 }
 0x604   : > { %5255 = vmatpush3.bf16.msra.mxu0 %v5738_v41  ;;  %5270 = vmatprep.mubr.msk.bf16.mxu0 %vm6585_vm0, %v7811_v26  ;;  %v2798_v41 = vlaneseq }
 0x605   : > { %5256 = vmatprep.subr.bf16.mxu0 %v7811_v26 }
 0x608   : > { %5257 = vmatpush3.bf16.msra.mxu0 %v5739_v44  ;;  %v2979_v44 = vpop.f32.mrf.mxu1 }
 0x609   : > { %5258 = vmatprep.subr.bf16.mxu0 %v7811_v26 }
 0x60c   : > { %5259 = vmatpush3.bf16.msra.mxu0 %v5740_v31 }
 0x60d   : > { %5260 = vmatprep.subr.bf16.mxu0 %v7811_v26 }
 0x610   : > { %5261 = vmatpush3.bf16.msra.mxu0 %v5741_v28  ;;  %v2799_v28 = vshrl.u32 %v2798_v41, 7 }
 0x611   : > { %5262 = vmatprep.subr.bf16.mxu0 %v7811_v26 }
 0x614   : > { %5263 = vmatpush3.bf16.msra.mxu0 %v5742_v35  ;;  %v7569_v35 = vsub.s32 0, %v2799_v28 }
 0x615   : > { %5264 = vmatprep.subr.bf16.mxu0 %v7811_v26 }
 0x618   : > { %5265 = vmatpush3.bf16.msra.mxu0 %v5743_v47  ;;  %v2793_v47 = vld [vmem:[%s2792_s21] sm:$0x7] }
 0x619   : > { %5266 = vmatprep.subr.bf16.mxu0 %v7811_v26 }
 0x61c   : > { %5267 = vmatpush3.bf16.msra.mxu0 %v5744_v50  ;;  %v2795_v50 = vld [vmem:[%s2794_s4] sm:$0x7] }
 0x61d   : > { %5268 = vmatprep.subr.bf16.mxu0 %v7811_v26 }
 0x620   : > { %5269 = vmatpush3.bf16.msra.mxu0 %v5745_v46 }
 0x621   : > { %5274 = vmatprep.subr.bf16.mxu0 %v7811_v26 }
 0x623   : > { %5271 = vmatmul.mubr.bf16.vlgmr.msra.gmra.mxu0 %v7369_v57  ;;  %v5788_v57 = vld [vmem:[%s7490_s19 + $0xac] ss:$12 sps:$4 sm:$0xff]  }
 0x624   : > { %5275 = vmatpush3.bf16.msra.mxu0 %v5746_v16  ;;  %5290 = vmatprep.mubr.msk.bf16.mxu0 %vm6585_vm0, %v7811_v26  ;;  %v2801_v16 = vrot.slane %v2793_v47, %v7569_v35 }
 0x625   : > { %5276 = vmatprep.subr.bf16.mxu0 %v7811_v26  ;;  %3742 = vmatprep.subr.bf16.mxu1 %v5788_v57 }
 0x626   : > { %v2976_v1 = vadd.f32 %v2975_v11, %v2801_v16 }
 0x628   : > { %5277 = vmatpush3.bf16.msra.mxu0 %v5747_v54  ;;  %v3030_v54 = vrot.slane %v2795_v50, %v7569_v35 }
 0x629   : > { %5278 = vmatprep.subr.bf16.mxu0 %v7811_v26 }
 0x62c   : > { %5279 = vmatpush3.bf16.msra.mxu0 %v5748_v4 }
 0x62d   : > { %5280 = vmatprep.subr.bf16.mxu0 %v7811_v26 }
 0x630   : > { %5281 = vmatpush3.bf16.msra.mxu0 %v5749_v25  ;;  %v2980_v25 = vadd.f32 %v2979_v44, %v2801_v16 }
 0x631   : > { %5282 = vmatprep.subr.bf16.mxu0 %v7811_v26 }
 0x634   : > { %5283 = vmatpush3.bf16.msra.mxu0 %v5750_v33 }
 0x635   : > { %5284 = vmatprep.subr.bf16.mxu0 %v7811_v26 }
 0x638   : > { %5285 = vmatpush3.bf16.msra.mxu0 %v5751_v19 }
 0x639   : > { %5286 = vmatprep.subr.bf16.mxu0 %v7811_v26 }
 0x63c   : > { %5287 = vmatpush3.bf16.msra.mxu0 %v5752_v39  ;;  %v7577_v39 = vsub.s32 1, %v2799_v28 }
 0x63d   : > { %5288 = vmatprep.subr.bf16.mxu0 %v7811_v26 }
 0x640   : > { %5289 = vmatpush3.bf16.msra.mxu0 %v5753_v42 }
 0x641   : > { %5294 = vmatprep.subr.bf16.mxu0 %v7811_v26 }
 0x643   : > { %5291 = vmatmul.mubr.bf16.vlgmr.msra.gmra.mxu0 %v7395_v61  ;;  %v5777_v61 = vld [vmem:[%s7412_s2 + $0x38] ss:$12 sps:$4 sm:$0xff]   ;;  %s6587_s2 = smov [#allocation35]  }
 0x644   : > { %5295 = vmatpush3.bf16.msra.mxu0 %v5757_v15  ;;  %5310 = vmatprep.mubr.msk.bf16.mxu0 %vm6585_vm0, %v7811_v26 }
 0x645   : > { %5296 = vmatprep.subr.bf16.mxu0 %v7811_v26 }
 0x648   : > { %5297 = vmatpush3.bf16.msra.mxu0 %v5761_v17  ;;  %v2805_v17 = vrot.slane %v2793_v47, %v7577_v39 }
 0x649   : > { %5298 = vmatprep.subr.bf16.mxu0 %v7811_v26 }
 0x64c   : > { %5299 = vmatpush3.bf16.msra.mxu0 %v5765_v56  ;;  %v3034_v56 = vrot.slane %v2795_v50, %v7577_v39 }
 0x64d   : > { %5300 = vmatprep.subr.bf16.mxu0 %v7811_v26 }
 0x650   : > { %5301 = vmatpush3.bf16.msra.mxu0 %v5769_v55 }
 0x651   : > { %5302 = vmatprep.subr.bf16.mxu0 %v7811_v26 }
 0x654   : > { %5303 = vmatpush3.bf16.msra.mxu0 %v5773_v36 }
 0x655   : > { %5304 = vmatprep.subr.bf16.mxu0 %v7811_v26 }
 0x658   : > { %5305 = vmatpush3.bf16.msra.mxu0 %v5777_v61 }
 0x659   : > { %5306 = vmatprep.subr.bf16.mxu0 %v7811_v26 }
 0x65c   : > { %5307 = vmatpush3.bf16.msra.mxu0 %v5781_v12  ;;  %v2978_v12 = vadd.f32 %v2977_v34, %v2805_v17 }
 0x65d   : > { %5308 = vmatprep.subr.bf16.mxu0 %v7811_v26 }
 0x660   : > { %5309 = vmatpush3.bf16.msra.mxu0 %v5785_v22 }
 0x661   : > { %5314 = vmatprep.subr.bf16.mxu0 %v7811_v26 }
 0x6a3   : > { %v2627_v6 = vpop.f32.mrf.mxu0 }
 0x6a5   : > { %v5212_v62 = vpop.f32.mrf.mxu0 }
 0x6a7   : > { %v2630_v21 = vpop.f32.mrf.mxu0 }
 0x6a8   : > { %v3368_v2 = vpack.c.bf16 %v2630_v21, %v2627_v6 }
 0x6a9   : > { %v5213_v45 = vpop.f32.mrf.mxu0 }
 0x6aa   : > { %3546 = vmatmul.mubr.bf16.vlgmr.msra.gmra.mxu1 %v3368_v2  ;;  %5311 = vmatmul.mubr.bf16.vlgmr.msra.gmra.mxu0 %v3368_v2 }
 0x6ab   : > { %3743 = vmatpush1.bf16.msra.mxu1 %v5786_v18  ;;  %5315 = vmatpush3.bf16.msra.mxu0 %v5789_v63 }
 0x6ac   : > { %3744 = vmatprep.subr.bf16.mxu1 %v5792_v60  ;;  %5316 = vmatprep.subr.bf16.mxu0 %v7811_v26 }
 0x6ad   : > { %3774 = vmatprep.mubr.bf16.mxu1 %v6586_v52  ;;  %5330 = vmatprep.mubr.msk.bf16.mxu0 %vm6585_vm0, %v7811_v26  ;;  %v5801_v52 = vld [vmem:[%s7490_s19 + $0x68] ss:$12 sps:$4 sm:$0xff]   ;;  %s4179_s19 = sshll.u32 %s6587_s2, 4  ;;  %s4180_s19 = int_to_ptr.vmem [resolvable:$true] %s4179_s19 }
 0x6ae   : > { %s6405_s8 = scalar_lea.vmem %s4180_s19, 2048  ;;  %p6412_p12 = scmp.lt.s32.totalorder %s4180_s19, %s4180_s19 }
 0x6af   : > { %3745 = vmatpush1.bf16.msra.mxu1 %v5790_v5  ;;  %5317 = vmatpush3.bf16.msra.mxu0 %v5793_v23  ;;  %p6406_p13 = scmp.ne.s32.totalorder %s4180_s19, %s6405_s8  ;;  %p6413_p2 = scmp.lt.s32.totalorder %s6405_s8, %s6405_s8 }
 0x6b0   : > { %3746 = vmatprep.subr.bf16.mxu1 %v5796_v20  ;;  %5318 = vmatprep.subr.bf16.mxu0 %v7811_v26 }
 0x6b1   : > { %p6407_p9 = pnand %p6406_p13, %p5546_p10  ;;  %p6414_p1 = por %p6413_p2, %p6412_p12 }
 0x6b3   : > { %3747 = vmatpush1.bf16.msra.mxu1 %v5794_v7  ;;  %5319 = vmatpush3.bf16.msra.mxu0 %v5797_v29  ;;  %p6408_p11 = pneg %p6407_p9 }
 0x6b4   : > { %3748 = vmatprep.subr.bf16.mxu1 %v5800_v30  ;;  %5320 = vmatprep.subr.bf16.mxu0 %v7811_v26  ;;  %v7581_v30 = vsub.s32 2, %v2799_v28 }
 0x6b5   : > { %p6415_p3 = pnand %p6414_p1, %p6408_p11 }
 0x6b7   : > { %3749 = vmatpush1.bf16.msra.mxu1 %v5798_v49  ;;  %5321 = vmatpush3.bf16.msra.mxu0 %v5801_v52  ;;  %v2809_v52 = vrot.slane %v2793_v47, %v7581_v30 }
 0x6b8   : > { %3750 = vmatprep.subr.bf16.mxu1 %v5804_v40  ;;  %5322 = vmatprep.subr.bf16.mxu0 %v7811_v26  ;;  %v3038_v40 = vrot.slane %v2795_v50, %v7581_v30 }
 0x6bb   : > { %3751 = vmatpush1.bf16.msra.mxu1 %v5802_v8  ;;  %5323 = vmatpush3.bf16.msra.mxu0 %v5805_v32 }
 0x6bc   : > { %3752 = vmatprep.subr.bf16.mxu1 %v5808_v37  ;;  %5324 = vmatprep.subr.bf16.mxu0 %v7811_v26 }
 0x6bf   : > { %3753 = vmatpush1.bf16.msra.mxu1 %v5806_v9  ;;  %5325 = vmatpush3.bf16.msra.mxu0 %v5809_v43 }
 0x6c0   : > { %3754 = vmatprep.subr.bf16.mxu1 %v5812_v24  ;;  %5326 = vmatprep.subr.bf16.mxu0 %v7811_v26 }
 0x6c3   : > { %v7553_v59 = vpop.f32.mrf.mxu0  ;;  %3755 = vmatpush1.bf16.msra.mxu1 %v5810_v3  ;;  %5327 = vmatpush3.bf16.msra.mxu0 %v5813_v10 }
 0x6c4   : > { %3756 = vmatprep.subr.bf16.mxu1 %v5816_v51  ;;  %5328 = vmatprep.subr.bf16.mxu0 %v7811_v26  ;;  %v2981_v26 = vpop.f32.mrf.mxu1 }
 0x6c5   : > { %v5252_v53 = vpop.f32.mrf.mxu0  ;;  %v2982_v21 = vadd.f32 %v2981_v26, %v2805_v17 }
 0x6c6   : > { %v3204_v46 = vpop.f32.mrf.mxu1 }
 0x6c7   : > { %v7558_v27 = vpop.f32.mrf.mxu0  ;;  %3757 = vmatpush1.bf16.msra.mxu1 %v5814_v0  ;;  %5329 = vmatpush3.bf16.msra.mxu0 %v5817_v58  ;;  %v3205_v4 = vadd.f32 %v3204_v46, %v3030_v54 }
 0x6c8   : > { %v3597_v38 = vpack.c.bf16 %v7558_v27, %v7553_v59  ;;  %v3206_v14 = vpop.f32.mrf.mxu1 }
 0x6c9   : > { %v5253_v31 = vpop.f32.mrf.mxu0  ;;  %v3254_v33 = vadd.f32 %v3205_v4, %v2976_v1  ;;  %v3207_v22 = vadd.f32 %v3206_v14, %v3034_v56 }
 0x6ca   : > { %3775 = vmatmul.mubr.bf16.vlgmr.msra.gmra.mxu1 %v3597_v38  ;;  %5331 = vmatmul.mubr.bf16.vlgmr.msra.gmra.mxu0 %v3597_v38  ;;  %v3208_v57 = vpop.f32.mrf.mxu1 }
 0x6cb   : > { %v3209_v19 = vadd.f32 %v3208_v57, %v3030_v54  ;;  %v4654_v42 = vmul.f32 -1.442695, %v3254_v33  ;;  %v3268_v2 = vadd.f32 %v3207_v22, %v2978_v12 }
 0x6cc   : > { %v3210_v6 = vpop.f32.mrf.mxu1 }
 0x6cd   : > { %v3255_v15 = vadd.f32 %v3209_v19, %v2980_v25  ;;  %5818 = vpow2.f32 %v4654_v42  ;;  %v3211_v18 = vadd.f32 %v3210_v6, %v3034_v56  ;;  %v4656_v45 = vmul.f32 -1.442695, %v3268_v2  ;;  %v3879_v19 = vpop.trf.xlu0  ;;  %v3367_v2 = vld [vmem:[%s3366_s27] sm:$0x7] }
 0x6ce   : > { %5336 = vmatprep.mubr.msk.bf16.mxu1 %vm3887_vm1, %v3879_v19  ;;  %5354 = vmatprep.mubr.msk.bf16.mxu0 %vm3887_vm1, %v3879_v19 }
 0x6cf   : > { %v4655_v55 = vmul.f32 -1.442695, %v3255_v15  ;;  %v3269_v60 = vadd.f32 %v3211_v18, %v2982_v21  ;;  %v3365_v18 = vld [vmem:[%s3364_s17] sm:$0x7] }
 0x6d1   : > { %5820 = vpow2.f32 %v4655_v55  ;;  %v4657_v23 = vmul.f32 -1.442695, %v3269_v60  ;;  %v7589_v15 = vpop.trf.xlu0  ;;  %v3373_v60 = vrot.slane %v3365_v18, %v7569_v35 }
 0x6d2   : > { %5822 = vpow2.f32 %v4656_v45  ;;  %v3602_v45 = vrot.slane %v3367_v2, %v7569_v35 }
 0x6d3   : > { %5824 = vpow2.f32 %v4657_v23 }
 0x6d5   : > { %v7595_v17 = vpop.trf.xlu0 }
 0x6da   : > { %v5819_v5 = vpop.eup %5818 }
 0x6db   : > { %v3262_v20 = vadd.f32 1.0, %v5819_v5 }
 0x6dd   : > { %5826 = vrcp.f32 %v3262_v20 }
 0x6de   : > { %v5821_v7 = vpop.eup %5820 }
 0x6df   : > { %v3263_v29 = vadd.f32 1.0, %v5821_v7  ;;  %v5823_v49 = vpop.eup %5822 }
 0x6e0   : > { %v5825_v8 = vpop.eup %5824  ;;  %v3276_v32 = vadd.f32 1.0, %v5823_v49  ;;  %v3606_v49 = vrot.slane %v3367_v2, %v7577_v39 }
 0x6e1   : > { %5828 = vrcp.f32 %v3263_v29  ;;  %v3277_v3 = vadd.f32 1.0, %v5825_v8  ;;  %v3377_v8 = vrot.slane %v3365_v18, %v7577_v39 }
 0x6e2   : > { %5830 = vrcp.f32 %v3276_v32 }
 0x6e3   : > { %v3018_v36 = vpop.f32.mrf.mxu0  ;;  %5832 = vrcp.f32 %v3277_v3 }
 0x6e4   : > { %v3019_v43 = vadd.f32 %v3018_v36, %v2809_v52 }
 0x6e5   : > { %v5272_v61 = vpop.f32.mrf.mxu0 }
 0x6e7   : > { %v3021_v62 = vpop.f32.mrf.mxu0 }
 0x6e8   : > { %v3022_v58 = vadd.f32 %v3021_v62, %v2809_v52 }
 0x6e9   : > { %v5273_v63 = vpop.f32.mrf.mxu0 }
 0x6ea   : > { %v5827_v37 = vpop.eup %5826 }
 0x6ee   : > { %v5829_v11 = vpop.eup %5828 }
 0x6ef   : > { %v5831_v31 = vpop.eup %5830 }
 0x6f0   : > { %v3288_v28 = vsub.f32 1.0, %v5831_v31  ;;  %v5833_v26 = vpop.eup %5832  ;;  %v3292_v16 = vmul.f32 %v5831_v31, %v7388_v48 }
 0x6f1   : > { %v3289_v50 = vsub.f32 1.0, %v5833_v26  ;;  %v3293_v1 = vmul.f32 %v5833_v26, %v7391_v13 }
 0x703   : > { %v3247_v9 = vpop.f32.mrf.mxu0 }
 0x704   : > { %v3248_v24 = vadd.f32 %v3247_v9, %v3038_v40 }
 0x705   : > { %v5292_v10 = vpop.f32.mrf.mxu0 }
 0x706   : > { %v3282_v51 = vmul.f32 %v5827_v37, %v3248_v24 }
 0x707   : > { %v3250_v0 = vpop.f32.mrf.mxu0 }
 0x708   : > { %v3284_v34 = vadd.f32 %v3282_v51, %v3019_v43  ;;  %v3251_v53 = vadd.f32 %v3250_v0, %v3038_v40 }
 0x709   : > { %v5293_v41 = vpop.f32.mrf.mxu0 }
 0x70a   : > { %5834 = vtanh.f32 %v3284_v34  ;;  %v3283_v38 = vmul.f32 %v5829_v11, %v3251_v53 }
 0x70c   : > { %v3285_v44 = vadd.f32 %v3283_v38, %v3022_v58 }
 0x70e   : > { %5836 = vtanh.f32 %v3285_v44 }
 0x717   : > { %v5835_v47 = vpop.eup %5834 }
 0x718   : > { %v3290_v46 = vmul.f32 %v5835_v47, %v3288_v28 }
 0x71a   : > { %v3294_v4 = vadd.f32 %v3292_v16, %v3290_v46  ;;  %v3610_v46 = vrot.slane %v3367_v2, %v7581_v30 }
 0x71b   : > { %v5837_v54 = vpop.eup %5836 }
 0x71c   : > { %v3291_v14 = vmul.f32 %v5837_v54, %v3289_v50  ;;  %v3868_v25 = vsub.f32 %v3294_v4, %v7388_v48  ;;  %v7599_v48 = vpop.trf.xlu0  ;;  %v3381_v54 = vrot.slane %v3365_v18, %v7581_v30 }
 0x71e   : > { %v3295_v57 = vadd.f32 %v3293_v1, %v3291_v14 }
 0x720   : > { %v3869_v33 = vsub.f32 %v3295_v57, %v7391_v13  ;;  %v3883_v13 = vpop.trf.xlu0 }
 0x722   : > { %v3870_v42 = vpack.c.bf16 %v3869_v33, %v3868_v25 }
 0x724   : > { %5334 = vmatprep.subr.bf16.mxu1 %v3870_v42  ;;  %v7604_v56 = vpop.trf.xlu0 }
 0x725   : > { %5335 = vmatpush3.bf16.msra.mxu1 %v3870_v42 }
 0x728   : > { %5337 = vmatmul.mubr.msk.bf16.vlgmr.msra.gmra.mxu1 %vm3887_vm1, %v7589_v15  ;;  %v7608_v55 = vpop.trf.xlu0 }
 0x729   : > { %5340 = vmatprep.mubr.msk.bf16.mxu1 %vm3887_vm1, %v7595_v17 }
 0x72c   : > { %v7612_v36 = vpop.trf.xlu0 }
 0x730   : > { %5341 = vmatmul.mubr.msk.bf16.gmra.mxu1 %vm3887_vm1, %v7599_v48 }
 0x731   : > { %5344 = vmatprep.mubr.msk.bf16.mxu1 %vm3887_vm1, %v3883_v13 }
 0x738   : > { %5345 = vmatmul.mubr.msk.bf16.gmra.mxu1 %vm3887_vm1, %v7604_v56 }
 0x739   : > { %5348 = vmatprep.mubr.msk.bf16.mxu1 %vm3887_vm1, %v7608_v55 }
 0x740   : > { %5349 = vmatmul.mubr.msk.bf16.gmra.mxu1 %vm3887_vm1, %v7612_v36 }
 0x741   : > { %5362 = vmatprep.mubr.msk.bf16.mxu1 %vm3887_vm1, %v3883_v13 }
 0x76a   : > { %v3590_v61 = vpop.f32.mrf.mxu0  ;;  %v3547_v62 = vpop.f32.mrf.mxu1 }
 0x76b   : > { %v3548_v7 = vadd.f32 %v3547_v62, %v3373_v60  ;;  %v3591_v25 = vadd.f32 %v3590_v61, %v3381_v54 }
 0x76c   : > { %v5312_v12 = vpop.f32.mrf.mxu0  ;;  %v3549_v21 = vpop.f32.mrf.mxu1 }
 0x76d   : > { %v3550_v11 = vadd.f32 %v3549_v21, %v3377_v8 }
 0x76e   : > { %v7617_v22 = vpop.f32.mrf.mxu0  ;;  %v3551_v63 = vpop.f32.mrf.mxu1 }
 0x76f   : > { %v3552_v43 = vadd.f32 %v3551_v63, %v3373_v60  ;;  %v3594_v12 = vadd.f32 %v7617_v22, %v3381_v54 }
 0x770   : > { %v5313_v6 = vpop.f32.mrf.mxu0  ;;  %v3553_v5 = vpop.f32.mrf.mxu1 }
 0x771   : > { %v3554_v41 = vadd.f32 %v3553_v5, %v3377_v8 }
 0x78a   : > { %v3776_v23 = vpop.f32.mrf.mxu1  ;;  %v3819_v20 = vpop.f32.mrf.mxu0 }
 0x78b   : > { %v3777_v29 = vadd.f32 %v3776_v23, %v3602_v45  ;;  %v3820_v1 = vadd.f32 %v3819_v20, %v3610_v46 }
 0x78c   : > { %v3778_v52 = vpop.f32.mrf.mxu1  ;;  %v5332_v40 = vpop.f32.mrf.mxu0 }
 0x78d   : > { %v3826_v32 = vadd.f32 %v3777_v29, %v3548_v7  ;;  %v3779_v3 = vadd.f32 %v3778_v52, %v3606_v49 }
 0x78e   : > { %v3780_v37 = vpop.f32.mrf.mxu1  ;;  %v3822_v9 = vpop.f32.mrf.mxu0 }
 0x78f   : > { %v4708_v24 = vmul.f32 -1.442695, %v3826_v32  ;;  %v3781_v10 = vadd.f32 %v3780_v37, %v3602_v45  ;;  %v3840_v34 = vadd.f32 %v3779_v3, %v3550_v11  ;;  %v3823_v42 = vadd.f32 %v3822_v9, %v3610_v46  ;;  %v5861_v32 = vld [vmem:[#allocation35 + $0x18] sm:$0xff]  ;;  %v5864_v3 = vld [vmem:[#allocation35 + $0x20] sm:$0xff]  ;;  %v5870_v46 = vld [vmem:[#allocation35 + $0x48] sm:$0xff] }
 0x790   : > { %v3782_v51 = vpop.f32.mrf.mxu1  ;;  %v5333_v35 = vpop.f32.mrf.mxu0 }
 0x791   : > { %5838 = vpow2.f32 %v4708_v24  ;;  %v3827_v0 = vadd.f32 %v3781_v10, %v3552_v43  ;;  %v3783_v58 = vadd.f32 %v3782_v51, %v3606_v49  ;;  %v4710_v44 = vmul.f32 -1.442695, %v3840_v34  ;;  %v5865_v35 = vld [vmem:[#allocation35 + $0x38] sm:$0xff] }
 0x793   : > { %v4709_v53 = vmul.f32 -1.442695, %v3827_v0  ;;  %v3841_v38 = vadd.f32 %v3783_v58, %v3554_v41  ;;  %v5866_v58 = vld [vmem:[#allocation35 + $0x28] sm:$0xff]  ;;  %v5867_v41 = vld [vmem:[#allocation35 + $0x50] sm:$0xff] }
 0x795   : > { %5840 = vpow2.f32 %v4709_v53  ;;  %v4711_v39 = vmul.f32 -1.442695, %v3841_v38 }
 0x796   : > { %5842 = vpow2.f32 %v4710_v44 }
 0x797   : > { %5844 = vpow2.f32 %v4711_v39  ;;  %v5868_v39 = vld [vmem:[#allocation35 + $0x40] sm:$0xff] }
 0x79e   : > { %v5839_v31 = vpop.eup %5838 }
 0x79f   : > { %v3834_v28 = vadd.f32 1.0, %v5839_v31 }
 0x7a1   : > { %5846 = vrcp.f32 %v3834_v28 }
 0x7a2   : > { %v5841_v26 = vpop.eup %5840 }
 0x7a3   : > { %v3835_v47 = vadd.f32 1.0, %v5841_v26  ;;  %v5843_v50 = vpop.eup %5842  ;;  %v5869_v26 = vld [vmem:[#allocation35 + $0x58] sm:$0xff] }
 0x7a4   : > { %v5845_v16 = vpop.eup %5844  ;;  %v3848_v14 = vadd.f32 1.0, %v5843_v50 }
 0x7a5   : > { %5848 = vrcp.f32 %v3835_v47  ;;  %v3849_v57 = vadd.f32 1.0, %v5845_v16 }
 0x7a6   : > { %5850 = vrcp.f32 %v3848_v14  ;;  %v5871_v14 = vld [vmem:[#allocation35 + $0x70] sm:$0xff] }
 0x7a7   : > { %5852 = vrcp.f32 %v3849_v57 }
 0x7ae   : > { %v5847_v4 = vpop.eup %5846 }
 0x7af   : > { %v3854_v33 = vmul.f32 %v5847_v4, %v3820_v1 }
 0x7b1   : > { %v3856_v19 = vadd.f32 %v3854_v33, %v3591_v25  ;;  %v5872_v33 = vld [vmem:[#allocation35 + $0x60] sm:$0xff] }
 0x7b2   : > { %v5849_v13 = vpop.eup %5848 }
 0x7b3   : > { %5854 = vtanh.f32 %v3856_v19  ;;  %v3855_v6 = vmul.f32 %v5849_v13, %v3823_v42  ;;  %v5851_v21 = vpop.eup %5850  ;;  %v5873_v42 = vld [vmem:[#allocation35 + $0x78] sm:$0xff] }
 0x7b4   : > { %v5853_v63 = vpop.eup %5852  ;;  %v3860_v30 = vsub.f32 1.0, %v5851_v21  ;;  %v3864_v61 = vmul.f32 %v5851_v21, %v7553_v59 }
 0x7b5   : > { %v3857_v62 = vadd.f32 %v3855_v6, %v3594_v12  ;;  %v3861_v60 = vsub.f32 1.0, %v5853_v63  ;;  %v3865_v23 = vmul.f32 %v5853_v63, %v7558_v27  ;;  %v5874_v12 = vld [vmem:[#allocation35 + $0x68] sm:$0xff] }
 0x7b7   : > { %5856 = vtanh.f32 %v3857_v62 }
 0x7c0   : > { %v5855_v18 = vpop.eup %5854 }
 0x7c1   : > { %v3862_v2 = vmul.f32 %v5855_v18, %v3860_v30 }
 0x7c3   : > { %v3866_v20 = vadd.f32 %v3864_v61, %v3862_v2 }
 0x7c4   : > { %v5857_v45 = vpop.eup %5856 }
 0x7c5   : > { %v3863_v5 = vmul.f32 %v5857_v45, %v3861_v60  ;;  %v4041_v22 = vsub.f32 %v3866_v20, %v7553_v59 }
 0x7c7   : > { %v3867_v7 = vadd.f32 %v3865_v23, %v3863_v5 }
 0x7c9   : > { %v4042_v29 = vsub.f32 %v3867_v7, %v7558_v27  ;;  %v5859_v27 = vld [vmem:[#allocation35 + $0x10] sm:$0xff] }
 0x7cb   : > { %v4043_v49 = vpack.c.bf16 %v4042_v29, %v4041_v22 }
 0x7cd   : > { %5352 = vmatprep.subr.bf16.mxu0 %v4043_v49  ;;  %5370 = vmatprep.subr.bf16.mxu1 %v4043_v49 }
 0x7ce   : > { %5353 = vmatpush3.bf16.msra.mxu0 %v4043_v49  ;;  %5371 = vmatpush3.bf16.msra.mxu1 %v4043_v49 }
 0x7d1   : > { %5355 = vmatmul.mubr.msk.bf16.vlgmr.msra.gmra.mxu0 %vm3887_vm1, %v7589_v15  ;;  %5363 = vmatmul.mubr.msk.bf16.vlgmr.msra.gmra.mxu1 %vm3887_vm1, %v7604_v56  ;;  %v5860_v15 = vld [vmem:[#allocation35] sm:$0xff] }
 0x7d2   : > { %5358 = vmatprep.mubr.msk.bf16.mxu0 %vm3887_vm1, %v7595_v17  ;;  %5366 = vmatprep.mubr.msk.bf16.mxu1 %vm3887_vm1, %v7608_v55  ;;  %v5862_v55 = vld [vmem:[#allocation35 + $0x8] sm:$0xff] }
 0x7d9   : > { %5359 = vmatmul.mubr.msk.bf16.gmra.mxu0 %vm3887_vm1, %v7599_v48  ;;  %5367 = vmatmul.mubr.msk.bf16.gmra.mxu1 %vm3887_vm1, %v7612_v36  ;;  %v5863_v48 = vld [vmem:[#allocation35 + $0x30] sm:$0xff] }
 0x7e8   : > { %v5338_v59 = vpop.f32.mrf.mxu1 }
 0x7e9   : > { %v4011_v52 = vadd.f32 %v5859_v27, %v5338_v59 }
 0x7ea   : > { %v3946_v40 = vpop.f32.mrf.mxu1 }
 0x7eb   : > { %4027 = vst [vmem:[#allocation35 + $0x10] sm:$0xff] %v4011_v52  ;;  %v4009_v8 = vadd.f32 %v5860_v15, %v3946_v40 }
 0x7ec   : > { %v5339_v56 = vpop.f32.mrf.mxu1 }
 0x7ed   : > { %4025 = vst [vmem:[#allocation35] sm:$0xff] %v4009_v8  ;;  %v4012_v17 = vadd.f32 %v5861_v32, %v5339_v56 }
 0x7ee   : > { %v3949_v37 = vpop.f32.mrf.mxu1 }
 0x7ef   : > { %4028 = vst [vmem:[#allocation35 + $0x18] sm:$0xff] %v4012_v17  ;;  %v4010_v9 = vadd.f32 %v5862_v55, %v3949_v37 }
 0x7f0   : > { %v5342_v43 = vpop.f32.mrf.mxu1 }
 0x7f1   : > { %4026 = vst [vmem:[#allocation35 + $0x8] sm:$0xff] %v4010_v9  ;;  %v4015_v24 = vadd.f32 %v5863_v48, %v5342_v43 }
 0x7f2   : > { %v3962_v36 = vpop.f32.mrf.mxu1 }
 0x7f3   : > { %4031 = vst [vmem:[#allocation35 + $0x30] sm:$0xff] %v4015_v24  ;;  %v4013_v10 = vadd.f32 %v5864_v3, %v3962_v36 }
 0x7f4   : > { %v5343_v51 = vpop.f32.mrf.mxu1 }
 0x7f5   : > { %4029 = vst [vmem:[#allocation35 + $0x20] sm:$0xff] %v4013_v10  ;;  %v4016_v11 = vadd.f32 %v5865_v35, %v5343_v51 }
 0x7f6   : > { %v3965_v0 = vpop.f32.mrf.mxu1 }
 0x7f7   : > { %4032 = vst [vmem:[#allocation35 + $0x38] sm:$0xff] %v4016_v11  ;;  %v4014_v34 = vadd.f32 %v5866_v58, %v3965_v0 }
 0x7f8   : > { %v5346_v53 = vpop.f32.mrf.mxu1 }
 0x7f9   : > { %4030 = vst [vmem:[#allocation35 + $0x28] sm:$0xff] %v4014_v34  ;;  %v4019_v38 = vadd.f32 %v5867_v41, %v5346_v53 }
 0x7fa   : > { %v3978_v44 = vpop.f32.mrf.mxu1 }
 0x7fb   : > { %4035 = vst [vmem:[#allocation35 + $0x50] sm:$0xff] %v4019_v38  ;;  %v4017_v31 = vadd.f32 %v5868_v39, %v3978_v44 }
 0x7fc   : > { %v5347_v28 = vpop.f32.mrf.mxu1 }
 0x7fd   : > { %4033 = vst [vmem:[#allocation35 + $0x40] sm:$0xff] %v4017_v31  ;;  %v4020_v47 = vadd.f32 %v5869_v26, %v5347_v28 }
 0x7fe   : > { %v3981_v50 = vpop.f32.mrf.mxu1 }
 0x7ff   : > { %4036 = vst [vmem:[#allocation35 + $0x58] sm:$0xff] %v4020_v47  ;;  %v4018_v16 = vadd.f32 %v5870_v46, %v3981_v50 }
 0x800   : > { %v5350_v54 = vpop.f32.mrf.mxu1 }
 0x801   : > { %4034 = vst [vmem:[#allocation35 + $0x48] sm:$0xff] %v4018_v16  ;;  %v4023_v1 = vadd.f32 %v5871_v14, %v5350_v54 }
 0x802   : > { %v3994_v4 = vpop.f32.mrf.mxu1 }
 0x803   : > { %4039 = vst [vmem:[#allocation35 + $0x70] sm:$0xff] %v4023_v1  ;;  %v4021_v19 = vadd.f32 %v5872_v33, %v3994_v4 }
 0x804   : > { %v5351_v57 = vpop.f32.mrf.mxu1 }
 0x805   : > { %v4024_v13 = vadd.f32 %v5873_v42, %v5351_v57  ;;  %4037 = vst [vmem:[#allocation35 + $0x60] sm:$0xff] %v4021_v19 }
 0x806   : > { %v3997_v25 = vpop.f32.mrf.mxu1 }
 0x807   : > { %v4022_v6 = vadd.f32 %v5874_v12, %v3997_v25  ;;  %4040 = vst [vmem:[#allocation35 + $0x78] sm:$0xff] %v4024_v13 }
 0x809   : > { %4038 = vst [vmem:[#allocation35 + $0x68] sm:$0xff] %v4022_v6 }
 0x80a   : > { %6418 = shalt.err (!%p6415_p3)
}
 0x80b   : > { %s6588_s30 = smov 128   ;;  %s6589_s13 = smov 8   ;;  %v5875_v63 = vld [vmem:[#allocation36 + $0x10] sm:$0xff]  ;;  %v5877_v45 = vld [vmem:[#allocation36] sm:$0xff]  ;;  %v5879_v29 = vld [vmem:[#allocation36 + $0x18] sm:$0xff] }
 0x80c   : > { %s7818_s14 = sld [smem:[#allocation73_spill]]  ;;  %v5876_v18 = vld [vmem:[#allocation36 + $0x50] sm:$0xff]  ;;  %v5878_v23 = vld [vmem:[#allocation36 + $0x40] sm:$0xff]  ;;  %v5880_v59 = vld [vmem:[#allocation36 + $0x58] sm:$0xff]  ;;  %s6590_s25 = smov [#allocation36]  }
 0x80d   : > { %v5881_v15 = vld [vmem:[#allocation36 + $0x8] sm:$0xff]  ;;  %v5883_v55 = vld [vmem:[#allocation36 + $0x30] sm:$0xff]  ;;  %v5885_v3 = vld [vmem:[#allocation36 + $0x20] sm:$0xff]  ;;  %s4192_s22 = sshll.u32 %s6590_s25, 4  ;;  %s4193_s22 = int_to_ptr.vmem [resolvable:$true] %s4192_s22 }
 0x80e   : > { %v5882_v56 = vld [vmem:[#allocation36 + $0x48] sm:$0xff]  ;;  %v5884_v43 = vld [vmem:[#allocation36 + $0x70] sm:$0xff]  ;;  %v5886_v51 = vld [vmem:[#allocation36 + $0x60] sm:$0xff]  ;;  %s6429_s4 = scalar_lea.vmem %s4193_s22, 2048  ;;  %p6436_p4 = scmp.lt.s32.totalorder %s4193_s22, %s4193_s22 }
 0x80f   : > { %v5887_v58 = vld [vmem:[#allocation36 + $0x38] sm:$0xff]  ;;  %v5889_v39 = vld [vmem:[#allocation36 + $0x28] sm:$0xff]  ;;  %p6430_p6 = scmp.ne.s32.totalorder %s4193_s22, %s6429_s4  ;;  %p6437_p7 = scmp.lt.s32.totalorder %s6429_s4, %s6429_s4 }
 0x810   : > { %v5888_v53 = vld [vmem:[#allocation36 + $0x78] sm:$0xff]  ;;  %v5890_v28 = vld [vmem:[#allocation36 + $0x68] sm:$0xff] }
 0x811   : > { %p6431_p5 = pnand %p6430_p6, %p5546_p10  ;;  %p6438_p8 = por %p6437_p7, %p6436_p4 }
 0x812   : > { %5445 = dma.vmem_to_hbm [thread:$0]  (%p5546_p10), %s4180_s19, 2048, %s7818_s14, [#allocation7], %s6588_s30, %s6588_s30, %s6589_s13  }
 0x813   : > { %p6432_p0 = pneg %p6431_p5 }
 0x815   : > { %p6439_p13 = pnand %p6438_p8, %p6432_p0 }
 0x891   : > { %v5356_v62 = vpop.f32.mrf.mxu0  ;;  %v5364_v21 = vpop.f32.mrf.mxu1 }
 0x892   : > { %v4143_v30 = vadd.f32 %v5875_v63, %v5356_v62  ;;  %v4151_v2 = vadd.f32 %v5876_v18, %v5364_v21 }
 0x893   : > { %v4078_v60 = vpop.f32.mrf.mxu0  ;;  %v4110_v61 = vpop.f32.mrf.mxu1 }
 0x894   : > { %4159 = vst [vmem:[#allocation36 + $0x10] sm:$0xff] %v4143_v30  ;;  %v4141_v5 = vadd.f32 %v5877_v45, %v4078_v60  ;;  %4167 = vst [vmem:[#allocation36 + $0x50] sm:$0xff] %v4151_v2  ;;  %v4149_v20 = vadd.f32 %v5878_v23, %v4110_v61 }
 0x895   : > { %v5357_v7 = vpop.f32.mrf.mxu0  ;;  %v5365_v22 = vpop.f32.mrf.mxu1 }
 0x896   : > { %4157 = vst [vmem:[#allocation36] sm:$0xff] %v4141_v5  ;;  %v4144_v49 = vadd.f32 %v5879_v29, %v5357_v7  ;;  %4165 = vst [vmem:[#allocation36 + $0x40] sm:$0xff] %v4149_v20  ;;  %v4152_v27 = vadd.f32 %v5880_v59, %v5365_v22 }
 0x897   : > { %v4081_v52 = vpop.f32.mrf.mxu0  ;;  %v4113_v40 = vpop.f32.mrf.mxu1 }
 0x898   : > { %4160 = vst [vmem:[#allocation36 + $0x18] sm:$0xff] %v4144_v49  ;;  %v4142_v8 = vadd.f32 %v5881_v15, %v4081_v52  ;;  %4168 = vst [vmem:[#allocation36 + $0x58] sm:$0xff] %v4152_v27  ;;  %v4150_v32 = vadd.f32 %v5882_v56, %v4113_v40 }
 0x899   : > { %v5360_v17 = vpop.f32.mrf.mxu0  ;;  %v5368_v37 = vpop.f32.mrf.mxu1 }
 0x89a   : > { %4158 = vst [vmem:[#allocation36 + $0x8] sm:$0xff] %v4142_v8  ;;  %v4147_v9 = vadd.f32 %v5883_v55, %v5360_v17  ;;  %4166 = vst [vmem:[#allocation36 + $0x48] sm:$0xff] %v4150_v32  ;;  %v4155_v48 = vadd.f32 %v5884_v43, %v5368_v37 }
 0x89b   : > { %v4094_v24 = vpop.f32.mrf.mxu0  ;;  %v4126_v36 = vpop.f32.mrf.mxu1 }
 0x89c   : > { %4163 = vst [vmem:[#allocation36 + $0x30] sm:$0xff] %v4147_v9  ;;  %v4145_v10 = vadd.f32 %v5885_v3, %v4094_v24  ;;  %4171 = vst [vmem:[#allocation36 + $0x70] sm:$0xff] %v4155_v48  ;;  %v4153_v35 = vadd.f32 %v5886_v51, %v4126_v36 }
 0x89d   : > { %v5361_v11 = vpop.f32.mrf.mxu0  ;;  %v5369_v0 = vpop.f32.mrf.mxu1 }
 0x89e   : > { %4161 = vst [vmem:[#allocation36 + $0x20] sm:$0xff] %v4145_v10  ;;  %v4148_v34 = vadd.f32 %v5887_v58, %v5361_v11  ;;  %4169 = vst [vmem:[#allocation36 + $0x60] sm:$0xff] %v4153_v35  ;;  %v4156_v41 = vadd.f32 %v5888_v53, %v5369_v0 }
 0x89f   : > { %v4097_v38 = vpop.f32.mrf.mxu0  ;;  %v4129_v44 = vpop.f32.mrf.mxu1 }
 0x8a0   : > { %4164 = vst [vmem:[#allocation36 + $0x38] sm:$0xff] %v4148_v34  ;;  %v4146_v31 = vadd.f32 %v5889_v39, %v4097_v38  ;;  %4172 = vst [vmem:[#allocation36 + $0x78] sm:$0xff] %v4156_v41  ;;  %v4154_v26 = vadd.f32 %v5890_v28, %v4129_v44 }
 0x8a2   : > { %4162 = vst [vmem:[#allocation36 + $0x28] sm:$0xff] %v4146_v31  ;;  %4170 = vst [vmem:[#allocation36 + $0x68] sm:$0xff] %v4154_v26 }
 0x8a3   : > { %6442 = shalt.err (!%p6439_p13)
}
 0x8a4   : > { %s7819_s15 = sld [smem:[#allocation74_spill]] }
 0x8aa   : > { %5447 = dma.vmem_to_hbm [thread:$0]  (%p5546_p10), %s4193_s22, 2048, %s7819_s15, [#allocation37], %s6588_s30, %s6588_s30, %s6589_s13  }
 0x8ab   : > { %6524 = dma.done.wait (%p5546_p10), [#allocation7], 2048  }
 0x8ac   : > { %6526 = vsyncadd (%p5546_p10), [#allocation7], 4294965248 }
 0x8ad   : > { %6528 = dma.done.wait (%p5546_p10), [#allocation37], 2048  }
 0x8ae   : > { %6530 = vsyncadd (%p5546_p10), [#allocation37], 4294965248 }
 0x8af PF: > { %s61_s29 = sadd.s32 1, %s6553_s29   ;;  %s7820_s22 = smov %s6537_s1 }
 0x8b0   : > { %p58_p9 = scmp.ge.s32.totalorder %s61_s29, 10   ;;  %s7821_s1 = smov %s6541_s11 }
 0x8b1   : > { %s7822_s11 = smov %s6985_s9  ;;  %s7823_s0 = smov %s6549_s12 }
 0x8b2   : > { %s7824_s12 = smov %s7826_s5  ;;  %60 = sbr.rel (!%p58_p9) target bundleno = 51 (0x33), region = 271 }
 0x8b7   :  { %4212 = vsyncpa [#allocation6], 1 }
 0x8b8   :  { %4214 = vsyncpa [#allocation6 + $0x1], 1 }
 0x8b9   :  { %4215 = vsyncpa [#allocation9], 1 }
 0x8ba   :  { %4217 = vsyncpa [#allocation9 + $0x1], 1 }
 0x8bb   :  { %4218 = vsyncpa [#allocation12], 1 }
 0x8bc   :  { %4219 = vsyncpa [#allocation15], 1 }
 0x8bd   :  { %4220 = vsyncpa [#allocation18], 1 }
 0x8be   :  { %4221 = vsyncpa [#allocation21], 1 }
 0x8bf   :  { %4222 = vsyncpa [#allocation24], 1 }
 0x8c0   :  { %4223 = vsyncpa [#allocation27], 1 }
 0x8c1   :  { %4224 = vsyncpa [#allocation30], 1 }
 0x8c2   :  { %4225 = vsyncpa [#allocation33], 1 }
 0x8c3   :  { %4226 = vsyncpa [#allocation7], 1 }
 0x8c4   :  { %4228 = vsyncpa [#allocation7 + $0x1], 1 }
 0x8c5   :  { %4229 = vsyncpa [#allocation37], 1 }

</bundles_post_ra>
